<compile_context>
chip_gen: v7x
topology: tpu7x:2x2x1
jax: 0.10.0
libtpu: 0.0.40
codegen_flags: <defaults>
</compile_context>

<pallas_src>
import jax
import jax.numpy as jnp
import numpy as np
from jax.experimental import pallas as pl
from jax.experimental.pallas import tpu as pltpu

KSIZE = 5
N_LANE = 128  # padded output-channel lanes used for in-kernel compute


# ---------------------------------------------------------------------------
# Pallas kernels
# ---------------------------------------------------------------------------
def _conv_block_kernel(x_ref, w_ref, b_ref, o_ref):
    """Fused conv (one im2col matmul) + bias + ReLU + 2x2 maxpool.

    x_ref : (nb, 4*P, K)   bf16 im2col patches, pool-corner-major row order
    w_ref : (K, 128)       bf16 packed conv weights (real Cout in low lanes)
    b_ref : (1, 128)       f32 bias (padded with zeros)
    o_ref : (nb, P, Cout)  f32 pooled output (only the real channels stored)
    """
    nb, r, k = x_ref.shape
    p = r // 4
    cout = o_ref.shape[-1]

    x = x_ref[...].reshape(nb * r, k)                     # layout no-op (r % 16 == 0)
    y = jnp.dot(x, w_ref[...], preferred_element_type=jnp.float32)   # MXU, f32 acc
    y = jnp.maximum(y + b_ref[...], 0.0)                  # bias + ReLU (VPU)

    y4 = y.reshape(nb, 4, p, 128)                         # layout no-op (p % 8 == 0)
    pooled = jnp.maximum(jnp.maximum(y4[:, 0], y4[:, 1]),
                         jnp.maximum(y4[:, 2], y4[:, 3]))  # 2x2 maxpool on the VPU
    o_ref[...] = pooled[:, :, :cout]                      # store real channels only


def _linear_kernel(x_ref, w_ref, b_ref, o_ref):
    x = x_ref[...].astype(jnp.bfloat16)                   # bf16 MXU operands
    o_ref[...] = (jnp.dot(x, w_ref[...], preferred_element_type=jnp.float32)
                  + b_ref[...])


# ---------------------------------------------------------------------------
# pallas_call wrappers
# ---------------------------------------------------------------------------
def conv_block(patches, w, b, *, cout, nb):
    bsz, r, k = patches.shape
    p = r // 4
    assert bsz % nb == 0 and r % 4 == 0 and p % 8 == 0
    grid = bsz // nb

    flops = int(2 * bsz * r * k * N_LANE)
    bytes_accessed = int(patches.size * patches.dtype.itemsize
                         + w.size * w.dtype.itemsize
                         + 4 * (b.size + bsz * p * cout))

    return pl.pallas_call(
        _conv_block_kernel,
        out_shape=jax.ShapeDtypeStruct((bsz, p, cout), jnp.float32),
        grid_spec=pltpu.PrefetchScalarGridSpec(
            num_scalar_prefetch=0,
            grid=(grid,),                                  # pipelined over batch
            in_specs=[
                pl.BlockSpec((nb, r, k), lambda i: (i, 0, 0)),
                pl.BlockSpec((k, N_LANE), lambda i: (0, 0)),
                pl.BlockSpec((1, N_LANE), lambda i: (0, 0)),
            ],
            out_specs=pl.BlockSpec((nb, p, cout), lambda i: (i, 0, 0)),
        ),
        compiler_params=pltpu.CompilerParams(
            dimension_semantics=("parallel",),             # megacore-friendly
            vmem_limit_bytes=32 * 1024 * 1024,             # safe on v5e/v6e/v7x
        ),
        cost_estimate=pl.CostEstimate(flops=flops, transcendentals=0,
                                      bytes_accessed=bytes_accessed),
    )(patches, w, b)


def linear_pallas(x, w, b):
    m, k = x.shape
    k2, n = w.shape
    assert k == k2 and n == N_LANE
    tm = m if m <= 256 else 128
    flops = int(2 * m * k * n)
    bytes_accessed = int(4 * m * k + 2 * k * n + 4 * (n + m * n))
    return pl.pallas_call(
        _linear_kernel,
        out_shape=jax.ShapeDtypeStruct((m, n), jnp.float32),
        grid_spec=pltpu.PrefetchScalarGridSpec(
            num_scalar_prefetch=0,
            grid=(pl.cdiv(m, tm),),
            in_specs=[
                pl.BlockSpec((tm, k), lambda i: (i, 0)),
                pl.BlockSpec((k, n), lambda i: (0, 0)),
                pl.BlockSpec((1, n), lambda i: (0, 0)),
            ],
            out_specs=pl.BlockSpec((tm, n), lambda i: (i, 0)),
        ),
        compiler_params=pltpu.CompilerParams(
            dimension_semantics=("parallel",),
            vmem_limit_bytes=32 * 1024 * 1024,
        ),
        cost_estimate=pl.CostEstimate(flops=flops, transcendentals=0,
                                      bytes_accessed=bytes_accessed),
    )(x, w, b)


# ---------------------------------------------------------------------------
# Wrapper-side im2col (tiny XLA op, outside the kernels)
# ---------------------------------------------------------------------------
def _im2col_pool_major(xpad, ksize, ph, pw, pw_pad, k_pad):
    """bf16 im2col patches with pool-corner-major row ordering.

    xpad : (B, 2*ph + ksize - 1, 2*pw + ksize - 1, C) spatially padded NHWC.
    Row index = corner*(ph*pw_pad) + i*pw_pad + j with corner = (h%2)*2+(w%2)
    of the conv output position (h, w) = (2i+dy, 2j+dx).
    Columns [pw, pw_pad) and K slots [ksize*ksize*C, k_pad) are zero padding,
    so the corresponding pooled columns are relu(bias) junk that downstream
    code drops explicitly.
    """
    b, hp, wp, c = xpad.shape
    hc, wc = 2 * ph, 2 * pw
    assert hp == hc + ksize - 1 and wp == wc + ksize - 1
    assert (ph * pw_pad) % 8 == 0 and k_pad >= ksize * ksize * c
    taps = [xpad[:, i:i + hc, j:j + wc, :]
            for i in range(ksize) for j in range(ksize)]
    pat = jnp.stack(taps, axis=3)                          # (B, hc, wc, k*k, C)
    pat = pat.reshape(b, ph, 2, pw, 2, ksize * ksize * c)
    pat = jnp.transpose(pat, (0, 2, 4, 1, 3, 5))           # (B, dy, dx, ph, pw, K)
    pat = jnp.pad(pat, ((0, 0), (0, 0), (0, 0), (0, 0),
                        (0, pw_pad - pw), (0, k_pad - ksize * ksize * c)))
    return pat.reshape(b, 4 * ph * pw_pad, k_pad).astype(jnp.bfloat16)


def _pick_nb(bsz):
    for nb in (8, 4, 2, 1):
        if bsz % nb == 0:
            return nb
    return 1


# ---------------------------------------------------------------------------
# One-time parameter preparation (outside the hot path)
# ---------------------------------------------------------------------------
def prepare_params(params):
    w1, b1, w2, b2, wo, bo = params

    # conv1: (16, 1, 5, 5) OIHW -> (25, 16) tap-major -> pad K 25->32, N 16->128
    w1m = jnp.pad(w1.reshape(16, 25).T, ((0, 7), (0, N_LANE - 16)))
    b1p = jnp.pad(b1, (0, N_LANE - 16)).reshape(1, N_LANE)

    # conv2: (32, 16, 5, 5) -> (kh, kw, ci, co) -> (400, 32) -> pad to (512, 128)
    w2m = jnp.pad(jnp.transpose(w2, (2, 3, 1, 0)).reshape(400, 32),
                  ((0, 112), (0, N_LANE - 32)))
    b2p = jnp.pad(b2, (0, N_LANE - 32)).reshape(1, N_LANE)

    # Linear: features are produced in torch NCHW-flatten order, so the weight
    # is just wo.T padded on N (no K padding: 1568 real contraction).
    wl = jnp.pad(wo.T, ((0, 0), (0, N_LANE - 10)))
    bop = jnp.pad(bo, (0, N_LANE - 10)).reshape(1, N_LANE)

    return dict(w1=w1m.astype(jnp.bfloat16), b1=b1p,
                w2=w2m.astype(jnp.bfloat16), b2=b2p,
                wl=wl.astype(jnp.bfloat16), bo=bop)


# ---------------------------------------------------------------------------
# Full forward pass (mirrors CNN.forward)
# ---------------------------------------------------------------------------
def cnn_forward(x_nchw, prep):
    bsz = x_nchw.shape[0]
    nb = _pick_nb(bsz)

    x = jnp.transpose(x_nchw, (0, 2, 3, 1))                     # (B, 28, 28, 1)
    xp = jnp.pad(x, ((0, 0), (2, 2), (2, 2), (0, 0)))           # (B, 32, 32, 1)

    # conv1 block: im2col (B, 896, 32) -> pooled (B, 224, 16); pooled grid 14x16
    pat1 = _im2col_pool_major(xp, KSIZE, 14, 14, 16, 32)
    h1 = conv_block(pat1, prep["w1"], prep["b1"], cout=16, nb=nb)

    # conv2 block: real 14x14x16 input, im2col (B, 224, 512) -> pooled (B, 56, 32)
    h1r = h1.reshape(bsz, 14, 16, 16)[:, :, :14, :]             # drop junk cols
    h1p = jnp.pad(h1r, ((0, 0), (2, 2), (2, 2), (0, 0)))        # (B, 18, 18, 16)
    pat2 = _im2col_pool_major(h1p, KSIZE, 7, 7, 8, 512)
    h2 = conv_block(pat2, prep["w2"], prep["b2"], cout=32, nb=nb)

    # features in torch NCHW flatten order; they are also the linear input.
    h2r = h2.reshape(bsz, 7, 8, 32)[:, :, :7, :]                # (B, 7, 7, 32) NHWC
    feats = jnp.transpose(h2r, (0, 3, 1, 2)).reshape(bsz, 32 * 7 * 7)

    logits = linear_pallas(feats, prep["wl"], prep["bo"])[:, :10]
    return logits, feats


# ---------------------------------------------------------------------------
# Pure-JAX reference (XLA conv) for a correctness check
# ---------------------------------------------------------------------------
def ref_forward(x_nchw, params):
    w1, b1, w2, b2, wo, bo = params

    def conv_relu_pool_ref(x, w, b):
        y = jax.lax.conv_general_dilated(
            x, w, window_strides=(1, 1), padding=((2, 2), (2, 2)),
            dimension_numbers=("NCHW", "OIHW", "NCHW"))
        y = jnp.maximum(y + b[None, :, None, None], 0.0)
        return jax.lax.reduce_window(y, -jnp.inf, jax.lax.max,
                                     (1, 1, 2, 2), (1, 1, 2, 2), "VALID")

    y = conv_relu_pool_ref(x_nchw, w1, b1)
    y = conv_relu_pool_ref(y, w2, b2)
    flat = y.reshape(y.shape[0], -1)
    return flat @ wo.T + bo, flat


# ---------------------------------------------------------------------------
# Deterministic parameter init (same shapes as the torch module)
# ---------------------------------------------------------------------------
def init_params():
    keys = jax.random.split(jax.random.PRNGKey(0), 6)
    w1 = 0.05 * jax.random.normal(keys[0], (16, 1, 5, 5), jnp.float32)
    b1 = 0.05 * jax.random.normal(keys[1], (16,), jnp.float32)
    w2 = 0.05 * jax.random.normal(keys[2], (32, 16, 5, 5), jnp.float32)
    b2 = 0.05 * jax.random.normal(keys[3], (32,), jnp.float32)
    wo = 0.05 * jax.random.normal(keys[4], (10, 32 * 7 * 7), jnp.float32)
    bo = 0.05 * jax.random.normal(keys[5], (10,), jnp.float32)
    return (w1, b1, w2, b2, wo, bo)


if __name__ == "__main__":
    params = init_params()
    prep = prepare_params(params)          # one-time weight repack (not in hot path)

    # MNIST geometry is fixed by Linear(32*7*7, 10): input must be (B, 1, 28, 28).
    x = jax.random.normal(jax.random.PRNGKey(0), (2, 1, 28, 28), jnp.float32)

    fwd = jax.jit(cnn_forward)
    logits, feats = fwd(x, prep)
    jax.block_until_ready((logits, feats))

    ref_logits, ref_feats = jax.jit(ref_forward)(x, params)
    np.testing.assert_allclose(np.asarray(feats), np.asarray(ref_feats),
                               rtol=1e-2, atol=1e-2)
    np.testing.assert_allclose(np.asarray(logits), np.asarray(ref_logits),
                               rtol=1e-2, atol=1e-2)

    assert logits.shape == (2, 10) and feats.shape == (2, 32 * 7 * 7)
    print("KERNEL_OK")
</pallas_src>

<mosaic_0001>
module attributes {stable_mosaic.version = 11 : i64} {
  func.func @_conv_block_kernel(%arg0: i32, %arg1: memref<2x896x32xbf16, #tpu.memory_space<vmem>>, %arg2: memref<32x128xbf16, #tpu.memory_space<vmem>>, %arg3: memref<1x128xf32, #tpu.memory_space<vmem>>, %arg4: memref<2x224x16xf32, #tpu.memory_space<vmem>>) attributes {dimension_semantics = [#tpu.dimension_semantics<parallel>], iteration_bounds = array<i64: 1>, scalar_prefetch = 0 : i64, scratch_operands = 0 : i64, tpu.core_type = #tpu.core_type<tc>, window_params = [{transform_indices = @transform_0, window_bounds = array<i64: 2, 896, 32>}, {pipeline_mode = #tpu.pipeline_mode<synchronous>, transform_indices = @transform_1, window_bounds = array<i64: 32, 128>}, {pipeline_mode = #tpu.pipeline_mode<synchronous>, transform_indices = @transform_2, window_bounds = array<i64: 1, 128>}, {transform_indices = @transform_3, window_bounds = array<i64: 2, 224, 16>}]} {
    %c0 = arith.constant 0 : index
    %c0_0 = arith.constant 0 : index
    %c0_1 = arith.constant 0 : index
    %0 = vector.load %arg1[%c0, %c0_0, %c0_1] : memref<2x896x32xbf16, #tpu.memory_space<vmem>>, vector<2x896x32xbf16>
    %1 = vector.shape_cast %0 : vector<2x896x32xbf16> to vector<1792x32xbf16>
    %c0_2 = arith.constant 0 : index
    %c0_3 = arith.constant 0 : index
    %2 = vector.load %arg2[%c0_2, %c0_3] : memref<32x128xbf16, #tpu.memory_space<vmem>>, vector<32x128xbf16>
    %cst = arith.constant dense<0.000000e+00> : vector<1792x128xf32>
    %3 = tpu.matmul %1, %2, %cst {dimension_numbers = #tpu.dot_dimension_numbers<[1], [0], [0], [1], [0, 0, 1, 1], [], []>} : vector<1792x32xbf16>, vector<32x128xbf16>, vector<1792x128xf32> -> vector<1792x128xf32>
    %c0_4 = arith.constant 0 : index
    %c0_5 = arith.constant 0 : index
    %4 = vector.load %arg3[%c0_4, %c0_5] : memref<1x128xf32, #tpu.memory_space<vmem>>, vector<1x128xf32>
    %5 = vector.broadcast %4 : vector<1x128xf32> to vector<1792x128xf32>
    %6 = arith.addf %3, %5 : vector<1792x128xf32>
    %cst_6 = arith.constant 0.000000e+00 : f32
    %7 = vector.broadcast %cst_6 : f32 to vector<1792x128xf32>
    %8 = arith.maximumf %6, %7 : vector<1792x128xf32>
    %9 = vector.shape_cast %8 : vector<1792x128xf32> to vector<2x4x224x128xf32>
    %10 = vector.extract_strided_slice %9 {offsets = [0, 0, 0, 0], sizes = [2, 1, 224, 128], strides = [1, 1, 1, 1]} : vector<2x4x224x128xf32> to vector<2x1x224x128xf32>
    %11 = vector.shape_cast %10 : vector<2x1x224x128xf32> to vector<2x224x128xf32>
    %12 = vector.extract_strided_slice %9 {offsets = [0, 1, 0, 0], sizes = [2, 1, 224, 128], strides = [1, 1, 1, 1]} : vector<2x4x224x128xf32> to vector<2x1x224x128xf32>
    %13 = vector.shape_cast %12 : vector<2x1x224x128xf32> to vector<2x224x128xf32>
    %14 = arith.maximumf %11, %13 : vector<2x224x128xf32>
    %15 = vector.extract_strided_slice %9 {offsets = [0, 2, 0, 0], sizes = [2, 1, 224, 128], strides = [1, 1, 1, 1]} : vector<2x4x224x128xf32> to vector<2x1x224x128xf32>
    %16 = vector.shape_cast %15 : vector<2x1x224x128xf32> to vector<2x224x128xf32>
    %17 = vector.extract_strided_slice %9 {offsets = [0, 3, 0, 0], sizes = [2, 1, 224, 128], strides = [1, 1, 1, 1]} : vector<2x4x224x128xf32> to vector<2x1x224x128xf32>
    %18 = vector.shape_cast %17 : vector<2x1x224x128xf32> to vector<2x224x128xf32>
    %19 = arith.maximumf %16, %18 : vector<2x224x128xf32>
    %20 = arith.maximumf %14, %19 : vector<2x224x128xf32>
    %21 = vector.extract_strided_slice %20 {offsets = [0, 0, 0], sizes = [2, 224, 16], strides = [1, 1, 1]} : vector<2x224x128xf32> to vector<2x224x16xf32>
    %c0_7 = arith.constant 0 : index
    %c0_8 = arith.constant 0 : index
    %c0_9 = arith.constant 0 : index
    %22 = vector.load %arg4[%c0_7, %c0_8, %c0_9] : memref<2x224x16xf32, #tpu.memory_space<vmem>>, vector<2x224x16xf32>
    tpu.vector_store %arg4[%c0_7, %c0_8, %c0_9], %21 {strides = array<i32>} : memref<2x224x16xf32, #tpu.memory_space<vmem>>, vector<2x224x16xf32>,
    return
  }
  func.func @transform_0(%arg0: i32) -> (i32, i32, i32) {
    %c0_i32 = arith.constant 0 : i32
    %c0_i32_0 = arith.constant 0 : i32
    %c0_i32_1 = arith.constant 0 : i32
    return %arg0, %c0_i32, %c0_i32_0 : i32, i32, i32
  }
  func.func @transform_1(%arg0: i32) -> (i32, i32) {
    %c0_i32 = arith.constant 0 : i32
    %c0_i32_0 = arith.constant 0 : i32
    %c0_i32_1 = arith.constant 0 : i32
    return %c0_i32, %c0_i32_0 : i32, i32
  }
  func.func @transform_2(%arg0: i32) -> (i32, i32) {
    %c0_i32 = arith.constant 0 : i32
    %c0_i32_0 = arith.constant 0 : i32
    %c0_i32_1 = arith.constant 0 : i32
    return %c0_i32, %c0_i32_0 : i32, i32
  }
  func.func @transform_3(%arg0: i32) -> (i32, i32, i32) {
    %c0_i32 = arith.constant 0 : i32
    %c0_i32_0 = arith.constant 0 : i32
    %c0_i32_1 = arith.constant 0 : i32
    return %arg0, %c0_i32, %c0_i32_0 : i32, i32, i32
  }
}

module attributes {stable_mosaic.version = 11 : i64} {
  func.func @_conv_block_kernel(%arg0: i32, %arg1: memref<2x224x512xbf16, #tpu.memory_space<vmem>>, %arg2: memref<512x128xbf16, #tpu.memory_space<vmem>>, %arg3: memref<1x128xf32, #tpu.memory_space<vmem>>, %arg4: memref<2x56x32xf32, #tpu.memory_space<vmem>>) attributes {dimension_semantics = [#tpu.dimension_semantics<parallel>], iteration_bounds = array<i64: 1>, scalar_prefetch = 0 : i64, scratch_operands = 0 : i64, tpu.core_type = #tpu.core_type<tc>, window_params = [{transform_indices = @transform_0, window_bounds = array<i64: 2, 224, 512>}, {pipeline_mode = #tpu.pipeline_mode<synchronous>, transform_indices = @transform_1, window_bounds = array<i64: 512, 128>}, {pipeline_mode = #tpu.pipeline_mode<synchronous>, transform_indices = @transform_2, window_bounds = array<i64: 1, 128>}, {transform_indices = @transform_3, window_bounds = array<i64: 2, 56, 32>}]} {
    %c0 = arith.constant 0 : index
    %c0_0 = arith.constant 0 : index
    %c0_1 = arith.constant 0 : index
    %0 = vector.load %arg1[%c0, %c0_0, %c0_1] : memref<2x224x512xbf16, #tpu.memory_space<vmem>>, vector<2x224x512xbf16>
    %1 = vector.shape_cast %0 : vector<2x224x512xbf16> to vector<448x512xbf16>
    %c0_2 = arith.constant 0 : index
    %c0_3 = arith.constant 0 : index
    %2 = vector.load %arg2[%c0_2, %c0_3] : memref<512x128xbf16, #tpu.memory_space<vmem>>, vector<512x128xbf16>
    %cst = arith.constant dense<0.000000e+00> : vector<448x128xf32>
    %3 = tpu.matmul %1, %2, %cst {dimension_numbers = #tpu.dot_dimension_numbers<[1], [0], [0], [1], [0, 0, 1, 1], [], []>} : vector<448x512xbf16>, vector<512x128xbf16>, vector<448x128xf32> -> vector<448x128xf32>
    %c0_4 = arith.constant 0 : index
    %c0_5 = arith.constant 0 : index
    %4 = vector.load %arg3[%c0_4, %c0_5] : memref<1x128xf32, #tpu.memory_space<vmem>>, vector<1x128xf32>
    %5 = vector.broadcast %4 : vector<1x128xf32> to vector<448x128xf32>
    %6 = arith.addf %3, %5 : vector<448x128xf32>
    %cst_6 = arith.constant 0.000000e+00 : f32
    %7 = vector.broadcast %cst_6 : f32 to vector<448x128xf32>
    %8 = arith.maximumf %6, %7 : vector<448x128xf32>
    %9 = vector.shape_cast %8 : vector<448x128xf32> to vector<2x4x56x128xf32>
    %10 = vector.extract_strided_slice %9 {offsets = [0, 0, 0, 0], sizes = [2, 1, 56, 128], strides = [1, 1, 1, 1]} : vector<2x4x56x128xf32> to vector<2x1x56x128xf32>
    %11 = vector.shape_cast %10 : vector<2x1x56x128xf32> to vector<2x56x128xf32>
    %12 = vector.extract_strided_slice %9 {offsets = [0, 1, 0, 0], sizes = [2, 1, 56, 128], strides = [1, 1, 1, 1]} : vector<2x4x56x128xf32> to vector<2x1x56x128xf32>
    %13 = vector.shape_cast %12 : vector<2x1x56x128xf32> to vector<2x56x128xf32>
    %14 = arith.maximumf %11, %13 : vector<2x56x128xf32>
    %15 = vector.extract_strided_slice %9 {offsets = [0, 2, 0, 0], sizes = [2, 1, 56, 128], strides = [1, 1, 1, 1]} : vector<2x4x56x128xf32> to vector<2x1x56x128xf32>
    %16 = vector.shape_cast %15 : vector<2x1x56x128xf32> to vector<2x56x128xf32>
    %17 = vector.extract_strided_slice %9 {offsets = [0, 3, 0, 0], sizes = [2, 1, 56, 128], strides = [1, 1, 1, 1]} : vector<2x4x56x128xf32> to vector<2x1x56x128xf32>
    %18 = vector.shape_cast %17 : vector<2x1x56x128xf32> to vector<2x56x128xf32>
    %19 = arith.maximumf %16, %18 : vector<2x56x128xf32>
    %20 = arith.maximumf %14, %19 : vector<2x56x128xf32>
    %21 = vector.extract_strided_slice %20 {offsets = [0, 0, 0], sizes = [2, 56, 32], strides = [1, 1, 1]} : vector<2x56x128xf32> to vector<2x56x32xf32>
    %c0_7 = arith.constant 0 : index
    %c0_8 = arith.constant 0 : index
    %c0_9 = arith.constant 0 : index
    %22 = vector.load %arg4[%c0_7, %c0_8, %c0_9] : memref<2x56x32xf32, #tpu.memory_space<vmem>>, vector<2x56x32xf32>
    tpu.vector_store %arg4[%c0_7, %c0_8, %c0_9], %21 {strides = array<i32>} : memref<2x56x32xf32, #tpu.memory_space<vmem>>, vector<2x56x32xf32>,
    return
  }
  func.func @transform_0(%arg0: i32) -> (i32, i32, i32) {
    %c0_i32 = arith.constant 0 : i32
    %c0_i32_0 = arith.constant 0 : i32
    %c0_i32_1 = arith.constant 0 : i32
    return %arg0, %c0_i32, %c0_i32_0 : i32, i32, i32
  }
  func.func @transform_1(%arg0: i32) -> (i32, i32) {
    %c0_i32 = arith.constant 0 : i32
    %c0_i32_0 = arith.constant 0 : i32
    %c0_i32_1 = arith.constant 0 : i32
    return %c0_i32, %c0_i32_0 : i32, i32
  }
  func.func @transform_2(%arg0: i32) -> (i32, i32) {
    %c0_i32 = arith.constant 0 : i32
    %c0_i32_0 = arith.constant 0 : i32
    %c0_i32_1 = arith.constant 0 : i32
    return %c0_i32, %c0_i32_0 : i32, i32
  }
  func.func @transform_3(%arg0: i32) -> (i32, i32, i32) {
    %c0_i32 = arith.constant 0 : i32
    %c0_i32_0 = arith.constant 0 : i32
    %c0_i32_1 = arith.constant 0 : i32
    return %arg0, %c0_i32, %c0_i32_0 : i32, i32, i32
  }
}

module attributes {stable_mosaic.version = 11 : i64} {
  func.func @_linear_kernel(%arg0: i32, %arg1: memref<2x1568xf32, #tpu.memory_space<vmem>>, %arg2: memref<1568x128xbf16, #tpu.memory_space<vmem>>, %arg3: memref<1x128xf32, #tpu.memory_space<vmem>>, %arg4: memref<2x128xf32, #tpu.memory_space<vmem>>) attributes {dimension_semantics = [#tpu.dimension_semantics<parallel>], iteration_bounds = array<i64: 1>, scalar_prefetch = 0 : i64, scratch_operands = 0 : i64, tpu.core_type = #tpu.core_type<tc>, window_params = [{transform_indices = @transform_0, window_bounds = array<i64: 2, 1568>}, {pipeline_mode = #tpu.pipeline_mode<synchronous>, transform_indices = @transform_1, window_bounds = array<i64: 1568, 128>}, {pipeline_mode = #tpu.pipeline_mode<synchronous>, transform_indices = @transform_2, window_bounds = array<i64: 1, 128>}, {transform_indices = @transform_3, window_bounds = array<i64: 2, 128>}]} {
    %c0 = arith.constant 0 : index
    %c0_0 = arith.constant 0 : index
    %0 = vector.load %arg1[%c0, %c0_0] : memref<2x1568xf32, #tpu.memory_space<vmem>>, vector<2x1568xf32>
    %1 = arith.truncf %0 : vector<2x1568xf32> to vector<2x1568xbf16>
    %c0_1 = arith.constant 0 : index
    %c0_2 = arith.constant 0 : index
    %2 = vector.load %arg2[%c0_1, %c0_2] : memref<1568x128xbf16, #tpu.memory_space<vmem>>, vector<1568x128xbf16>
    %cst = arith.constant dense<0.000000e+00> : vector<2x128xf32>
    %3 = tpu.matmul %1, %2, %cst {dimension_numbers = #tpu.dot_dimension_numbers<[1], [0], [0], [1], [0, 0, 1, 1], [], []>} : vector<2x1568xbf16>, vector<1568x128xbf16>, vector<2x128xf32> -> vector<2x128xf32>
    %c0_3 = arith.constant 0 : index
    %c0_4 = arith.constant 0 : index
    %4 = vector.load %arg3[%c0_3, %c0_4] : memref<1x128xf32, #tpu.memory_space<vmem>>, vector<1x128xf32>
    %5 = vector.broadcast %4 : vector<1x128xf32> to vector<2x128xf32>
    %6 = arith.addf %3, %5 : vector<2x128xf32>
    %c0_5 = arith.constant 0 : index
    %c0_6 = arith.constant 0 : index
    %7 = vector.load %arg4[%c0_5, %c0_6] : memref<2x128xf32, #tpu.memory_space<vmem>>, vector<2x128xf32>
    tpu.vector_store %arg4[%c0_5, %c0_6], %6 {strides = array<i32>} : memref<2x128xf32, #tpu.memory_space<vmem>>, vector<2x128xf32>,
    return
  }
  func.func @transform_0(%arg0: i32) -> (i32, i32) {
    %c0_i32 = arith.constant 0 : i32
    %c0_i32_0 = arith.constant 0 : i32
    return %arg0, %c0_i32 : i32, i32
  }
  func.func @transform_1(%arg0: i32) -> (i32, i32) {
    %c0_i32 = arith.constant 0 : i32
    %c0_i32_0 = arith.constant 0 : i32
    %c0_i32_1 = arith.constant 0 : i32
    return %c0_i32, %c0_i32_0 : i32, i32
  }
  func.func @transform_2(%arg0: i32) -> (i32, i32) {
    %c0_i32 = arith.constant 0 : i32
    %c0_i32_0 = arith.constant 0 : i32
    %c0_i32_1 = arith.constant 0 : i32
    return %c0_i32, %c0_i32_0 : i32, i32
  }
  func.func @transform_3(%arg0: i32) -> (i32, i32) {
    %c0_i32 = arith.constant 0 : i32
    %c0_i32_0 = arith.constant 0 : i32
    return %arg0, %c0_i32 : i32, i32
  }
}

</mosaic_0001>

<bundles_post_ra>
// kernel: cnn_forward.3
= control target key start
LH: loop header
LB: loop body
LE: loop exit
PB: predicated region body
PF: predicated region fallthrough
CT: control target
= control target key end

     0   :  { %vm822_vm0 = vcmask 261120   ;;  %vm2480_vm1 = vcmask 130048   ;;  %s5017_s1 = inlined_call_operand.vmem [shape: bf16[32,128], index: 1, kind: input, shape index: {}]   ;;  %s5018_s0 = inlined_call_operand.vmem [shape: bf16[2,896,32], index: 0, kind: input, shape index: {}]   ;;  %s5019_s2 = inlined_call_operand.vmem [shape: f32[1,128], index: 2, kind: input, shape index: {}]   ;;  %s5020_s3 = inlined_call_operand.vmem [shape: f32[2,224,16], index: 3, kind: output, shape index: {}]  }
   0x1   :  { %v3114_v0 = vld [vmem:[%s5017_s1] sm:$0xff]   ;;  %v3115_v1 = vld [vmem:[%s5017_s1 + $0x8] sm:$0xff]   ;;  %v3120_v6 = vld [vmem:[%s5018_s0 + $0x10] sm:$0xff]  }
   0x2   :  { %2882 = vmatprep.subr.bf16.mxu0 %v3114_v0  ;;  %3110 = vmatprep.subr.bf16.mxu1 %v3114_v0  ;;  %v3116_v2 = vld [vmem:[%s5018_s0] sm:$0xff]   ;;  %v3118_v4 = vld [vmem:[%s5018_s0 + $0x8] sm:$0xff]   ;;  %v3121_v7 = vld [vmem:[%s5018_s0 + $0x1d0] sm:$0xff]  }
   0x3   :  { %2883 = vmatpush3.bf16.msra.mxu0 %v3114_v0  ;;  %3112 = vmatpush3.bf16.msra.mxu1 %v3114_v0  ;;  %v3117_v3 = vld [vmem:[%s5018_s0 + $0x1c0] sm:$0xff]   ;;  %v3119_v5 = vld [vmem:[%s5018_s0 + $0x1c8] sm:$0xff]   ;;  %v3122_v8 = vld [vmem:[%s5018_s0 + $0x18] sm:$0xff]  }
   0x4   :  { %2884 = vmatprep.subr.bf16.mxu0 %v3115_v1  ;;  %3111 = vmatprep.subr.bf16.mxu1 %v3115_v1  ;;  %v3123_v9 = vld [vmem:[%s5018_s0 + $0x1d8] sm:$0xff]   ;;  %v3124_v10 = vld [vmem:[%s5018_s0 + $0x20] sm:$0xff]   ;;  %v3126_v12 = vld [vmem:[%s5018_s0 + $0x28] sm:$0xff]  }
   0x5   :  { %2886 = vmatprep.mubr.msk.bf16.mxu0 %vm822_vm0, %v3116_v2  ;;  %2998 = vmatprep.mubr.msk.bf16.mxu1 %vm822_vm0, %v3117_v3  ;;  %v3125_v11 = vld [vmem:[%s5018_s0 + $0x1e0] sm:$0xff]   ;;  %v3127_v13 = vld [vmem:[%s5018_s0 + $0x1e8] sm:$0xff]   ;;  %v3128_v14 = vld [vmem:[%s5018_s0 + $0x30] sm:$0xff]  }
   0x6   :  { %v3129_v15 = vld [vmem:[%s5018_s0 + $0x1f0] sm:$0xff]   ;;  %v3130_v16 = vld [vmem:[%s5018_s0 + $0x38] sm:$0xff]   ;;  %v3132_v18 = vld [vmem:[%s5018_s0 + $0x40] sm:$0xff]  }
   0x7   :  { %2885 = vmatpush3.bf16.msra.mxu0 %v3115_v1  ;;  %3113 = vmatpush3.bf16.msra.mxu1 %v3115_v1  ;;  %v3131_v17 = vld [vmem:[%s5018_s0 + $0x1f8] sm:$0xff]   ;;  %v3133_v19 = vld [vmem:[%s5018_s0 + $0x200] sm:$0xff]   ;;  %v3134_v20 = vld [vmem:[%s5018_s0 + $0x48] sm:$0xff]  }
   0x8   :  { %v3135_v21 = vld [vmem:[%s5018_s0 + $0x208] sm:$0xff]   ;;  %v3136_v22 = vld [vmem:[%s5018_s0 + $0x50] sm:$0xff]   ;;  %v3138_v24 = vld [vmem:[%s5018_s0 + $0x58] sm:$0xff]  }
   0x9   :  { %v3137_v23 = vld [vmem:[%s5018_s0 + $0x210] sm:$0xff]   ;;  %v3139_v25 = vld [vmem:[%s5018_s0 + $0x218] sm:$0xff]   ;;  %v3140_v26 = vld [vmem:[%s5018_s0 + $0x60] sm:$0xff]  }
   0xa   :  { %2887 = vmatmul.mubr.msk.bf16.vlgmr.msra.gmra.mrb[0].mxu0 %vm822_vm0, %v3118_v4  ;;  %2999 = vmatmul.mubr.msk.bf16.vlgmr.msra.gmra.mrb[0].mxu1 %vm822_vm0, %v3119_v5  ;;  %v3141_v27 = vld [vmem:[%s5018_s0 + $0x220] sm:$0xff]   ;;  %v3142_v28 = vld [vmem:[%s5018_s0 + $0x68] sm:$0xff]   ;;  %v3144_v30 = vld [vmem:[%s5018_s0 + $0x70] sm:$0xff]  }
   0xb   :  { %2890 = vmatprep.mubr.msk.bf16.mxu0 %vm822_vm0, %v3120_v6  ;;  %3002 = vmatprep.mubr.msk.bf16.mxu1 %vm822_vm0, %v3121_v7  ;;  %v3143_v29 = vld [vmem:[%s5018_s0 + $0x228] sm:$0xff]   ;;  %v3145_v31 = vld [vmem:[%s5018_s0 + $0x230] sm:$0xff]   ;;  %v3146_v32 = vld [vmem:[%s5018_s0 + $0x78] sm:$0xff]  }
   0xc   :  { %v3147_v33 = vld [vmem:[%s5018_s0 + $0x238] sm:$0xff]   ;;  %v3148_v34 = vld [vmem:[%s5018_s0 + $0x80] sm:$0xff]   ;;  %v3150_v36 = vld [vmem:[%s5018_s0 + $0x88] sm:$0xff]  }
   0xd   :  { %v3149_v35 = vld [vmem:[%s5018_s0 + $0x240] sm:$0xff]   ;;  %v3151_v37 = vld [vmem:[%s5018_s0 + $0x248] sm:$0xff]   ;;  %v3152_v38 = vld [vmem:[%s5018_s0 + $0x90] sm:$0xff]  }
   0xe   :  { %v3153_v39 = vld [vmem:[%s5018_s0 + $0x250] sm:$0xff]   ;;  %v3154_v40 = vld [vmem:[%s5018_s0 + $0x98] sm:$0xff]   ;;  %v3156_v42 = vld [vmem:[%s5018_s0 + $0xa0] sm:$0xff]  }
   0xf   :  { %v3155_v41 = vld [vmem:[%s5018_s0 + $0x258] sm:$0xff]   ;;  %v3157_v43 = vld [vmem:[%s5018_s0 + $0x260] sm:$0xff]   ;;  %v3158_v44 = vld [vmem:[%s5018_s0 + $0xa8] sm:$0xff]  }
  0x10   :  { %v3159_v45 = vld [vmem:[%s5018_s0 + $0x268] sm:$0xff]   ;;  %v3160_v46 = vld [vmem:[%s5018_s0 + $0xb0] sm:$0xff]   ;;  %v3162_v48 = vld [vmem:[%s5018_s0 + $0xb8] sm:$0xff]  }
  0x11   :  { %v3161_v47 = vld [vmem:[%s5018_s0 + $0x270] sm:$0xff]   ;;  %v3163_v49 = vld [vmem:[%s5018_s0 + $0x278] sm:$0xff]   ;;  %v3164_v50 = vld [vmem:[%s5018_s0 + $0xc0] sm:$0xff]  }
  0x12   :  { %2891 = vmatmul.mubr.msk.bf16.gmra.mrb[4].mxu0 %vm822_vm0, %v3122_v8  ;;  %3003 = vmatmul.mubr.msk.bf16.gmra.mrb[4].mxu1 %vm822_vm0, %v3123_v9  ;;  %v3165_v51 = vld [vmem:[%s5018_s0 + $0x280] sm:$0xff]   ;;  %v3166_v52 = vld [vmem:[%s5018_s0 + $0xc8] sm:$0xff]   ;;  %v3168_v54 = vld [vmem:[%s5018_s0 + $0xd0] sm:$0xff]  }
  0x13   :  { %2894 = vmatprep.mubr.msk.bf16.mxu0 %vm822_vm0, %v3124_v10  ;;  %3006 = vmatprep.mubr.msk.bf16.mxu1 %vm822_vm0, %v3125_v11  ;;  %v3167_v53 = vld [vmem:[%s5018_s0 + $0x288] sm:$0xff]   ;;  %v3169_v55 = vld [vmem:[%s5018_s0 + $0x290] sm:$0xff]   ;;  %v3170_v56 = vld [vmem:[%s5018_s0 + $0xd8] sm:$0xff]  }
  0x14   :  { %v3171_v57 = vld [vmem:[%s5018_s0 + $0x298] sm:$0xff]   ;;  %v3172_v58 = vld [vmem:[%s5018_s0 + $0xe0] sm:$0xff]   ;;  %v3174_v60 = vld [vmem:[%s5018_s0 + $0xe8] sm:$0xff]  }
  0x15   :  { %v3173_v59 = vld [vmem:[%s5018_s0 + $0x2a0] sm:$0xff]   ;;  %v3175_v61 = vld [vmem:[%s5018_s0 + $0x2a8] sm:$0xff]   ;;  %v3176_v62 = vld [vmem:[%s5018_s0 + $0xf0] sm:$0xff]  }
  0x16   :  { %v3177_v63 = vld [vmem:[%s5018_s0 + $0x2b0] sm:$0xff]   ;;  %v3178_v0 = vld [vmem:[%s5018_s0 + $0xf8] sm:$0xff]   ;;  %v3180_v2 = vld [vmem:[%s5018_s0 + $0x100] sm:$0xff]  }
  0x17   :  { %v3179_v1 = vld [vmem:[%s5018_s0 + $0x2b8] sm:$0xff]   ;;  %v3181_v3 = vld [vmem:[%s5018_s0 + $0x2c0] sm:$0xff]   ;;  %v3182_v4 = vld [vmem:[%s5018_s0 + $0x108] sm:$0xff]  }
  0x18   :  { %v3183_v5 = vld [vmem:[%s5018_s0 + $0x2c8] sm:$0xff]   ;;  %v3184_v6 = vld [vmem:[%s5018_s0 + $0x110] sm:$0xff]   ;;  %v3186_v8 = vld [vmem:[%s5018_s0 + $0x118] sm:$0xff]  }
  0x19   :  { %v3185_v7 = vld [vmem:[%s5018_s0 + $0x2d0] sm:$0xff]   ;;  %v3187_v9 = vld [vmem:[%s5018_s0 + $0x2d8] sm:$0xff]   ;;  %v3188_v10 = vld [vmem:[%s5018_s0 + $0x120] sm:$0xff]  }
  0x1a   :  { %2895 = vmatmul.mubr.msk.bf16.gmra.mrb[8].mxu0 %vm822_vm0, %v3126_v12  ;;  %3007 = vmatmul.mubr.msk.bf16.gmra.mrb[8].mxu1 %vm822_vm0, %v3127_v13  ;;  %v3189_v11 = vld [vmem:[%s5018_s0 + $0x2e0] sm:$0xff]   ;;  %v3190_v12 = vld [vmem:[%s5018_s0 + $0x128] sm:$0xff]  }
  0x1b   :  { %2898 = vmatprep.mubr.msk.bf16.mxu0 %vm822_vm0, %v3128_v14  ;;  %3010 = vmatprep.mubr.msk.bf16.mxu1 %vm822_vm0, %v3129_v15  ;;  %v3191_v13 = vld [vmem:[%s5018_s0 + $0x2e8] sm:$0xff]   ;;  %v3192_v14 = vld [vmem:[%s5018_s0 + $0x130] sm:$0xff]  }
  0x1c   :  { %v3193_v15 = vld [vmem:[%s5018_s0 + $0x2f0] sm:$0xff]  }
  0x22   :  { %2899 = vmatmul.mubr.msk.bf16.gmra.mrb[12].mxu0 %vm822_vm0, %v3130_v16  ;;  %3011 = vmatmul.mubr.msk.bf16.gmra.mrb[12].mxu1 %vm822_vm0, %v3131_v17  ;;  %v3194_v16 = vld [vmem:[%s5018_s0 + $0x138] sm:$0xff]  }
  0x23   :  { %2902 = vmatprep.mubr.msk.bf16.mxu0 %vm822_vm0, %v3132_v18  ;;  %3014 = vmatprep.mubr.msk.bf16.mxu1 %vm822_vm0, %v3133_v19  ;;  %v3195_v17 = vld [vmem:[%s5018_s0 + $0x2f8] sm:$0xff]   ;;  %v3196_v18 = vld [vmem:[%s5018_s0 + $0x140] sm:$0xff]  }
  0x24   :  { %v3197_v19 = vld [vmem:[%s5018_s0 + $0x300] sm:$0xff]  }
  0x2a   :  { %2903 = vmatmul.mubr.msk.bf16.gmra.mrb[16].mxu0 %vm822_vm0, %v3134_v20  ;;  %3015 = vmatmul.mubr.msk.bf16.gmra.mrb[16].mxu1 %vm822_vm0, %v3135_v21  ;;  %v3198_v20 = vld [vmem:[%s5018_s0 + $0x148] sm:$0xff]  }
  0x2b   :  { %2906 = vmatprep.mubr.msk.bf16.mxu0 %vm822_vm0, %v3136_v22  ;;  %3018 = vmatprep.mubr.msk.bf16.mxu1 %vm822_vm0, %v3137_v23  ;;  %v3199_v21 = vld [vmem:[%s5018_s0 + $0x308] sm:$0xff]   ;;  %v3200_v22 = vld [vmem:[%s5018_s0 + $0x150] sm:$0xff]  }
  0x2c   :  { %v3201_v23 = vld [vmem:[%s5018_s0 + $0x310] sm:$0xff]  }
  0x32   :  { %2907 = vmatmul.mubr.msk.bf16.gmra.mrb[20].mxu0 %vm822_vm0, %v3138_v24  ;;  %3019 = vmatmul.mubr.msk.bf16.gmra.mrb[20].mxu1 %vm822_vm0, %v3139_v25  ;;  %v3202_v24 = vld [vmem:[%s5018_s0 + $0x158] sm:$0xff]  }
  0x33   :  { %2910 = vmatprep.mubr.msk.bf16.mxu0 %vm822_vm0, %v3140_v26  ;;  %3022 = vmatprep.mubr.msk.bf16.mxu1 %vm822_vm0, %v3141_v27  ;;  %v3203_v25 = vld [vmem:[%s5018_s0 + $0x318] sm:$0xff]   ;;  %v3204_v26 = vld [vmem:[%s5018_s0 + $0x160] sm:$0xff]  }
  0x34   :  { %v3205_v27 = vld [vmem:[%s5018_s0 + $0x320] sm:$0xff]  }
  0x3a   :  { %2911 = vmatmul.mubr.msk.bf16.gmra.mrb[24].mxu0 %vm822_vm0, %v3142_v28  ;;  %3023 = vmatmul.mubr.msk.bf16.gmra.mrb[24].mxu1 %vm822_vm0, %v3143_v29  ;;  %v3206_v28 = vld [vmem:[%s5018_s0 + $0x168] sm:$0xff]  }
  0x3b   :  { %2914 = vmatprep.mubr.msk.bf16.mxu0 %vm822_vm0, %v3144_v30  ;;  %3026 = vmatprep.mubr.msk.bf16.mxu1 %vm822_vm0, %v3145_v31  ;;  %v3207_v29 = vld [vmem:[%s5018_s0 + $0x328] sm:$0xff]   ;;  %v3208_v30 = vld [vmem:[%s5018_s0 + $0x170] sm:$0xff]  }
  0x3c   :  { %v3209_v31 = vld [vmem:[%s5018_s0 + $0x330] sm:$0xff]  }
  0x42   :  { %2915 = vmatmul.mubr.msk.bf16.gmra.mrb[28].mxu0 %vm822_vm0, %v3146_v32  ;;  %3027 = vmatmul.mubr.msk.bf16.gmra.mrb[28].mxu1 %vm822_vm0, %v3147_v33  ;;  %v3210_v32 = vld [vmem:[%s5018_s0 + $0x178] sm:$0xff]  }
  0x43   :  { %2918 = vmatprep.mubr.msk.bf16.mxu0 %vm822_vm0, %v3148_v34  ;;  %3030 = vmatprep.mubr.msk.bf16.mxu1 %vm822_vm0, %v3149_v35  ;;  %v3211_v33 = vld [vmem:[%s5018_s0 + $0x338] sm:$0xff]   ;;  %v3212_v34 = vld [vmem:[%s5018_s0 + $0x180] sm:$0xff]  }
  0x44   :  { %v3213_v35 = vld [vmem:[%s5018_s0 + $0x340] sm:$0xff]  }
  0x4a   :  { %2919 = vmatmul.mubr.msk.bf16.gmra.mrb[32].mxu0 %vm822_vm0, %v3150_v36  ;;  %3031 = vmatmul.mubr.msk.bf16.gmra.mrb[32].mxu1 %vm822_vm0, %v3151_v37  ;;  %v3214_v36 = vld [vmem:[%s5018_s0 + $0x188] sm:$0xff]  }
  0x4b   :  { %2922 = vmatprep.mubr.msk.bf16.mxu0 %vm822_vm0, %v3152_v38  ;;  %3034 = vmatprep.mubr.msk.bf16.mxu1 %vm822_vm0, %v3153_v39  ;;  %v3215_v37 = vld [vmem:[%s5018_s0 + $0x348] sm:$0xff]   ;;  %v3216_v38 = vld [vmem:[%s5018_s0 + $0x190] sm:$0xff]  }
  0x4c   :  { %v3217_v39 = vld [vmem:[%s5018_s0 + $0x350] sm:$0xff]  }
  0x52   :  { %2923 = vmatmul.mubr.msk.bf16.gmra.mrb[36].mxu0 %vm822_vm0, %v3154_v40  ;;  %3035 = vmatmul.mubr.msk.bf16.gmra.mrb[36].mxu1 %vm822_vm0, %v3155_v41  ;;  %v3218_v40 = vld [vmem:[%s5018_s0 + $0x198] sm:$0xff]  }
  0x53   :  { %2926 = vmatprep.mubr.msk.bf16.mxu0 %vm822_vm0, %v3156_v42  ;;  %3038 = vmatprep.mubr.msk.bf16.mxu1 %vm822_vm0, %v3157_v43  ;;  %v3219_v41 = vld [vmem:[%s5018_s0 + $0x358] sm:$0xff]   ;;  %v3220_v42 = vld [vmem:[%s5018_s0 + $0x1a0] sm:$0xff]  }
  0x54   :  { %v3221_v43 = vld [vmem:[%s5018_s0 + $0x360] sm:$0xff]  }
  0x5a   :  { %2927 = vmatmul.mubr.msk.bf16.gmra.mrb[40].mxu0 %vm822_vm0, %v3158_v44  ;;  %3039 = vmatmul.mubr.msk.bf16.gmra.mrb[40].mxu1 %vm822_vm0, %v3159_v45  ;;  %v3222_v44 = vld [vmem:[%s5018_s0 + $0x1a8] sm:$0xff]  }
  0x5b   :  { %2930 = vmatprep.mubr.msk.bf16.mxu0 %vm822_vm0, %v3160_v46  ;;  %3042 = vmatprep.mubr.msk.bf16.mxu1 %vm822_vm0, %v3161_v47  ;;  %v3223_v45 = vld [vmem:[%s5018_s0 + $0x368] sm:$0xff]   ;;  %v3224_v46 = vld [vmem:[%s5018_s0 + $0x1b0] sm:$0xff]  }
  0x5c   :  { %v3225_v47 = vld [vmem:[%s5018_s0 + $0x370] sm:$0xff]  }
  0x62   :  { %2931 = vmatmul.mubr.msk.bf16.gmra.mrb[44].mxu0 %vm822_vm0, %v3162_v48  ;;  %3043 = vmatmul.mubr.msk.bf16.gmra.mrb[44].mxu1 %vm822_vm0, %v3163_v49 }
  0x63   :  { %2934 = vmatprep.mubr.msk.bf16.mxu0 %vm822_vm0, %v3164_v50  ;;  %3046 = vmatprep.mubr.msk.bf16.mxu1 %vm822_vm0, %v3165_v51 }
  0x6a   :  { %2935 = vmatmul.mubr.msk.bf16.gmra.mrb[48].mxu0 %vm822_vm0, %v3166_v52  ;;  %3047 = vmatmul.mubr.msk.bf16.gmra.mrb[48].mxu1 %vm822_vm0, %v3167_v53  ;;  %v3226_v52 = vld [vmem:[%s5018_s0 + $0x1b8] sm:$0xff]  }
  0x6b   :  { %2938 = vmatprep.mubr.msk.bf16.mxu0 %vm822_vm0, %v3168_v54  ;;  %3050 = vmatprep.mubr.msk.bf16.mxu1 %vm822_vm0, %v3169_v55  ;;  %v3227_v53 = vld [vmem:[%s5018_s0 + $0x378] sm:$0xff]  }
  0x72   :  { %2939 = vmatmul.mubr.msk.bf16.gmra.mrb[52].mxu0 %vm822_vm0, %v3170_v56  ;;  %3051 = vmatmul.mubr.msk.bf16.gmra.mrb[52].mxu1 %vm822_vm0, %v3171_v57 }
  0x73   :  { %2942 = vmatprep.mubr.msk.bf16.mxu0 %vm822_vm0, %v3172_v58  ;;  %3054 = vmatprep.mubr.msk.bf16.mxu1 %vm822_vm0, %v3173_v59 }
  0x7a   :  { %2943 = vmatmul.mubr.msk.bf16.gmra.mrb[56].mxu0 %vm822_vm0, %v3174_v60  ;;  %3055 = vmatmul.mubr.msk.bf16.gmra.mrb[56].mxu1 %vm822_vm0, %v3175_v61 }
  0x7b   :  { %2946 = vmatprep.mubr.msk.bf16.mxu0 %vm822_vm0, %v3176_v62  ;;  %3058 = vmatprep.mubr.msk.bf16.mxu1 %vm822_vm0, %v3177_v63 }
  0x82   :  { %2947 = vmatmul.mubr.msk.bf16.gmra.mrb[60].mxu0 %vm822_vm0, %v3178_v0  ;;  %3059 = vmatmul.mubr.msk.bf16.gmra.mrb[60].mxu1 %vm822_vm0, %v3179_v1 }
  0x83   :  { %2950 = vmatprep.mubr.msk.bf16.mxu0 %vm822_vm0, %v3180_v2  ;;  %3062 = vmatprep.mubr.msk.bf16.mxu1 %vm822_vm0, %v3181_v3 }
  0x8a   :  { %2951 = vmatmul.mubr.msk.bf16.gmra.mrb[64].mxu0 %vm822_vm0, %v3182_v4  ;;  %3063 = vmatmul.mubr.msk.bf16.gmra.mrb[64].mxu1 %vm822_vm0, %v3183_v5 }
  0x8b   :  { %2954 = vmatprep.mubr.msk.bf16.mxu0 %vm822_vm0, %v3184_v6  ;;  %3066 = vmatprep.mubr.msk.bf16.mxu1 %vm822_vm0, %v3185_v7 }
  0x92   :  { %2955 = vmatmul.mubr.msk.bf16.gmra.mrb[68].mxu0 %vm822_vm0, %v3186_v8  ;;  %3067 = vmatmul.mubr.msk.bf16.gmra.mrb[68].mxu1 %vm822_vm0, %v3187_v9 }
  0x93   :  { %2958 = vmatprep.mubr.msk.bf16.mxu0 %vm822_vm0, %v3188_v10  ;;  %3070 = vmatprep.mubr.msk.bf16.mxu1 %vm822_vm0, %v3189_v11 }
  0x9a   :  { %2959 = vmatmul.mubr.msk.bf16.gmra.mrb[72].mxu0 %vm822_vm0, %v3190_v12  ;;  %3071 = vmatmul.mubr.msk.bf16.gmra.mrb[72].mxu1 %vm822_vm0, %v3191_v13 }
  0x9b   :  { %2962 = vmatprep.mubr.msk.bf16.mxu0 %vm822_vm0, %v3192_v14  ;;  %3074 = vmatprep.mubr.msk.bf16.mxu1 %vm822_vm0, %v3193_v15 }
  0xa2   :  { %2963 = vmatmul.mubr.msk.bf16.gmra.mrb[76].mxu0 %vm822_vm0, %v3194_v16  ;;  %3075 = vmatmul.mubr.msk.bf16.gmra.mrb[76].mxu1 %vm822_vm0, %v3195_v17 }
  0xa3   :  { %2966 = vmatprep.mubr.msk.bf16.mxu0 %vm822_vm0, %v3196_v18  ;;  %3078 = vmatprep.mubr.msk.bf16.mxu1 %vm822_vm0, %v3197_v19 }
  0xaa   :  { %2967 = vmatmul.mubr.msk.bf16.gmra.mrb[80].mxu0 %vm822_vm0, %v3198_v20  ;;  %3079 = vmatmul.mubr.msk.bf16.gmra.mrb[80].mxu1 %vm822_vm0, %v3199_v21 }
  0xab   :  { %2970 = vmatprep.mubr.msk.bf16.mxu0 %vm822_vm0, %v3200_v22  ;;  %3082 = vmatprep.mubr.msk.bf16.mxu1 %vm822_vm0, %v3201_v23 }
  0xb2   :  { %2971 = vmatmul.mubr.msk.bf16.gmra.mrb[84].mxu0 %vm822_vm0, %v3202_v24  ;;  %3083 = vmatmul.mubr.msk.bf16.gmra.mrb[84].mxu1 %vm822_vm0, %v3203_v25 }
  0xb3   :  { %2974 = vmatprep.mubr.msk.bf16.mxu0 %vm822_vm0, %v3204_v26  ;;  %3086 = vmatprep.mubr.msk.bf16.mxu1 %vm822_vm0, %v3205_v27  ;;  %v3754_v26 = vld [vmem:[%s5019_s2] ss:$0 sm:$0xff] }
  0xba   :  { %2975 = vmatmul.mubr.msk.bf16.gmra.mrb[88].mxu0 %vm822_vm0, %v3206_v28  ;;  %3087 = vmatmul.mubr.msk.bf16.gmra.mrb[88].mxu1 %vm822_vm0, %v3207_v29 }
  0xbb   :  { %2978 = vmatprep.mubr.msk.bf16.mxu0 %vm822_vm0, %v3208_v30  ;;  %3090 = vmatprep.mubr.msk.bf16.mxu1 %vm822_vm0, %v3209_v31 }
  0xc2   :  { %2979 = vmatmul.mubr.msk.bf16.gmra.mrb[92].mxu0 %vm822_vm0, %v3210_v32  ;;  %3091 = vmatmul.mubr.msk.bf16.gmra.mrb[92].mxu1 %vm822_vm0, %v3211_v33 }
  0xc3   :  { %2982 = vmatprep.mubr.msk.bf16.mxu0 %vm822_vm0, %v3212_v34  ;;  %3094 = vmatprep.mubr.msk.bf16.mxu1 %vm822_vm0, %v3213_v35 }
  0xca   :  { %2983 = vmatmul.mubr.msk.bf16.gmra.mrb[96].mxu0 %vm822_vm0, %v3214_v36  ;;  %3095 = vmatmul.mubr.msk.bf16.gmra.mrb[96].mxu1 %vm822_vm0, %v3215_v37 }
  0xcb   :  { %2986 = vmatprep.mubr.msk.bf16.mxu0 %vm822_vm0, %v3216_v38  ;;  %3098 = vmatprep.mubr.msk.bf16.mxu1 %vm822_vm0, %v3217_v39 }
  0xd2   :  { %2987 = vmatmul.mubr.msk.bf16.gmra.mrb[100].mxu0 %vm822_vm0, %v3218_v40  ;;  %3099 = vmatmul.mubr.msk.bf16.gmra.mrb[100].mxu1 %vm822_vm0, %v3219_v41 }
  0xd3   :  { %2990 = vmatprep.mubr.msk.bf16.mxu0 %vm822_vm0, %v3220_v42  ;;  %3102 = vmatprep.mubr.msk.bf16.mxu1 %vm822_vm0, %v3221_v43 }
  0xda   :  { %2991 = vmatmul.mubr.msk.bf16.gmra.mrb[104].mxu0 %vm822_vm0, %v3222_v44  ;;  %3103 = vmatmul.mubr.msk.bf16.gmra.mrb[104].mxu1 %vm822_vm0, %v3223_v45 }
  0xdb   :  { %2994 = vmatprep.mubr.msk.bf16.mxu0 %vm822_vm0, %v3224_v46  ;;  %3106 = vmatprep.mubr.msk.bf16.mxu1 %vm822_vm0, %v3225_v47 }
  0xdd   :  { %v2888_v48 = vpop.f32.mrb[0].mxu0  ;;  %v3000_v49 = vpop.f32.mrb[0].mxu1 }
  0xde   :  { %v1193_v50 = vpop.f32.mrb[1].mxu0  ;;  %v1641_v51 = vpop.f32.mrb[1].mxu1  ;;  %v3761_v29 = vadd.f32 %v2888_v48, %v3754_v26  ;;  %v3764_v30 = vadd.f32 %v3000_v49, %v3754_v26 }
  0xdf   :  { %v2889_v54 = vpop.f32.mrb[2].mxu0  ;;  %v3001_v55 = vpop.f32.mrb[2].mxu1  ;;  %v3771_v33 = vadd.f32 %v3754_v26, %v1193_v50  ;;  %v3774_v34 = vadd.f32 %v3754_v26, %v1641_v51 }
  0xe0   :  { %v1196_v56 = vpop.f32.mrb[3].mxu0  ;;  %v1644_v57 = vpop.f32.mrb[3].mxu1  ;;  %v3781_v37 = vadd.f32 %v2889_v54, %v3754_v26  ;;  %v3784_v38 = vadd.f32 %v3001_v55, %v3754_v26 }
  0xe1   :  { %v3787_v39 = vadd.f32 %v3754_v26, %v1196_v56  ;;  %v3790_v40 = vadd.f32 %v3754_v26, %v1644_v57 }
  0xe2   :  { %2995 = vmatmul.mubr.msk.bf16.gmra.mrb[108].mxu0 %vm822_vm0, %v3226_v52  ;;  %3107 = vmatmul.mubr.msk.bf16.gmra.mrb[108].mxu1 %vm822_vm0, %v3227_v53 }
  0xe5   :  { %v2892_v58 = vpop.f32.mrb[4].mxu0  ;;  %v3004_v59 = vpop.f32.mrb[4].mxu1 }
  0xe6   :  { %v1209_v60 = vpop.f32.mrb[5].mxu0  ;;  %v1657_v61 = vpop.f32.mrb[5].mxu1  ;;  %v3797_v43 = vadd.f32 %v2892_v58, %v3754_v26  ;;  %v3800_v44 = vadd.f32 %v3004_v59, %v3754_v26 }
  0xe7   :  { %v2893_v62 = vpop.f32.mrb[6].mxu0  ;;  %v3005_v63 = vpop.f32.mrb[6].mxu1  ;;  %v3803_v45 = vadd.f32 %v3754_v26, %v1209_v60  ;;  %v3806_v46 = vadd.f32 %v3754_v26, %v1657_v61 }
  0xe8   :  { %v1212_v0 = vpop.f32.mrb[7].mxu0  ;;  %v1660_v1 = vpop.f32.mrb[7].mxu1  ;;  %v3811_v49 = vadd.f32 %v2893_v62, %v3754_v26  ;;  %v3814_v50 = vadd.f32 %v3005_v63, %v3754_v26 }
  0xe9   :  { %v3819_v53 = vadd.f32 %v3754_v26, %v1212_v0  ;;  %v3822_v54 = vadd.f32 %v3754_v26, %v1660_v1 }
  0xed   :  { %v3703_v2 = vpop.f32.mrb[8].mxu0  ;;  %v3705_v3 = vpop.f32.mrb[8].mxu1 }
  0xee   :  { %v3707_v4 = vpop.f32.mrb[9].mxu0  ;;  %v3709_v5 = vpop.f32.mrb[9].mxu1  ;;  %v3840_v57 = vadd.f32 %v3703_v2, %v3754_v26  ;;  %v3844_v59 = vadd.f32 %v3705_v3, %v3754_v26 }
  0xef   :  { %v3711_v6 = vpop.f32.mrb[10].mxu0  ;;  %v3713_v7 = vpop.f32.mrb[10].mxu1  ;;  %v3854_v1 = vadd.f32 %v3754_v26, %v3707_v4  ;;  %v3858_v2 = vadd.f32 %v3754_v26, %v3709_v5 }
  0xf0   :  { %v3715_v8 = vpop.f32.mrb[11].mxu0  ;;  %v3717_v9 = vpop.f32.mrb[11].mxu1  ;;  %v3866_v55 = vadd.f32 %v3711_v6, %v3754_v26  ;;  %v3870_v62 = vadd.f32 %v3713_v7, %v3754_v26 }
  0xf1   :  { %v3874_v4 = vadd.f32 %v3754_v26, %v3715_v8  ;;  %v3878_v5 = vadd.f32 %v3754_v26, %v3717_v9 }
  0xf5   :  { %v3719_v10 = vpop.f32.mrb[12].mxu0  ;;  %v3721_v11 = vpop.f32.mrb[12].mxu1 }
  0xf6   :  { %v3723_v12 = vpop.f32.mrb[13].mxu0  ;;  %v3725_v13 = vpop.f32.mrb[13].mxu1  ;;  %v3886_v6 = vadd.f32 %v3719_v10, %v3754_v26  ;;  %v3890_v7 = vadd.f32 %v3721_v11, %v3754_v26 }
  0xf7   :  { %v3727_v14 = vpop.f32.mrb[14].mxu0  ;;  %v3729_v15 = vpop.f32.mrb[14].mxu1  ;;  %v3894_v8 = vadd.f32 %v3754_v26, %v3723_v12  ;;  %v3898_v9 = vadd.f32 %v3754_v26, %v3725_v13 }
  0xf8   :  { %v3731_v16 = vpop.f32.mrb[15].mxu0  ;;  %v3733_v17 = vpop.f32.mrb[15].mxu1  ;;  %v3904_v10 = vadd.f32 %v3727_v14, %v3754_v26  ;;  %v3908_v11 = vadd.f32 %v3729_v15, %v3754_v26 }
  0xf9   :  { %5061 = vst [vmem:[#allocation10_spill] sm:$0xff] %v3898_v9  ;;  %v3914_v13 = vadd.f32 %v3754_v26, %v3731_v16  ;;  %v3918_v51 = vadd.f32 %v3754_v26, %v3733_v17 }
  0xfa   :  { %5062 = vst [vmem:[#allocation11_spill] sm:$0xff] %v3904_v10  ;;  %5063 = vst [vmem:[#allocation12_spill] sm:$0xff] %v3908_v11 }
  0xfb   :  { %5064 = vst [vmem:[#allocation13_spill] sm:$0xff] %v3914_v13  ;;  %5065 = vst [vmem:[#allocation14_spill] sm:$0xff] %v3918_v51 }
  0xfd   :  { %v3735_v18 = vpop.f32.mrb[16].mxu0  ;;  %v3737_v19 = vpop.f32.mrb[16].mxu1 }
  0xfe   :  { %v3739_v20 = vpop.f32.mrb[17].mxu0  ;;  %v3741_v21 = vpop.f32.mrb[17].mxu1 }
  0xff   :  { %v3743_v22 = vpop.f32.mrb[18].mxu0  ;;  %v3745_v23 = vpop.f32.mrb[18].mxu1 }
 0x100   :  { %v3747_v24 = vpop.f32.mrb[19].mxu0  ;;  %v3749_v25 = vpop.f32.mrb[19].mxu1 }
 0x105   :  { %v3756_v27 = vpop.f32.mrb[20].mxu0  ;;  %v3758_v28 = vpop.f32.mrb[20].mxu1 }
 0x106   :  { %v3766_v31 = vpop.f32.mrb[21].mxu0  ;;  %v3768_v32 = vpop.f32.mrb[21].mxu1 }
 0x107   :  { %v3776_v35 = vpop.f32.mrb[22].mxu0  ;;  %v3778_v36 = vpop.f32.mrb[22].mxu1 }
 0x108   :  { %v3792_v41 = vpop.f32.mrb[23].mxu0  ;;  %v3794_v42 = vpop.f32.mrb[23].mxu1 }
 0x10d   :  { %v3832_v63 = vpop.f32.mrb[24].mxu0  ;;  %v3834_v0 = vpop.f32.mrb[24].mxu1 }
 0x10e   :  { %5053 = vst [vmem:[#allocation2_spill] sm:$0xff] %v3832_v63  ;;  %5054 = vst [vmem:[#allocation3_spill] sm:$0xff] %v3834_v0  ;;  %v3846_v60 = vpop.f32.mrb[25].mxu0  ;;  %v3848_v61 = vpop.f32.mrb[25].mxu1 }
 0x10f   :  { %5055 = vst [vmem:[#allocation4_spill] sm:$0xff] %v3846_v60  ;;  %5056 = vst [vmem:[#allocation5_spill] sm:$0xff] %v3848_v61  ;;  %v3860_v56 = vpop.f32.mrb[26].mxu0  ;;  %v3862_v3 = vpop.f32.mrb[26].mxu1 }
 0x110   :  { %5057 = vst [vmem:[#allocation6_spill] sm:$0xff] %v3860_v56  ;;  %5058 = vst [vmem:[#allocation7_spill] sm:$0xff] %v3862_v3  ;;  %v3880_v58 = vpop.f32.mrb[27].mxu0  ;;  %v3882_v52 = vpop.f32.mrb[27].mxu1 }
 0x111   :  { %5059 = vst [vmem:[#allocation8_spill] sm:$0xff] %v3880_v58  ;;  %5060 = vst [vmem:[#allocation9_spill] sm:$0xff] %v3882_v52 }
 0x115   :  { %v2916_v3 = vpop.f32.mrb[28].mxu0  ;;  %v3028_v56 = vpop.f32.mrb[28].mxu1 }
 0x116   :  { %v1314_v14 = vadd.f32 %v2916_v3, %v3754_v26  ;;  %v1762_v52 = vadd.f32 %v3028_v56, %v3754_v26  ;;  %v1305_v61 = vpop.f32.mrb[29].mxu0  ;;  %v1753_v15 = vpop.f32.mrb[29].mxu1 }
 0x117   :  { %v1306_v58 = vadd.f32 %v3754_v26, %v1305_v61  ;;  %v1754_v16 = vadd.f32 %v3754_v26, %v1753_v15  ;;  %v2917_v60 = vpop.f32.mrb[30].mxu0  ;;  %v3029_v0 = vpop.f32.mrb[30].mxu1  ;;  %v5066_v61 = vmax.f32 %v3761_v29, 0.0  ;;  %v5067_v15 = vmax.f32 %v3764_v30, 0.0 }
 0x118   :  { %v2118_v63 = vmax.f32 %v1314_v14, 0.0  ;;  %v2230_v17 = vmax.f32 %v1762_v52, 0.0  ;;  %v1317_v48 = vadd.f32 %v2917_v60, %v3754_v26  ;;  %v1765_v3 = vadd.f32 %v3029_v0, %v3754_v26  ;;  %v1308_v11 = vpop.f32.mrb[31].mxu0  ;;  %v1756_v56 = vpop.f32.mrb[31].mxu1 }
 0x119   :  { %v2116_v10 = vmax.f32 %v1306_v58, 0.0  ;;  %v2228_v9 = vmax.f32 %v1754_v16, 0.0  ;;  %v1309_v47 = vadd.f32 %v3754_v26, %v1308_v11  ;;  %v1757_v12 = vadd.f32 %v3754_v26, %v1756_v56 }
 0x11a   :  { %v3942_v51 = vmax.f32 %v5066_v61, %v2118_v63  ;;  %v3946_v14 = vmax.f32 %v5067_v15, %v2230_v17  ;;  %v2119_v52 = vmax.f32 %v1317_v48, 0.0  ;;  %v2231_v60 = vmax.f32 %v1765_v3, 0.0 }
 0x11b   :  { %v5068_v0 = vmax.f32 %v3771_v33, 0.0  ;;  %v5069_v58 = vmax.f32 %v3774_v34, 0.0  ;;  %v2117_v11 = vmax.f32 %v1309_v47, 0.0  ;;  %v2229_v56 = vmax.f32 %v1757_v12, 0.0 }
 0x11c   :  { %v3958_v29 = vadd.f32 %v3735_v18, %v3754_v26  ;;  %v3962_v30 = vadd.f32 %v3737_v19, %v3754_v26  ;;  %v5070_v48 = vmax.f32 %v3781_v37, 0.0  ;;  %v5071_v33 = vmax.f32 %v3784_v38, 0.0 }
 0x11d   :  { %v3950_v13 = vmax.f32 %v5068_v0, %v2116_v10  ;;  %v3954_v16 = vmax.f32 %v5069_v58, %v2228_v9  ;;  %v3974_v34 = vadd.f32 %v3754_v26, %v3739_v20  ;;  %v3978_v18 = vadd.f32 %v3754_v26, %v3741_v21  ;;  %v2920_v12 = vpop.f32.mrb[32].mxu0  ;;  %v3032_v38 = vpop.f32.mrb[32].mxu1 }
 0x11e   :  { %v3966_v63 = vmax.f32 %v5070_v48, %v2119_v52  ;;  %v3970_v10 = vmax.f32 %v5071_v33, %v2231_v60  ;;  %v5072_v47 = vmax.f32 %v3787_v39, 0.0  ;;  %v5073_v37 = vmax.f32 %v3790_v40, 0.0  ;;  %v1321_v3 = vpop.f32.mrb[33].mxu0  ;;  %v1769_v61 = vpop.f32.mrb[33].mxu1 }
 0x11f   :  { %v3990_v17 = vadd.f32 %v3743_v22, %v3754_v26  ;;  %v3994_v20 = vadd.f32 %v3745_v23, %v3754_v26  ;;  %v1330_v21 = vadd.f32 %v2920_v12, %v3754_v26  ;;  %v1778_v39 = vadd.f32 %v3032_v38, %v3754_v26  ;;  %v2921_v23 = vpop.f32.mrb[34].mxu0  ;;  %v3033_v60 = vpop.f32.mrb[34].mxu1 }
 0x120   :  { %v3982_v19 = vmax.f32 %v5072_v47, %v2117_v11  ;;  %v3986_v9 = vmax.f32 %v5073_v37, %v2229_v56  ;;  %v4000_v40 = vadd.f32 %v3754_v26, %v3747_v24  ;;  %v4004_v15 = vadd.f32 %v3754_v26, %v3749_v25  ;;  %v1324_v48 = vpop.f32.mrb[35].mxu0  ;;  %v1772_v33 = vpop.f32.mrb[35].mxu1 }
 0x121   :  { %v1322_v22 = vadd.f32 %v3754_v26, %v1321_v3  ;;  %v1770_v52 = vadd.f32 %v3754_v26, %v1769_v61  ;;  %v2122_v0 = vmax.f32 %v1330_v21, 0.0  ;;  %v2234_v58 = vmax.f32 %v1778_v39, 0.0 }
 0x122   :  { %v1333_v11 = vadd.f32 %v2921_v23, %v3754_v26  ;;  %v1781_v56 = vadd.f32 %v3033_v60, %v3754_v26  ;;  %v1325_v37 = vadd.f32 %v3754_v26, %v1324_v48  ;;  %v1773_v25 = vadd.f32 %v3754_v26, %v1772_v33 }
 0x123   :  { %v2120_v24 = vmax.f32 %v1322_v22, 0.0  ;;  %v2232_v47 = vmax.f32 %v1770_v52, 0.0  ;;  %v5074_v12 = vmax.f32 %v3797_v43, 0.0  ;;  %v5075_v3 = vmax.f32 %v3800_v44, 0.0 }
 0x124   :  { %v2123_v39 = vmax.f32 %v1333_v11, 0.0  ;;  %v2235_v61 = vmax.f32 %v1781_v56, 0.0  ;;  %v5076_v23 = vmax.f32 %v3803_v45, 0.0  ;;  %v5077_v22 = vmax.f32 %v3806_v46, 0.0 }
 0x125   :  { %v4014_v38 = vmax.f32 %v5074_v12, %v2122_v0  ;;  %v4018_v21 = vmax.f32 %v5075_v3, %v2234_v58  ;;  %v2121_v48 = vmax.f32 %v1325_v37, 0.0  ;;  %v2233_v33 = vmax.f32 %v1773_v25, 0.0  ;;  %v2924_v12 = vpop.f32.mrb[36].mxu0 }
 0x126   :  { %v4022_v60 = vmax.f32 %v5076_v23, %v2120_v24  ;;  %v4026_v52 = vmax.f32 %v5077_v22, %v2232_v47  ;;  %v5078_v44 = vmax.f32 %v3811_v49, 0.0  ;;  %v5080_v11 = vmax.f32 %v3814_v50, 0.0  ;;  %v3036_v49 = vpop.f32.mrb[36].mxu1  ;;  %v1337_v23 = vpop.f32.mrb[37].mxu0 }
 0x127   :  { %v5082_v24 = vmax.f32 %v3819_v53, 0.0  ;;  %v5084_v37 = vmax.f32 %v3822_v54, 0.0  ;;  %v1785_v22 = vpop.f32.mrb[37].mxu1  ;;  %v1338_v54 = vadd.f32 %v3754_v26, %v1337_v23  ;;  %v5086_v23 = vmax.f32 %v3840_v57, 0.0 }
 0x128   :  { %v4032_v58 = vmax.f32 %v5078_v44, %v2123_v39  ;;  %v4036_v56 = vmax.f32 %v5080_v11, %v2235_v61  ;;  %v1346_v39 = vadd.f32 %v2924_v12, %v3754_v26  ;;  %v1794_v61 = vadd.f32 %v3036_v49, %v3754_v26  ;;  %v2925_v44 = vpop.f32.mrb[38].mxu0  ;;  %v3037_v11 = vpop.f32.mrb[38].mxu1 }
 0x129   :  { %v4042_v47 = vmax.f32 %v5082_v24, %v2121_v48  ;;  %v4046_v25 = vmax.f32 %v5084_v37, %v2233_v33  ;;  %v1786_v33 = vadd.f32 %v3754_v26, %v1785_v22  ;;  %v1349_v50 = vadd.f32 %v2925_v44, %v3754_v26  ;;  %v1340_v3 = vpop.f32.mrb[39].mxu0  ;;  %v1788_v49 = vpop.f32.mrb[39].mxu1 }
 0x12a   :  { %5079 = vst [vmem:[#allocation15_spill] sm:$0xff] %v4032_v58  ;;  %5081 = vst [vmem:[#allocation16_spill] sm:$0xff] %v4036_v56  ;;  %v2126_v24 = vmax.f32 %v1346_v39, 0.0  ;;  %v2238_v37 = vmax.f32 %v1794_v61, 0.0  ;;  %v1797_v12 = vadd.f32 %v3037_v11, %v3754_v26  ;;  %v2124_v46 = vmax.f32 %v1338_v54, 0.0 }
 0x12b   :  { %5083 = vst [vmem:[#allocation17_spill] sm:$0xff] %v4042_v47  ;;  %5085 = vst [vmem:[#allocation18_spill] sm:$0xff] %v4046_v25  ;;  %v2236_v45 = vmax.f32 %v1786_v33, 0.0  ;;  %v1341_v53 = vadd.f32 %v3754_v26, %v1340_v3  ;;  %v1789_v48 = vadd.f32 %v3754_v26, %v1788_v49  ;;  %v5088_v22 = vmax.f32 %v3844_v59, 0.0 }
 0x12c   :  { %v4062_v0 = vmax.f32 %v5086_v23, %v2126_v24  ;;  %v2127_v61 = vmax.f32 %v1349_v50, 0.0  ;;  %v2239_v44 = vmax.f32 %v1797_v12, 0.0  ;;  %v5090_v11 = vmax.f32 %v3854_v1, 0.0 }
 0x12d   :  { %v4066_v39 = vmax.f32 %v5088_v22, %v2238_v37  ;;  %v5092_v54 = vmax.f32 %v3858_v2, 0.0  ;;  %v2125_v3 = vmax.f32 %v1341_v53, 0.0  ;;  %v2237_v49 = vmax.f32 %v1789_v48, 0.0  ;;  %v2928_v48 = vpop.f32.mrb[40].mxu0 }
 0x12e   :  { %5087 = vst [vmem:[#allocation19_spill] sm:$0xff] %v4062_v0  ;;  %v4070_v43 = vmax.f32 %v5090_v11, %v2124_v46  ;;  %v4078_v57 = vadd.f32 %v3756_v27, %v3754_v26  ;;  %v4082_v59 = vadd.f32 %v3758_v28, %v3754_v26  ;;  %v5094_v50 = vmax.f32 %v3866_v55, 0.0  ;;  %v1353_v12 = vpop.f32.mrb[41].mxu0 }
 0x12f   :  { %5089 = vst [vmem:[#allocation20_spill] sm:$0xff] %v4066_v39  ;;  %v4074_v33 = vmax.f32 %v5092_v54, %v2236_v45  ;;  %v5096_v1 = vmax.f32 %v3870_v62, 0.0  ;;  %v4094_v2 = vadd.f32 %v3754_v26, %v3766_v31  ;;  %v4098_v27 = vadd.f32 %v3754_v26, %v3768_v32  ;;  %v3040_v62 = vpop.f32.mrb[40].mxu1 }
 0x130   :  { %5091 = vst [vmem:[#allocation21_spill] sm:$0xff] %v4070_v43  ;;  %v4086_v24 = vmax.f32 %v5094_v50, %v2127_v61  ;;  %v5098_v45 = vmax.f32 %v3874_v4, 0.0  ;;  %v5100_v55 = vmax.f32 %v3878_v5, 0.0  ;;  %v4110_v37 = vadd.f32 %v3776_v35, %v3754_v26  ;;  %v1801_v23 = vpop.f32.mrb[41].mxu1 }
 0x131   :  { %5093 = vst [vmem:[#allocation22_spill] sm:$0xff] %v4074_v33  ;;  %v4090_v46 = vmax.f32 %v5096_v1, %v2239_v44  ;;  %v4114_v31 = vadd.f32 %v3778_v36, %v3754_v26  ;;  %v1362_v32 = vadd.f32 %v2928_v48, %v3754_v26  ;;  %v1810_v4 = vadd.f32 %v3040_v62, %v3754_v26  ;;  %v2929_v36 = vpop.f32.mrb[42].mxu0  ;;  %v3041_v44 = vpop.f32.mrb[42].mxu1 }
 0x132   :  { %5095 = vst [vmem:[#allocation23_spill] sm:$0xff] %v4086_v24  ;;  %v4102_v28 = vmax.f32 %v5098_v45, %v2125_v3  ;;  %v4106_v53 = vmax.f32 %v5100_v55, %v2237_v49  ;;  %v4120_v5 = vadd.f32 %v3754_v26, %v3792_v41  ;;  %v4124_v22 = vadd.f32 %v3754_v26, %v3794_v42  ;;  %v1356_v50 = vpop.f32.mrb[43].mxu0  ;;  %v1804_v1 = vpop.f32.mrb[43].mxu1 }
 0x133   :  { %5097 = vst [vmem:[#allocation24_spill] sm:$0xff] %v4090_v46  ;;  %v1354_v35 = vadd.f32 %v3754_v26, %v1353_v12  ;;  %v1802_v61 = vadd.f32 %v3754_v26, %v1801_v23  ;;  %v2130_v11 = vmax.f32 %v1362_v32, 0.0  ;;  %v2242_v54 = vmax.f32 %v1810_v4, 0.0 }
 0x134   :  { %5099 = vst [vmem:[#allocation25_spill] sm:$0xff] %v4102_v28  ;;  %5101 = vst [vmem:[#allocation26_spill] sm:$0xff] %v4106_v53  ;;  %v1365_v3 = vadd.f32 %v2929_v36, %v3754_v26  ;;  %v1813_v49 = vadd.f32 %v3041_v44, %v3754_v26  ;;  %v1357_v55 = vadd.f32 %v3754_v26, %v1356_v50  ;;  %v5102_v48 = vmax.f32 %v3886_v6, 0.0 }
 0x135   :  { %v2128_v41 = vmax.f32 %v1354_v35, 0.0  ;;  %v2240_v45 = vmax.f32 %v1802_v61, 0.0  ;;  %v1805_v42 = vadd.f32 %v3754_v26, %v1804_v1  ;;  %v5104_v12 = vmax.f32 %v3890_v7, 0.0  ;;  %v5108_v35 = vld [vmem:[#allocation10_spill] sm:$0xff] }
 0x136   :  { %v4134_v62 = vmax.f32 %v5102_v48, %v2130_v11  ;;  %v2131_v4 = vmax.f32 %v1365_v3, 0.0  ;;  %v2243_v23 = vmax.f32 %v1813_v49, 0.0  ;;  %v5106_v36 = vmax.f32 %v3894_v8, 0.0  ;;  %v5111_v48 = vld [vmem:[#allocation11_spill] sm:$0xff]  ;;  %v5114_v3 = vld [vmem:[#allocation12_spill] sm:$0xff]  ;;  %v2932_v11 = vpop.f32.mrb[44].mxu0 }
 0x137   :  { %v4138_v32 = vmax.f32 %v5104_v12, %v2242_v54  ;;  %v5109_v61 = vmax.f32 %v5108_v35, 0.0  ;;  %v2129_v50 = vmax.f32 %v1357_v55, 0.0  ;;  %v2241_v1 = vmax.f32 %v1805_v42, 0.0  ;;  %v5120_v42 = vld [vmem:[#allocation14_spill] sm:$0xff] }
 0x138   :  { %5103 = vst [vmem:[#allocation27_spill] sm:$0xff] %v4134_v62  ;;  %v4142_v44 = vmax.f32 %v5106_v36, %v2128_v41  ;;  %v5112_v7 = vmax.f32 %v5111_v48, 0.0  ;;  %v5115_v49 = vmax.f32 %v5114_v3, 0.0  ;;  %v5121_v35 = vmax.f32 %v5120_v42, 0.0  ;;  %v3044_v48 = vpop.f32.mrb[44].mxu1 }
 0x139   :  { %5105 = vst [vmem:[#allocation28_spill] sm:$0xff] %v4138_v32  ;;  %v4146_v53 = vmax.f32 %v5109_v61, %v2240_v45  ;;  %v5117_v45 = vld [vmem:[#allocation13_spill] sm:$0xff]  ;;  %v1826_v3 = vadd.f32 %v3044_v48, %v3754_v26  ;;  %v1817_v41 = vpop.f32.mrb[45].mxu1 }
 0x13a   :  { %5107 = vst [vmem:[#allocation29_spill] sm:$0xff] %v4142_v44  ;;  %v4152_v54 = vmax.f32 %v5112_v7, %v2131_v4  ;;  %v4156_v12 = vmax.f32 %v5115_v49, %v2243_v23  ;;  %v5118_v36 = vmax.f32 %v5117_v45, 0.0  ;;  %v4166_v61 = vmax.f32 %v5121_v35, %v2241_v1  ;;  %v1369_v49 = vpop.f32.mrb[45].mxu0  ;;  %v3045_v35 = vpop.f32.mrb[46].mxu1 }
 0x13b   :  { %5110 = vst [vmem:[#allocation10_spill] sm:$0xff] %v4146_v53  ;;  %v1378_v23 = vadd.f32 %v2932_v11, %v3754_v26  ;;  %v1818_v1 = vadd.f32 %v3754_v26, %v1817_v41  ;;  %v2933_v42 = vpop.f32.mrb[46].mxu0  ;;  %v2246_v4 = vmax.f32 %v1826_v3, 0.0  ;;  %v1829_v11 = vadd.f32 %v3045_v35, %v3754_v26  ;;  %v1820_v48 = vpop.f32.mrb[47].mxu1 }
 0x13c   :  { %5113 = vst [vmem:[#allocation11_spill] sm:$0xff] %v4152_v54  ;;  %5116 = vst [vmem:[#allocation12_spill] sm:$0xff] %v4156_v12  ;;  %v4162_v55 = vmax.f32 %v5118_v36, %v2129_v50  ;;  %v1370_v36 = vadd.f32 %v3754_v26, %v1369_v49  ;;  %v1381_v7 = vadd.f32 %v2933_v42, %v3754_v26  ;;  %v1372_v6 = vpop.f32.mrb[47].mxu0  ;;  %v5123_v49 = vmax.f32 %v3958_v29, 0.0  ;;  %v5131_v29 = vld [vmem:[#allocation2_spill] sm:$0xff] }
 0x13d   :  { %5122 = vst [vmem:[#allocation14_spill] sm:$0xff] %v4166_v61  ;;  %v2134_v8 = vmax.f32 %v1378_v23, 0.0  ;;  %v1373_v45 = vadd.f32 %v3754_v26, %v1372_v6  ;;  %v1821_v50 = vadd.f32 %v3754_v26, %v1820_v48  ;;  %v5125_v41 = vmax.f32 %v3962_v30, 0.0  ;;  %v5132_v30 = vld [vmem:[#allocation3_spill] sm:$0xff] }
 0x13e   :  { %5119 = vst [vmem:[#allocation13_spill] sm:$0xff] %v4162_v55  ;;  %v2132_v61 = vmax.f32 %v1370_v36, 0.0  ;;  %v2244_v55 = vmax.f32 %v1818_v1, 0.0  ;;  %v2135_v3 = vmax.f32 %v1381_v7, 0.0  ;;  %v2247_v42 = vmax.f32 %v1829_v11, 0.0 }
 0x13f   :  { %v4182_v12 = vmax.f32 %v5123_v49, %v2134_v8  ;;  %v4186_v23 = vmax.f32 %v5125_v41, %v2246_v4  ;;  %v5127_v35 = vmax.f32 %v3974_v34, 0.0  ;;  %v5129_v36 = vmax.f32 %v3978_v18, 0.0  ;;  %v5137_v18 = vld [vmem:[#allocation4_spill] sm:$0xff] }
 0x140   :  { %v2133_v6 = vmax.f32 %v1373_v45, 0.0  ;;  %v2245_v48 = vmax.f32 %v1821_v50, 0.0  ;;  %v4198_v8 = vadd.f32 %v5131_v29, %v3754_v26  ;;  %v4202_v4 = vadd.f32 %v5132_v30, %v3754_v26  ;;  %v5138_v45 = vld [vmem:[#allocation5_spill] sm:$0xff]  ;;  %v5144_v29 = vld [vmem:[#allocation7_spill] sm:$0xff] }
 0x141   :  { %5124 = vst [vmem:[#allocation30_spill] sm:$0xff] %v4182_v12  ;;  %5126 = vst [vmem:[#allocation31_spill] sm:$0xff] %v4186_v23  ;;  %v4190_v54 = vmax.f32 %v5127_v35, %v2132_v61  ;;  %v4194_v1 = vmax.f32 %v5129_v36, %v2244_v55  ;;  %v5133_v7 = vmax.f32 %v3990_v17, 0.0  ;;  %v5135_v34 = vmax.f32 %v3994_v20, 0.0  ;;  %v2936_v35 = vpop.f32.mrb[48].mxu0  ;;  %v3048_v20 = vpop.f32.mrb[48].mxu1 }
 0x142   :  { %v4214_v55 = vadd.f32 %v3754_v26, %v5137_v18  ;;  %v4218_v50 = vadd.f32 %v3754_v26, %v5138_v45  ;;  %v5139_v49 = vmax.f32 %v4000_v40, 0.0  ;;  %v5141_v17 = vmax.f32 %v4004_v15, 0.0  ;;  %v5145_v18 = vld [vmem:[#allocation8_spill] sm:$0xff] }
 0x143   :  { %5128 = vst [vmem:[#allocation32_spill] sm:$0xff] %v4190_v54  ;;  %5130 = vst [vmem:[#allocation33_spill] sm:$0xff] %v4194_v1  ;;  %v4206_v11 = vmax.f32 %v5133_v7, %v2135_v3  ;;  %v4210_v61 = vmax.f32 %v5135_v34, %v2247_v42  ;;  %v5143_v42 = vld [vmem:[#allocation6_spill] sm:$0xff]  ;;  %v4234_v30 = vadd.f32 %v5144_v29, %v3754_v26  ;;  %v1833_v34 = vpop.f32.mrb[49].mxu1 }
 0x144   :  { %v4222_v41 = vmax.f32 %v5139_v49, %v2133_v6  ;;  %v4226_v3 = vmax.f32 %v5141_v17, %v2245_v48  ;;  %v4230_v36 = vadd.f32 %v5143_v42, %v3754_v26  ;;  %v1394_v7 = vadd.f32 %v2936_v35, %v3754_v26  ;;  %v1385_v6 = vpop.f32.mrb[49].mxu0  ;;  %v5146_v48 = vld [vmem:[#allocation9_spill] sm:$0xff]  ;;  %v3049_v29 = vpop.f32.mrb[50].mxu1 }
 0x145   :  { %5134 = vst [vmem:[#allocation2_spill] sm:$0xff] %v4206_v11  ;;  %5136 = vst [vmem:[#allocation3_spill] sm:$0xff] %v4210_v61  ;;  %v1842_v40 = vadd.f32 %v3048_v20, %v3754_v26  ;;  %v4240_v15 = vadd.f32 %v3754_v26, %v5145_v18  ;;  %v4244_v45 = vadd.f32 %v3754_v26, %v5146_v48  ;;  %v2937_v42 = vpop.f32.mrb[50].mxu0  ;;  %v1836_v11 = vpop.f32.mrb[51].mxu1 }
 0x146   :  { %5140 = vst [vmem:[#allocation4_spill] sm:$0xff] %v4222_v41  ;;  %5142 = vst [vmem:[#allocation5_spill] sm:$0xff] %v4226_v3  ;;  %v1386_v49 = vadd.f32 %v3754_v26, %v1385_v6  ;;  %v1834_v17 = vadd.f32 %v3754_v26, %v1833_v34  ;;  %v2138_v3 = vmax.f32 %v1394_v7, 0.0  ;;  %v1397_v20 = vadd.f32 %v2937_v42, %v3754_v26  ;;  %v1388_v61 = vpop.f32.mrb[51].mxu0 }
 0x147   :  { %v2250_v35 = vmax.f32 %v1842_v40, 0.0  ;;  %v1845_v41 = vadd.f32 %v3049_v29, %v3754_v26  ;;  %v1389_v54 = vadd.f32 %v3754_v26, %v1388_v61  ;;  %v1837_v48 = vadd.f32 %v3754_v26, %v1836_v11 }
 0x148   :  { %v2136_v18 = vmax.f32 %v1386_v49, 0.0  ;;  %v2248_v1 = vmax.f32 %v1834_v17, 0.0  ;;  %v5147_v6 = vmax.f32 %v4078_v57, 0.0  ;;  %v5149_v34 = vmax.f32 %v4082_v59, 0.0 }
 0x149   :  { %v2139_v40 = vmax.f32 %v1397_v20, 0.0  ;;  %v2251_v42 = vmax.f32 %v1845_v41, 0.0  ;;  %v5151_v29 = vmax.f32 %v4094_v2, 0.0  ;;  %v5153_v49 = vmax.f32 %v4098_v27, 0.0 }
 0x14a   :  { %v4254_v23 = vmax.f32 %v5147_v6, %v2138_v3  ;;  %v4258_v7 = vmax.f32 %v5149_v34, %v2250_v35  ;;  %v2137_v61 = vmax.f32 %v1389_v54, 0.0  ;;  %v2249_v11 = vmax.f32 %v1837_v48, 0.0 }
 0x14b   :  { %v4262_v12 = vmax.f32 %v5151_v29, %v2136_v18  ;;  %v4266_v17 = vmax.f32 %v5153_v49, %v2248_v1  ;;  %v2114_v57 = vmax.f32 %v4198_v8, 0.0  ;;  %v2226_v3 = vmax.f32 %v4202_v4, 0.0  ;;  %v2940_v4 = vpop.f32.mrb[52].mxu0 }
 0x14c   :  { %5148 = vst [vmem:[#allocation6_spill] sm:$0xff] %v4254_v23  ;;  %5150 = vst [vmem:[#allocation7_spill] sm:$0xff] %v4258_v7  ;;  %v5155_v59 = vmax.f32 %v4110_v37, 0.0  ;;  %v5157_v41 = vmax.f32 %v4114_v31, 0.0  ;;  %v2112_v2 = vmax.f32 %v4214_v55, 0.0  ;;  %v2224_v27 = vmax.f32 %v4218_v50, 0.0 }
 0x14d   :  { %5152 = vst [vmem:[#allocation8_spill] sm:$0xff] %v4262_v12  ;;  %5154 = vst [vmem:[#allocation9_spill] sm:$0xff] %v4266_v17  ;;  %v5159_v1 = vmax.f32 %v4120_v5, 0.0  ;;  %v5161_v8 = vmax.f32 %v4124_v22, 0.0  ;;  %v3052_v37 = vpop.f32.mrb[52].mxu1  ;;  %v2115_v48 = vmax.f32 %v4230_v36, 0.0  ;;  %v1410_v6 = vadd.f32 %v2940_v4, %v3754_v26 }
 0x14e   :  { %v4272_v35 = vmax.f32 %v5155_v59, %v2139_v40  ;;  %v4276_v20 = vmax.f32 %v5157_v41, %v2251_v42  ;;  %v2227_v31 = vmax.f32 %v4234_v30, 0.0  ;;  %v1858_v55 = vadd.f32 %v3052_v37, %v3754_v26  ;;  %v1401_v34 = vpop.f32.mrb[53].mxu0  ;;  %v1849_v50 = vpop.f32.mrb[53].mxu1 }
 0x14f   :  { %v4282_v54 = vmax.f32 %v5159_v1, %v2137_v61  ;;  %v4286_v18 = vmax.f32 %v5161_v8, %v2249_v11  ;;  %v2113_v5 = vmax.f32 %v4240_v15, 0.0  ;;  %v2225_v40 = vmax.f32 %v4244_v45, 0.0  ;;  %v2941_v29 = vpop.f32.mrb[54].mxu0  ;;  %v3053_v49 = vpop.f32.mrb[54].mxu1 }
 0x150   :  { %5156 = vst [vmem:[#allocation34_spill] sm:$0xff] %v4272_v35  ;;  %5158 = vst [vmem:[#allocation35_spill] sm:$0xff] %v4276_v20  ;;  %v1402_v22 = vadd.f32 %v3754_v26, %v1401_v34  ;;  %v1850_v42 = vadd.f32 %v3754_v26, %v1849_v50  ;;  %v2142_v61 = vmax.f32 %v1410_v6, 0.0  ;;  %v2254_v36 = vmax.f32 %v1858_v55, 0.0  ;;  %v1404_v59 = vpop.f32.mrb[55].mxu0  ;;  %v1852_v41 = vpop.f32.mrb[55].mxu1 }
 0x151   :  { %5160 = vst [vmem:[#allocation36_spill] sm:$0xff] %v4282_v54  ;;  %5162 = vst [vmem:[#allocation37_spill] sm:$0xff] %v4286_v18  ;;  %v1413_v30 = vadd.f32 %v2941_v29, %v3754_v26  ;;  %v1861_v11 = vadd.f32 %v3053_v49, %v3754_v26  ;;  %v1405_v15 = vadd.f32 %v3754_v26, %v1404_v59 }
 0x152   :  { %v2140_v1 = vmax.f32 %v1402_v22, 0.0  ;;  %v2252_v8 = vmax.f32 %v1850_v42, 0.0  ;;  %v1853_v45 = vadd.f32 %v3754_v26, %v1852_v41  ;;  %v4300_v4 = vmax.f32 %v2114_v57, %v2142_v61  ;;  %v2944_v57 = vpop.f32.mrb[56].mxu0  ;;  %v3056_v61 = vpop.f32.mrb[56].mxu1 }
 0x153   :  { %v4302_v37 = vmax.f32 %v2226_v3, %v2254_v36  ;;  %v2143_v34 = vmax.f32 %v1413_v30, 0.0  ;;  %v2255_v50 = vmax.f32 %v1861_v11, 0.0  ;;  %v2141_v29 = vmax.f32 %v1405_v15, 0.0  ;;  %v1417_v3 = vpop.f32.mrb[57].mxu0  ;;  %v1865_v36 = vpop.f32.mrb[57].mxu1 }
 0x154   :  { %5163 = vst [vmem:[#allocation38_spill] sm:$0xff] %v4300_v4  ;;  %v4304_v6 = vmax.f32 %v2112_v2, %v2140_v1  ;;  %v4306_v55 = vmax.f32 %v2224_v27, %v2252_v8  ;;  %v2253_v49 = vmax.f32 %v1853_v45, 0.0  ;;  %v2945_v30 = vpop.f32.mrb[58].mxu0  ;;  %v3057_v11 = vpop.f32.mrb[58].mxu1  ;;  %v4333_v17 = vadd.f32 %v2944_v57, %v3754_v26 }
 0x155   :  { %5164 = vst [vmem:[#allocation39_spill] sm:$0xff] %v4302_v37  ;;  %v4308_v18 = vmax.f32 %v2115_v48, %v2143_v34  ;;  %v4310_v22 = vmax.f32 %v2227_v31, %v2255_v50  ;;  %v4312_v42 = vmax.f32 %v2113_v5, %v2141_v29  ;;  %v1420_v2 = vpop.f32.mrb[59].mxu0  ;;  %v1868_v41 = vpop.f32.mrb[59].mxu1  ;;  %v4336_v12 = vadd.f32 %v3056_v61, %v3754_v26 }
 0x156   :  { %5165 = vst [vmem:[#allocation40_spill] sm:$0xff] %v4304_v6  ;;  %5166 = vst [vmem:[#allocation41_spill] sm:$0xff] %v4306_v55  ;;  %v4314_v59 = vmax.f32 %v2225_v40, %v2253_v49  ;;  %v2948_v27 = vpop.f32.mrb[60].mxu0  ;;  %v3060_v1 = vpop.f32.mrb[60].mxu1  ;;  %v4339_v7 = vadd.f32 %v3754_v26, %v1417_v3  ;;  %v4342_v23 = vadd.f32 %v3754_v26, %v1865_v36 }
 0x157   :  { %5167 = vst [vmem:[#allocation42_spill] sm:$0xff] %v4308_v18  ;;  %5168 = vst [vmem:[#allocation43_spill] sm:$0xff] %v4310_v22  ;;  %v1433_v8 = vpop.f32.mrb[61].mxu0  ;;  %v1881_v15 = vpop.f32.mrb[61].mxu1  ;;  %v4345_v53 = vadd.f32 %v2945_v30, %v3754_v26  ;;  %v4348_v44 = vadd.f32 %v3057_v11, %v3754_v26  ;;  %v4351_v32 = vadd.f32 %v3754_v26, %v1420_v2 }
 0x158   :  { %5169 = vst [vmem:[#allocation44_spill] sm:$0xff] %v4312_v42  ;;  %5170 = vst [vmem:[#allocation45_spill] sm:$0xff] %v4314_v59  ;;  %v2949_v48 = vpop.f32.mrb[62].mxu0  ;;  %v3061_v45 = vpop.f32.mrb[62].mxu1  ;;  %v4354_v57 = vadd.f32 %v3754_v26, %v1868_v41  ;;  %v4363_v2 = vadd.f32 %v2948_v27, %v3754_v26  ;;  %v4366_v41 = vadd.f32 %v3060_v1, %v3754_v26 }
 0x159   :  { %v1436_v31 = vpop.f32.mrb[63].mxu0  ;;  %v1884_v34 = vpop.f32.mrb[63].mxu1  ;;  %v4371_v36 = vadd.f32 %v3754_v26, %v1433_v8  ;;  %v4374_v33 = vadd.f32 %v3754_v26, %v1881_v15  ;;  %v4377_v27 = vadd.f32 %v2949_v48, %v3754_v26  ;;  %v4380_v1 = vadd.f32 %v3061_v45, %v3754_v26 }
 0x15a   :  { %v4383_v43 = vadd.f32 %v3754_v26, %v1436_v31  ;;  %v4386_v3 = vadd.f32 %v3754_v26, %v1884_v34 }
 0x15d   :  { %v2952_v5 = vpop.f32.mrb[64].mxu0  ;;  %v3064_v50 = vpop.f32.mrb[64].mxu1 }
 0x15e   :  { %v1449_v40 = vpop.f32.mrb[65].mxu0  ;;  %v1897_v29 = vpop.f32.mrb[65].mxu1  ;;  %v4389_v39 = vadd.f32 %v2952_v5, %v3754_v26  ;;  %v4392_v15 = vadd.f32 %v3064_v50, %v3754_v26 }
 0x15f   :  { %v2953_v49 = vpop.f32.mrb[66].mxu0  ;;  %v3065_v59 = vpop.f32.mrb[66].mxu1  ;;  %v4395_v48 = vadd.f32 %v3754_v26, %v1449_v40  ;;  %v4398_v45 = vadd.f32 %v3754_v26, %v1897_v29 }
 0x160   :  { %v1452_v42 = vpop.f32.mrb[67].mxu0  ;;  %v1900_v22 = vpop.f32.mrb[67].mxu1  ;;  %v4403_v34 = vadd.f32 %v2953_v49, %v3754_v26  ;;  %v4406_v25 = vadd.f32 %v3065_v59, %v3754_v26 }
 0x161   :  { %5171 = vst [vmem:[#allocation46_spill] sm:$0xff] %v4398_v45  ;;  %v4411_v40 = vadd.f32 %v3754_v26, %v1452_v42  ;;  %v4414_v29 = vadd.f32 %v3754_v26, %v1900_v22 }
 0x162   :  { %5172 = vst [vmem:[#allocation47_spill] sm:$0xff] %v4403_v34  ;;  %5173 = vst [vmem:[#allocation48_spill] sm:$0xff] %v4406_v25 }
 0x163   :  { %5174 = vst [vmem:[#allocation49_spill] sm:$0xff] %v4411_v40  ;;  %5175 = vst [vmem:[#allocation50_spill] sm:$0xff] %v4414_v29 }
 0x165   :  { %v4316_v18 = vpop.f32.mrb[68].mxu0  ;;  %v4318_v55 = vpop.f32.mrb[68].mxu1 }
 0x166   :  { %v4320_v6 = vpop.f32.mrb[69].mxu0  ;;  %v4322_v37 = vpop.f32.mrb[69].mxu1  ;;  %v4428_v0 = vadd.f32 %v4316_v18, %v3754_v26  ;;  %v4432_v47 = vadd.f32 %v4318_v55, %v3754_v26 }
 0x167   :  { %v4324_v4 = vpop.f32.mrb[70].mxu0  ;;  %v4326_v54 = vpop.f32.mrb[70].mxu1  ;;  %v4438_v49 = vadd.f32 %v3754_v26, %v4320_v6  ;;  %v4442_v31 = vadd.f32 %v3754_v26, %v4322_v37 }
 0x168   :  { %v4328_v20 = vpop.f32.mrb[71].mxu0  ;;  %v4330_v35 = vpop.f32.mrb[71].mxu1  ;;  %5176 = vst [vmem:[#allocation51_spill] sm:$0xff] %v4432_v47  ;;  %v4446_v55 = vadd.f32 %v4324_v4, %v3754_v26  ;;  %v4450_v25 = vadd.f32 %v4326_v54, %v3754_v26 }
 0x169   :  { %5177 = vst [vmem:[#allocation52_spill] sm:$0xff] %v4438_v49  ;;  %5178 = vst [vmem:[#allocation53_spill] sm:$0xff] %v4442_v31  ;;  %v4454_v42 = vadd.f32 %v3754_v26, %v4328_v20  ;;  %v4458_v6 = vadd.f32 %v3754_v26, %v4330_v35 }
 0x16d   :  { %v2960_v28 = vpop.f32.mrb[72].mxu0  ;;  %v3072_v30 = vpop.f32.mrb[72].mxu1 }
 0x16e   :  { %v1481_v24 = vpop.f32.mrb[73].mxu0  ;;  %v1929_v61 = vpop.f32.mrb[73].mxu1  ;;  %v4461_v29 = vadd.f32 %v2960_v28, %v3754_v26  ;;  %v4464_v4 = vadd.f32 %v3072_v30, %v3754_v26 }
 0x16f   :  { %v2961_v46 = vpop.f32.mrb[74].mxu0  ;;  %v3073_v11 = vpop.f32.mrb[74].mxu1  ;;  %v4467_v40 = vadd.f32 %v3754_v26, %v1481_v24  ;;  %v4470_v54 = vadd.f32 %v3754_v26, %v1929_v61 }
 0x170   :  { %v1484_v62 = vpop.f32.mrb[75].mxu0  ;;  %v1932_v8 = vpop.f32.mrb[75].mxu1  ;;  %v4475_v35 = vadd.f32 %v2961_v46, %v3754_v26  ;;  %v4478_v45 = vadd.f32 %v3073_v11, %v3754_v26 }
 0x171   :  { %5179 = vst [vmem:[#allocation54_spill] sm:$0xff] %v4470_v54  ;;  %v4483_v24 = vadd.f32 %v3754_v26, %v1484_v62  ;;  %v4486_v61 = vadd.f32 %v3754_v26, %v1932_v8 }
 0x172   :  { %5180 = vst [vmem:[#allocation55_spill] sm:$0xff] %v4475_v35  ;;  %5181 = vst [vmem:[#allocation56_spill] sm:$0xff] %v4478_v45 }
 0x173   :  { %5182 = vst [vmem:[#allocation57_spill] sm:$0xff] %v4483_v24  ;;  %5183 = vst [vmem:[#allocation58_spill] sm:$0xff] %v4486_v61 }
 0x175   :  { %v2964_v56 = vpop.f32.mrb[76].mxu0  ;;  %v3076_v58 = vpop.f32.mrb[76].mxu1 }
 0x176   :  { %v1497_v59 = vpop.f32.mrb[77].mxu0  ;;  %v1945_v5 = vpop.f32.mrb[77].mxu1  ;;  %v4499_v34 = vadd.f32 %v2964_v56, %v3754_v26  ;;  %v4502_v46 = vadd.f32 %v3076_v58, %v3754_v26 }
 0x177   :  { %v2965_v18 = vpop.f32.mrb[78].mxu0  ;;  %v3077_v22 = vpop.f32.mrb[78].mxu1  ;;  %v4507_v62 = vadd.f32 %v3754_v26, %v1497_v59  ;;  %v4510_v54 = vadd.f32 %v3754_v26, %v1945_v5 }
 0x178   :  { %v1500_v37 = vpop.f32.mrb[79].mxu0  ;;  %v1948_v50 = vpop.f32.mrb[79].mxu1  ;;  %5184 = vst [vmem:[#allocation59_spill] sm:$0xff] %v4502_v46  ;;  %v4513_v56 = vadd.f32 %v2965_v18, %v3754_v26  ;;  %v4516_v58 = vadd.f32 %v3077_v22, %v3754_v26 }
 0x179   :  { %5185 = vst [vmem:[#allocation60_spill] sm:$0xff] %v4510_v54  ;;  %v4519_v45 = vadd.f32 %v3754_v26, %v1500_v37  ;;  %v4522_v28 = vadd.f32 %v3754_v26, %v1948_v50 }
 0x17a   :  { %5186 = vst [vmem:[#allocation61_spill] sm:$0xff] %v4513_v56  ;;  %5187 = vst [vmem:[#allocation62_spill] sm:$0xff] %v4516_v58 }
 0x17b   :  { %5188 = vst [vmem:[#allocation63_spill] sm:$0xff] %v4519_v45  ;;  %5189 = vst [vmem:[#allocation64_spill] sm:$0xff] %v4522_v28 }
 0x17d   :  { %v2968_v31 = vpop.f32.mrb[80].mxu0  ;;  %v3080_v49 = vpop.f32.mrb[80].mxu1 }
 0x17e   :  { %v1513_v47 = vpop.f32.mrb[81].mxu0  ;;  %v1961_v11 = vpop.f32.mrb[81].mxu1  ;;  %v4525_v61 = vadd.f32 %v2968_v31, %v3754_v26  ;;  %v4528_v5 = vadd.f32 %v3080_v49, %v3754_v26 }
 0x17f   :  { %v2969_v8 = vpop.f32.mrb[82].mxu0  ;;  %v3081_v20 = vpop.f32.mrb[82].mxu1  ;;  %v4531_v18 = vadd.f32 %v3754_v26, %v1513_v47  ;;  %v4534_v22 = vadd.f32 %v3754_v26, %v1961_v11 }
 0x180   :  { %v1516_v30 = vpop.f32.mrb[83].mxu0  ;;  %v1964_v59 = vpop.f32.mrb[83].mxu1  ;;  %5190 = vst [vmem:[#allocation65_spill] sm:$0xff] %v4525_v61  ;;  %5191 = vst [vmem:[#allocation66_spill] sm:$0xff] %v4528_v5  ;;  %v4539_v50 = vadd.f32 %v2969_v8, %v3754_v26  ;;  %v4542_v35 = vadd.f32 %v3081_v20, %v3754_v26  ;;  %v4565_v8 = vld [vmem:[%s5019_s2] ss:$0 sm:$0xff] }
 0x181   :  { %5192 = vst [vmem:[#allocation67_spill] sm:$0xff] %v4531_v18  ;;  %5193 = vst [vmem:[#allocation68_spill] sm:$0xff] %v4534_v22  ;;  %v4547_v47 = vadd.f32 %v3754_v26, %v1516_v30  ;;  %v4550_v11 = vadd.f32 %v3754_v26, %v1964_v59 }
 0x182   :  { %5194 = vst [vmem:[#allocation69_spill] sm:$0xff] %v4539_v50  ;;  %5195 = vst [vmem:[#allocation70_spill] sm:$0xff] %v4542_v35 }
 0x183   :  { %5196 = vst [vmem:[#allocation71_spill] sm:$0xff] %v4547_v47  ;;  %5197 = vst [vmem:[#allocation72_spill] sm:$0xff] %v4550_v11 }
 0x185   :  { %v2972_v54 = vpop.f32.mrb[84].mxu0  ;;  %v3084_v26 = vpop.f32.mrb[84].mxu1 }
 0x186   :  { %v1538_v20 = vadd.f32 %v4565_v8, %v2972_v54  ;;  %v1986_v46 = vadd.f32 %v4565_v8, %v3084_v26  ;;  %v1529_v31 = vpop.f32.mrb[85].mxu0  ;;  %v1977_v24 = vpop.f32.mrb[85].mxu1 }
 0x187   :  { %v1530_v22 = vadd.f32 %v4565_v8, %v1529_v31  ;;  %v1978_v59 = vadd.f32 %v4565_v8, %v1977_v24  ;;  %v2973_v37 = vpop.f32.mrb[86].mxu0  ;;  %v3085_v35 = vpop.f32.mrb[86].mxu1  ;;  %v5198_v31 = vmax.f32 %v4333_v17, 0.0  ;;  %v5199_v24 = vmax.f32 %v4336_v12, 0.0 }
 0x188   :  { %v2174_v50 = vmax.f32 %v1538_v20, 0.0  ;;  %v2286_v18 = vmax.f32 %v1986_v46, 0.0  ;;  %v1541_v5 = vadd.f32 %v4565_v8, %v2973_v37  ;;  %v1989_v54 = vadd.f32 %v4565_v8, %v3085_v35  ;;  %v1532_v61 = vpop.f32.mrb[87].mxu0  ;;  %v1980_v26 = vpop.f32.mrb[87].mxu1 }
 0x189   :  { %v2172_v28 = vmax.f32 %v1530_v22, 0.0  ;;  %v2284_v45 = vmax.f32 %v1978_v59, 0.0  ;;  %v1533_v49 = vadd.f32 %v4565_v8, %v1532_v61  ;;  %v1981_v30 = vadd.f32 %v4565_v8, %v1980_v26 }
 0x18a   :  { %v2370_v11 = vmax.f32 %v5198_v31, %v2174_v50  ;;  %v2398_v47 = vmax.f32 %v5199_v24, %v2286_v18  ;;  %v2175_v20 = vmax.f32 %v1541_v5, 0.0  ;;  %v2287_v46 = vmax.f32 %v1989_v54, 0.0 }
 0x18b   :  { %v5200_v37 = vmax.f32 %v4339_v7, 0.0  ;;  %v5201_v35 = vmax.f32 %v4342_v23, 0.0  ;;  %v2173_v22 = vmax.f32 %v1533_v49, 0.0  ;;  %v2285_v59 = vmax.f32 %v1981_v30, 0.0 }
 0x18c   :  { %v2426_v61 = vmax.f32 %v3942_v51, %v2370_v11  ;;  %v2454_v26 = vmax.f32 %v3946_v14, %v2398_v47  ;;  %v5202_v17 = vmax.f32 %v4345_v53, 0.0  ;;  %v5203_v12 = vmax.f32 %v4348_v44, 0.0 }
 0x18d   :  { %v2368_v58 = vmax.f32 %v5200_v37, %v2172_v28  ;;  %v2396_v56 = vmax.f32 %v5201_v35, %v2284_v45  ;;  %v5204_v28 = vmax.f32 %v4351_v32, 0.0  ;;  %v5205_v45 = vmax.f32 %v4354_v57, 0.0  ;;  %v2976_v30 = vpop.f32.mrb[88].mxu0  ;;  %v3088_v51 = vpop.f32.mrb[88].mxu1 }
 0x18e   :  { %v2371_v50 = vmax.f32 %v5202_v17, %v2175_v20  ;;  %v2399_v18 = vmax.f32 %v5203_v12, %v2287_v46  ;;  %2483 = vst.msk [vmem:[%s5020_s3 + $0x10] sm:$0xff] %vm2480_vm1, %v2426_v61  ;;  %2511 = vst.msk [vmem:[%s5020_s3 + $0xf0] sm:$0xff] %vm2480_vm1, %v2454_v26  ;;  %v2002_v53 = vadd.f32 %v4565_v8, %v3088_v51  ;;  %v1545_v32 = vpop.f32.mrb[89].mxu0  ;;  %v1993_v44 = vpop.f32.mrb[89].mxu1  ;;  %v5207_v61 = vmax.f32 %v4366_v41, 0.0 }
 0x18f   :  { %v2424_v5 = vmax.f32 %v3950_v13, %v2368_v58  ;;  %v2452_v7 = vmax.f32 %v3954_v16, %v2396_v56  ;;  %v2369_v23 = vmax.f32 %v5204_v28, %v2173_v22  ;;  %v2397_v49 = vmax.f32 %v5205_v45, %v2285_v59  ;;  %v2977_v58 = vpop.f32.mrb[90].mxu0  ;;  %v3089_v47 = vpop.f32.mrb[90].mxu1 }
 0x190   :  { %v2427_v13 = vmax.f32 %v3966_v63, %v2371_v50  ;;  %v2455_v14 = vmax.f32 %v3970_v10, %v2399_v18  ;;  %v1554_v16 = vadd.f32 %v4565_v8, %v2976_v30  ;;  %v1546_v57 = vadd.f32 %v4565_v8, %v1545_v32  ;;  %v1548_v31 = vpop.f32.mrb[91].mxu0  ;;  %v1996_v24 = vpop.f32.mrb[91].mxu1 }
 0x191   :  { %2481 = vst.msk [vmem:[%s5020_s3] sm:$0xff] %vm2480_vm1, %v2424_v5  ;;  %2509 = vst.msk [vmem:[%s5020_s3 + $0xe0] sm:$0xff] %vm2480_vm1, %v2452_v7  ;;  %v2425_v63 = vmax.f32 %v3982_v19, %v2369_v23  ;;  %v2453_v10 = vmax.f32 %v3986_v9, %v2397_v49  ;;  %v1994_v56 = vadd.f32 %v4565_v8, %v1993_v44  ;;  %v2290_v19 = vmax.f32 %v2002_v53, 0.0 }
 0x192   :  { %2484 = vst.msk [vmem:[%s5020_s3 + $0x18] sm:$0xff] %vm2480_vm1, %v2427_v13  ;;  %2512 = vst.msk [vmem:[%s5020_s3 + $0xf8] sm:$0xff] %vm2480_vm1, %v2455_v14  ;;  %v2178_v11 = vmax.f32 %v1554_v16, 0.0  ;;  %v1557_v9 = vadd.f32 %v4565_v8, %v2977_v58  ;;  %v2005_v54 = vadd.f32 %v4565_v8, %v3089_v47  ;;  %v2176_v20 = vmax.f32 %v1546_v57, 0.0  ;;  %v5217_v57 = vld [vmem:[#allocation18_spill] sm:$0xff] }
 0x193   :  { %2482 = vst.msk [vmem:[%s5020_s3 + $0x8] sm:$0xff] %vm2480_vm1, %v2425_v63  ;;  %2510 = vst.msk [vmem:[%s5020_s3 + $0xe8] sm:$0xff] %vm2480_vm1, %v2453_v10  ;;  %v2288_v46 = vmax.f32 %v1994_v56, 0.0  ;;  %v1549_v37 = vadd.f32 %v4565_v8, %v1548_v31  ;;  %v1997_v35 = vadd.f32 %v4565_v8, %v1996_v24  ;;  %v5206_v22 = vmax.f32 %v4363_v2, 0.0  ;;  %v5216_v63 = vld [vmem:[#allocation17_spill] sm:$0xff] }
 0x194   :  { %v2402_v26 = vmax.f32 %v5207_v61, %v2290_v19  ;;  %v2179_v17 = vmax.f32 %v1557_v9, 0.0  ;;  %v2291_v50 = vmax.f32 %v2005_v54, 0.0  ;;  %v5208_v12 = vmax.f32 %v4371_v36, 0.0 }
 0x195   :  { %v2374_v59 = vmax.f32 %v5206_v22, %v2178_v11  ;;  %v5209_v5 = vmax.f32 %v4374_v33, 0.0  ;;  %v2177_v28 = vmax.f32 %v1549_v37, 0.0  ;;  %v2289_v23 = vmax.f32 %v1997_v35, 0.0  ;;  %v2980_v32 = vpop.f32.mrb[92].mxu0 }
 0x196   :  { %v2372_v18 = vmax.f32 %v5208_v12, %v2176_v20  ;;  %v2458_v49 = vmax.f32 %v4018_v21, %v2402_v26  ;;  %v5210_v2 = vmax.f32 %v4377_v27, 0.0  ;;  %v5211_v41 = vmax.f32 %v4380_v1, 0.0  ;;  %v5214_v21 = vld [vmem:[#allocation15_spill] sm:$0xff]  ;;  %v1561_v1 = vpop.f32.mrb[93].mxu0 }
 0x197   :  { %v2400_v7 = vmax.f32 %v5209_v5, %v2288_v46  ;;  %v2430_v45 = vmax.f32 %v4014_v38, %v2374_v59  ;;  %v5212_v14 = vmax.f32 %v4383_v43, 0.0  ;;  %v5213_v16 = vmax.f32 %v4386_v3, 0.0  ;;  %v3092_v38 = vpop.f32.mrb[92].mxu1  ;;  %v2981_v11 = vpop.f32.mrb[94].mxu0 }
 0x198   :  { %v2375_v30 = vmax.f32 %v5210_v2, %v2179_v17  ;;  %v2403_v51 = vmax.f32 %v5211_v41, %v2291_v50  ;;  %v2428_v13 = vmax.f32 %v4022_v60, %v2372_v18  ;;  %2515 = vst.msk [vmem:[%s5020_s3 + $0x110] sm:$0xff] %vm2480_vm1, %v2458_v49  ;;  %v1570_v27 = vadd.f32 %v4565_v8, %v2980_v32  ;;  %v2009_v44 = vpop.f32.mrb[93].mxu1  ;;  %v1564_v20 = vpop.f32.mrb[95].mxu0 }
 0x199   :  { %v2456_v36 = vmax.f32 %v4026_v52, %v2400_v7  ;;  %v2373_v33 = vmax.f32 %v5212_v14, %v2177_v28  ;;  %v2401_v53 = vmax.f32 %v5213_v16, %v2289_v23  ;;  %2487 = vst.msk [vmem:[%s5020_s3 + $0x30] sm:$0xff] %vm2480_vm1, %v2430_v45  ;;  %v5215_v52 = vld [vmem:[#allocation16_spill] sm:$0xff]  ;;  %v2018_v3 = vadd.f32 %v4565_v8, %v3092_v38  ;;  %v3093_v19 = vpop.f32.mrb[94].mxu1  ;;  %v5221_v28 = vld [vmem:[#allocation46_spill] sm:$0xff] }
 0x19a   :  { %v2431_v60 = vmax.f32 %v5214_v21, %v2375_v30  ;;  %v2459_v43 = vmax.f32 %v5215_v52, %v2403_v51  ;;  %2485 = vst.msk [vmem:[%s5020_s3 + $0x20] sm:$0xff] %vm2480_vm1, %v2428_v13  ;;  %v1562_v58 = vadd.f32 %v4565_v8, %v1561_v1  ;;  %v2010_v47 = vadd.f32 %v4565_v8, %v2009_v44  ;;  %v2012_v46 = vpop.f32.mrb[95].mxu1  ;;  %v5223_v30 = vld [vmem:[#allocation19_spill] sm:$0xff]  ;;  %v5224_v51 = vld [vmem:[#allocation20_spill] sm:$0xff]  ;;  %v5230_v38 = vld [vmem:[#allocation22_spill] sm:$0xff] }
 0x19b   :  { %2513 = vst.msk [vmem:[%s5020_s3 + $0x100] sm:$0xff] %vm2480_vm1, %v2456_v36  ;;  %v2429_v10 = vmax.f32 %v5216_v63, %v2373_v33  ;;  %v2457_v56 = vmax.f32 %v5217_v57, %v2401_v53  ;;  %v2182_v9 = vmax.f32 %v1570_v27, 0.0  ;;  %v2294_v54 = vmax.f32 %v2018_v3, 0.0  ;;  %v5225_v36 = vld [vmem:[#allocation47_spill] sm:$0xff]  ;;  %v5227_v33 = vld [vmem:[#allocation48_spill] sm:$0xff]  ;;  %v5229_v53 = vld [vmem:[#allocation21_spill] sm:$0xff] }
 0x19c   :  { %2488 = vst.msk [vmem:[%s5020_s3 + $0x38] sm:$0xff] %vm2480_vm1, %v2431_v60  ;;  %2516 = vst.msk [vmem:[%s5020_s3 + $0x118] sm:$0xff] %vm2480_vm1, %v2459_v43  ;;  %v1573_v31 = vadd.f32 %v4565_v8, %v2981_v11  ;;  %v2021_v24 = vadd.f32 %v4565_v8, %v3093_v19  ;;  %v2180_v37 = vmax.f32 %v1562_v58, 0.0  ;;  %v2292_v35 = vmax.f32 %v2010_v47, 0.0  ;;  %v5231_v21 = vld [vmem:[#allocation49_spill] sm:$0xff]  ;;  %v5233_v43 = vld [vmem:[#allocation50_spill] sm:$0xff] }
 0x19d   :  { %2486 = vst.msk [vmem:[%s5020_s3 + $0x28] sm:$0xff] %vm2480_vm1, %v2429_v10  ;;  %2514 = vst.msk [vmem:[%s5020_s3 + $0x108] sm:$0xff] %vm2480_vm1, %v2457_v56  ;;  %v1565_v22 = vadd.f32 %v4565_v8, %v1564_v20  ;;  %v2013_v59 = vadd.f32 %v4565_v8, %v2012_v46  ;;  %v5218_v61 = vmax.f32 %v4389_v39, 0.0  ;;  %v5219_v17 = vmax.f32 %v4392_v15, 0.0  ;;  %v2984_v1 = vpop.f32.mrb[96].mxu0  ;;  %v3096_v44 = vpop.f32.mrb[96].mxu1 }
 0x19e   :  { %v2183_v12 = vmax.f32 %v1573_v31, 0.0  ;;  %v2295_v18 = vmax.f32 %v2021_v24, 0.0  ;;  %v5220_v5 = vmax.f32 %v4395_v48, 0.0  ;;  %v5222_v23 = vmax.f32 %v5221_v28, 0.0  ;;  %v5235_v63 = vld [vmem:[#allocation23_spill] sm:$0xff]  ;;  %v5236_v57 = vld [vmem:[#allocation24_spill] sm:$0xff] }
 0x19f   :  { %v2378_v26 = vmax.f32 %v5218_v61, %v2182_v9  ;;  %v2406_v50 = vmax.f32 %v5219_v17, %v2294_v54  ;;  %v2181_v49 = vmax.f32 %v1565_v22, 0.0  ;;  %v2293_v2 = vmax.f32 %v2013_v59, 0.0  ;;  %v1577_v11 = vpop.f32.mrb[97].mxu0  ;;  %v2025_v19 = vpop.f32.mrb[97].mxu1  ;;  %v5237_v9 = vld [vmem:[#allocation25_spill] sm:$0xff]  ;;  %v5238_v31 = vld [vmem:[#allocation26_spill] sm:$0xff] }
 0x1a0   :  { %v2376_v7 = vmax.f32 %v5220_v5, %v2180_v37  ;;  %v2404_v45 = vmax.f32 %v5222_v23, %v2292_v35  ;;  %v5226_v39 = vmax.f32 %v5225_v36, 0.0  ;;  %v5228_v15 = vmax.f32 %v5227_v33, 0.0  ;;  %v2985_v37 = vpop.f32.mrb[98].mxu0  ;;  %v3097_v35 = vpop.f32.mrb[98].mxu1 }
 0x1a1   :  { %v2434_v41 = vmax.f32 %v5223_v30, %v2378_v26  ;;  %v2462_v13 = vmax.f32 %v5224_v51, %v2406_v50  ;;  %v5232_v60 = vmax.f32 %v5231_v21, 0.0  ;;  %v5234_v27 = vmax.f32 %v5233_v43, 0.0  ;;  %v1580_v17 = vpop.f32.mrb[99].mxu0  ;;  %v2028_v50 = vpop.f32.mrb[99].mxu1  ;;  %v5242_v51 = vld [vmem:[#allocation52_spill] sm:$0xff]  ;;  %v5250_v43 = vld [vmem:[#allocation29_spill] sm:$0xff] }
 0x1a2   :  { %v2379_v14 = vmax.f32 %v5226_v39, %v2183_v12  ;;  %v2407_v16 = vmax.f32 %v5228_v15, %v2295_v18  ;;  %v2432_v32 = vmax.f32 %v5229_v53, %v2376_v7  ;;  %v2460_v48 = vmax.f32 %v5230_v38, %v2404_v45  ;;  %v5240_v45 = vld [vmem:[#allocation51_spill] sm:$0xff]  ;;  %v5244_v39 = vld [vmem:[#allocation53_spill] sm:$0xff]  ;;  %v5247_v38 = vld [vmem:[#allocation28_spill] sm:$0xff] }
 0x1a3   :  { %v2377_v52 = vmax.f32 %v5232_v60, %v2181_v49  ;;  %v2405_v3 = vmax.f32 %v5234_v27, %v2293_v2  ;;  %2491 = vst.msk [vmem:[%s5020_s3 + $0x50] sm:$0xff] %vm2480_vm1, %v2434_v41  ;;  %2519 = vst.msk [vmem:[%s5020_s3 + $0x130] sm:$0xff] %vm2480_vm1, %v2462_v13  ;;  %v1586_v58 = vadd.f32 %v4565_v8, %v2984_v1  ;;  %v5239_v28 = vmax.f32 %v4428_v0, 0.0  ;;  %v5246_v53 = vld [vmem:[#allocation27_spill] sm:$0xff] }
 0x1a4   :  { %v2435_v10 = vmax.f32 %v5235_v63, %v2379_v14  ;;  %v2463_v56 = vmax.f32 %v5236_v57, %v2407_v16  ;;  %v2034_v47 = vadd.f32 %v4565_v8, %v3096_v44  ;;  %2489 = vst.msk [vmem:[%s5020_s3 + $0x40] sm:$0xff] %vm2480_vm1, %v2432_v32  ;;  %2517 = vst.msk [vmem:[%s5020_s3 + $0x120] sm:$0xff] %vm2480_vm1, %v2460_v48  ;;  %v5241_v49 = vmax.f32 %v5240_v45, 0.0 }
 0x1a5   :  { %v2433_v54 = vmax.f32 %v5237_v9, %v2377_v52  ;;  %v2461_v24 = vmax.f32 %v5238_v31, %v2405_v3  ;;  %v1578_v20 = vadd.f32 %v4565_v8, %v1577_v11  ;;  %v2026_v46 = vadd.f32 %v4565_v8, %v2025_v19  ;;  %v5251_v3 = vld [vmem:[#allocation10_spill] sm:$0xff] }
 0x1a6   :  { %2492 = vst.msk [vmem:[%s5020_s3 + $0x58] sm:$0xff] %vm2480_vm1, %v2435_v10  ;;  %2520 = vst.msk [vmem:[%s5020_s3 + $0x138] sm:$0xff] %vm2480_vm1, %v2463_v56  ;;  %v2186_v22 = vmax.f32 %v1586_v58, 0.0  ;;  %v2298_v59 = vmax.f32 %v2034_v47, 0.0  ;;  %v1589_v61 = vadd.f32 %v4565_v8, %v2985_v37  ;;  %v2037_v26 = vadd.f32 %v4565_v8, %v3097_v35  ;;  %v2988_v56 = vpop.f32.mrb[100].mxu0  ;;  %v3100_v58 = vpop.f32.mrb[100].mxu1 }
 0x1a7   :  { %2490 = vst.msk [vmem:[%s5020_s3 + $0x48] sm:$0xff] %vm2480_vm1, %v2433_v54  ;;  %2518 = vst.msk [vmem:[%s5020_s3 + $0x128] sm:$0xff] %vm2480_vm1, %v2461_v24  ;;  %v2184_v12 = vmax.f32 %v1578_v20, 0.0  ;;  %v2296_v18 = vmax.f32 %v2026_v46, 0.0  ;;  %v1581_v5 = vadd.f32 %v4565_v8, %v1580_v17  ;;  %v2029_v7 = vadd.f32 %v4565_v8, %v2028_v50  ;;  %v5255_v47 = vld [vmem:[#allocation12_spill] sm:$0xff]  ;;  %v1593_v19 = vpop.f32.mrb[101].mxu0 }
 0x1a8   :  { %v2382_v23 = vmax.f32 %v5239_v28, %v2186_v22  ;;  %v2410_v2 = vmax.f32 %v5241_v49, %v2298_v59  ;;  %v2187_v30 = vmax.f32 %v1589_v61, 0.0  ;;  %v2299_v41 = vmax.f32 %v2037_v26, 0.0  ;;  %v2041_v9 = vpop.f32.mrb[101].mxu1  ;;  %v5256_v54 = vld [vmem:[#allocation13_spill] sm:$0xff]  ;;  %v5257_v24 = vld [vmem:[#allocation14_spill] sm:$0xff]  ;;  %v2989_v35 = vpop.f32.mrb[102].mxu0 }
 0x1a9   :  { %v5243_v13 = vmax.f32 %v5242_v51, 0.0  ;;  %v5245_v14 = vmax.f32 %v5244_v39, 0.0  ;;  %v2185_v15 = vmax.f32 %v1581_v5, 0.0  ;;  %v2297_v16 = vmax.f32 %v2029_v7, 0.0  ;;  %v3101_v22 = vpop.f32.mrb[102].mxu1  ;;  %v1596_v50 = vpop.f32.mrb[103].mxu0 }
 0x1aa   :  { %v2438_v32 = vmax.f32 %v5246_v53, %v2382_v23  ;;  %v2466_v48 = vmax.f32 %v5247_v38, %v2410_v2  ;;  %v5248_v0 = vmax.f32 %v4446_v55, 0.0  ;;  %v5249_v60 = vmax.f32 %v4450_v25, 0.0  ;;  %v5254_v25 = vld [vmem:[#allocation11_spill] sm:$0xff] }
 0x1ab   :  { %v2380_v36 = vmax.f32 %v5243_v13, %v2184_v12  ;;  %v2408_v33 = vmax.f32 %v5245_v14, %v2296_v18  ;;  %v5252_v44 = vmax.f32 %v4454_v42, 0.0  ;;  %v5253_v10 = vmax.f32 %v4458_v6, 0.0  ;;  %v2044_v12 = vpop.f32.mrb[103].mxu1 }
 0x1ac   :  { %v2383_v21 = vmax.f32 %v5248_v0, %v2187_v30  ;;  %v2411_v52 = vmax.f32 %v5249_v60, %v2299_v41  ;;  %2495 = vst.msk [vmem:[%s5020_s3 + $0x70] sm:$0xff] %vm2480_vm1, %v2438_v32  ;;  %2523 = vst.msk [vmem:[%s5020_s3 + $0x150] sm:$0xff] %vm2480_vm1, %v2466_v48  ;;  %v1602_v11 = vadd.f32 %v4565_v8, %v2988_v56  ;;  %v5258_v23 = vmax.f32 %v4461_v29, 0.0  ;;  %v5264_v32 = vld [vmem:[#allocation31_spill] sm:$0xff] }
 0x1ad   :  { %v2436_v27 = vmax.f32 %v5250_v43, %v2380_v36  ;;  %v2464_v1 = vmax.f32 %v5251_v3, %v2408_v33  ;;  %v2381_v63 = vmax.f32 %v5252_v44, %v2185_v15  ;;  %v2409_v57 = vmax.f32 %v5253_v10, %v2297_v16  ;;  %v5261_v36 = vld [vmem:[#allocation54_spill] sm:$0xff]  ;;  %v5265_v48 = vld [vmem:[#allocation55_spill] sm:$0xff]  ;;  %v5271_v3 = vld [vmem:[#allocation57_spill] sm:$0xff]  ;;  %v2992_v56 = vpop.f32.mrb[104].mxu0 }
 0x1ae   :  { %v2439_v55 = vmax.f32 %v5254_v25, %v2383_v21  ;;  %v2467_v42 = vmax.f32 %v5255_v47, %v2411_v52  ;;  %v2050_v6 = vadd.f32 %v4565_v8, %v3100_v58  ;;  %v1594_v46 = vadd.f32 %v4565_v8, %v1593_v19  ;;  %v5263_v16 = vld [vmem:[#allocation30_spill] sm:$0xff]  ;;  %v5267_v21 = vld [vmem:[#allocation56_spill] sm:$0xff]  ;;  %v3104_v58 = vpop.f32.mrb[104].mxu1  ;;  %v5276_v47 = vld [vmem:[#allocation3_spill] sm:$0xff]  ;;  %v1609_v19 = vpop.f32.mrb[105].mxu0 }
 0x1af   :  { %2493 = vst.msk [vmem:[%s5020_s3 + $0x60] sm:$0xff] %vm2480_vm1, %v2436_v27  ;;  %2521 = vst.msk [vmem:[%s5020_s3 + $0x140] sm:$0xff] %vm2480_vm1, %v2464_v1  ;;  %v2437_v31 = vmax.f32 %v5256_v54, %v2381_v63  ;;  %v2465_v20 = vmax.f32 %v5257_v24, %v2409_v57  ;;  %v2042_v37 = vadd.f32 %v4565_v8, %v2041_v9  ;;  %v2190_v59 = vmax.f32 %v1602_v11, 0.0  ;;  %v5269_v52 = vld [vmem:[#allocation32_spill] sm:$0xff]  ;;  %v5270_v27 = vld [vmem:[#allocation33_spill] sm:$0xff]  ;;  %v2057_v9 = vpop.f32.mrb[105].mxu1 }
 0x1b0   :  { %2496 = vst.msk [vmem:[%s5020_s3 + $0x78] sm:$0xff] %vm2480_vm1, %v2439_v55  ;;  %2524 = vst.msk [vmem:[%s5020_s3 + $0x158] sm:$0xff] %vm2480_vm1, %v2467_v42  ;;  %v2302_v61 = vmax.f32 %v2050_v6, 0.0  ;;  %v1605_v26 = vadd.f32 %v4565_v8, %v2989_v35  ;;  %v2053_v17 = vadd.f32 %v4565_v8, %v3101_v22  ;;  %v2188_v18 = vmax.f32 %v1594_v46, 0.0  ;;  %v5273_v63 = vld [vmem:[#allocation58_spill] sm:$0xff]  ;;  %v5277_v54 = vld [vmem:[#allocation4_spill] sm:$0xff] }
 0x1b1   :  { %2494 = vst.msk [vmem:[%s5020_s3 + $0x68] sm:$0xff] %vm2480_vm1, %v2437_v31  ;;  %2522 = vst.msk [vmem:[%s5020_s3 + $0x148] sm:$0xff] %vm2480_vm1, %v2465_v20  ;;  %v2300_v5 = vmax.f32 %v2042_v37, 0.0  ;;  %v1597_v7 = vadd.f32 %v4565_v8, %v1596_v50  ;;  %v2045_v28 = vadd.f32 %v4565_v8, %v2044_v12  ;;  %v2386_v45 = vmax.f32 %v5258_v23, %v2190_v59  ;;  %v5275_v25 = vld [vmem:[#allocation2_spill] sm:$0xff]  ;;  %v5278_v24 = vld [vmem:[#allocation5_spill] sm:$0xff]  ;;  %v2993_v35 = vpop.f32.mrb[106].mxu0 }
 0x1b2   :  { %v5259_v49 = vmax.f32 %v4464_v4, 0.0  ;;  %v2191_v30 = vmax.f32 %v1605_v26, 0.0  ;;  %v2303_v41 = vmax.f32 %v2053_v17, 0.0  ;;  %v5260_v51 = vmax.f32 %v4467_v40, 0.0  ;;  %v3105_v22 = vpop.f32.mrb[106].mxu1  ;;  %v1612_v50 = vpop.f32.mrb[107].mxu0 }
 0x1b3   :  { %v5262_v39 = vmax.f32 %v5261_v36, 0.0  ;;  %v2189_v33 = vmax.f32 %v1597_v7, 0.0  ;;  %v2301_v15 = vmax.f32 %v2045_v28, 0.0  ;;  %v2442_v53 = vmax.f32 %v5263_v16, %v2386_v45  ;;  %v2060_v12 = vpop.f32.mrb[107].mxu1 }
 0x1b4   :  { %v2414_v2 = vmax.f32 %v5259_v49, %v2302_v61  ;;  %v2384_v13 = vmax.f32 %v5260_v51, %v2188_v18  ;;  %v5266_v29 = vmax.f32 %v5265_v48, 0.0  ;;  %v5268_v4 = vmax.f32 %v5267_v21, 0.0  ;;  %v5280_v49 = vld [vmem:[#allocation59_spill] sm:$0xff]  ;;  %v5289_v21 = vld [vmem:[#allocation62_spill] sm:$0xff] }
 0x1b5   :  { %v2412_v14 = vmax.f32 %v5262_v39, %v2300_v5  ;;  %v5272_v1 = vmax.f32 %v5271_v3, 0.0  ;;  %v5274_v10 = vmax.f32 %v5273_v63, 0.0  ;;  %2499 = vst.msk [vmem:[%s5020_s3 + $0x90] sm:$0xff] %vm2480_vm1, %v2442_v53  ;;  %v1618_v11 = vadd.f32 %v4565_v8, %v2992_v56  ;;  %v5283_v39 = vld [vmem:[#allocation60_spill] sm:$0xff]  ;;  %v5285_v53 = vld [vmem:[#allocation6_spill] sm:$0xff]  ;;  %v3108_v56 = vpop.f32.mrb[108].mxu1 }
 0x1b6   :  { %v2470_v38 = vmax.f32 %v5264_v32, %v2414_v2  ;;  %v2387_v0 = vmax.f32 %v5266_v29, %v2191_v30  ;;  %v2415_v60 = vmax.f32 %v5268_v4, %v2303_v41  ;;  %v2440_v43 = vmax.f32 %v5269_v52, %v2384_v13  ;;  %v5287_v29 = vld [vmem:[#allocation61_spill] sm:$0xff]  ;;  %v5291_v52 = vld [vmem:[#allocation8_spill] sm:$0xff] }
 0x1b7   :  { %v2468_v40 = vmax.f32 %v5270_v27, %v2412_v14  ;;  %v2385_v44 = vmax.f32 %v5272_v1, %v2189_v33  ;;  %v2413_v57 = vmax.f32 %v5274_v10, %v2301_v15  ;;  %v2066_v6 = vadd.f32 %v4565_v8, %v3104_v58  ;;  %v5292_v27 = vld [vmem:[#allocation9_spill] sm:$0xff]  ;;  %v5297_v58 = vld [vmem:[#allocation34_spill] sm:$0xff] }
 0x1b8   :  { %2527 = vst.msk [vmem:[%s5020_s3 + $0x170] sm:$0xff] %vm2480_vm1, %v2470_v38  ;;  %v2443_v55 = vmax.f32 %v5275_v25, %v2387_v0  ;;  %v2471_v42 = vmax.f32 %v5276_v47, %v2415_v60  ;;  %2497 = vst.msk [vmem:[%s5020_s3 + $0x80] sm:$0xff] %vm2480_vm1, %v2440_v43  ;;  %v1610_v46 = vadd.f32 %v4565_v8, %v1609_v19  ;;  %v2194_v59 = vmax.f32 %v1618_v11, 0.0  ;;  %v5286_v38 = vld [vmem:[#allocation7_spill] sm:$0xff]  ;;  %v2073_v19 = vpop.f32.mrb[109].mxu1 }
 0x1b9   :  { %2525 = vst.msk [vmem:[%s5020_s3 + $0x160] sm:$0xff] %vm2480_vm1, %v2468_v40  ;;  %v2441_v31 = vmax.f32 %v5277_v54, %v2385_v44  ;;  %v2469_v20 = vmax.f32 %v5278_v24, %v2413_v57  ;;  %v2058_v37 = vadd.f32 %v4565_v8, %v2057_v9  ;;  %v2306_v61 = vmax.f32 %v2066_v6, 0.0  ;;  %v5293_v40 = vld [vmem:[#allocation63_spill] sm:$0xff]  ;;  %v5295_v44 = vld [vmem:[#allocation64_spill] sm:$0xff]  ;;  %v2996_v57 = vpop.f32.mrb[108].mxu0 }
 0x1ba   :  { %2500 = vst.msk [vmem:[%s5020_s3 + $0x98] sm:$0xff] %vm2480_vm1, %v2443_v55  ;;  %2528 = vst.msk [vmem:[%s5020_s3 + $0x178] sm:$0xff] %vm2480_vm1, %v2471_v42  ;;  %v1621_v26 = vadd.f32 %v4565_v8, %v2993_v35  ;;  %v2069_v17 = vadd.f32 %v4565_v8, %v3105_v22  ;;  %v2192_v18 = vmax.f32 %v1610_v46, 0.0  ;;  %v1613_v7 = vadd.f32 %v4565_v8, %v1612_v50  ;;  %v5298_v55 = vld [vmem:[#allocation35_spill] sm:$0xff]  ;;  %v1625_v6 = vpop.f32.mrb[109].mxu0  ;;  %v5299_v9 = vld [vmem:[#allocation36_spill] sm:$0xff] }
 0x1bb   :  { %2498 = vst.msk [vmem:[%s5020_s3 + $0x88] sm:$0xff] %vm2480_vm1, %v2441_v31  ;;  %2526 = vst.msk [vmem:[%s5020_s3 + $0x168] sm:$0xff] %vm2480_vm1, %v2469_v20  ;;  %v2304_v5 = vmax.f32 %v2058_v37, 0.0  ;;  %v2061_v28 = vadd.f32 %v4565_v8, %v2060_v12  ;;  %v5279_v23 = vmax.f32 %v4499_v34, 0.0  ;;  %v5281_v2 = vmax.f32 %v5280_v49, 0.0  ;;  %v5300_v31 = vld [vmem:[#allocation37_spill] sm:$0xff] }
 0x1bc   :  { %v2195_v41 = vmax.f32 %v1621_v26, 0.0  ;;  %v2307_v51 = vmax.f32 %v2069_v17, 0.0  ;;  %v5282_v13 = vmax.f32 %v4507_v62, 0.0  ;;  %v5284_v14 = vmax.f32 %v5283_v39, 0.0  ;;  %v2997_v37 = vpop.f32.mrb[110].mxu0  ;;  %v3109_v35 = vpop.f32.mrb[110].mxu1 }
 0x1bd   :  { %v2390_v45 = vmax.f32 %v5279_v23, %v2194_v59  ;;  %v2418_v30 = vmax.f32 %v5281_v2, %v2306_v61  ;;  %v2193_v15 = vmax.f32 %v1613_v7, 0.0  ;;  %v2305_v16 = vmax.f32 %v2061_v28, 0.0  ;;  %v1628_v17 = vpop.f32.mrb[111].mxu0  ;;  %v2076_v50 = vpop.f32.mrb[111].mxu1  ;;  %v5301_v28 = vld [vmem:[#allocation65_spill] sm:$0xff]  ;;  %v5303_v49 = vld [vmem:[#allocation66_spill] sm:$0xff] }
 0x1be   :  { %v2388_v36 = vmax.f32 %v5282_v13, %v2192_v18  ;;  %v2416_v33 = vmax.f32 %v5284_v14, %v2304_v5  ;;  %v5288_v34 = vmax.f32 %v5287_v29, 0.0  ;;  %v5290_v4 = vmax.f32 %v5289_v21, 0.0  ;;  %v5305_v13 = vld [vmem:[#allocation67_spill] sm:$0xff]  ;;  %v5307_v14 = vld [vmem:[#allocation68_spill] sm:$0xff]  ;;  %v5311_v29 = vld [vmem:[#allocation69_spill] sm:$0xff] }
 0x1bf   :  { %v2446_v32 = vmax.f32 %v5285_v53, %v2390_v45  ;;  %v2474_v48 = vmax.f32 %v5286_v38, %v2418_v30  ;;  %v5294_v3 = vmax.f32 %v5293_v40, 0.0  ;;  %v5296_v63 = vmax.f32 %v5295_v44, 0.0  ;;  %v5313_v21 = vld [vmem:[#allocation70_spill] sm:$0xff]  ;;  %v5317_v40 = vld [vmem:[#allocation71_spill] sm:$0xff]  ;;  %v5319_v44 = vld [vmem:[#allocation72_spill] sm:$0xff] }
 0x1c0   :  { %v2391_v0 = vmax.f32 %v5288_v34, %v2195_v41  ;;  %v2419_v60 = vmax.f32 %v5290_v4, %v2307_v51  ;;  %v2444_v43 = vmax.f32 %v5291_v52, %v2388_v36  ;;  %v2472_v62 = vmax.f32 %v5292_v27, %v2416_v33  ;;  %v5315_v52 = vld [vmem:[#allocation40_spill] sm:$0xff]  ;;  %v5316_v27 = vld [vmem:[#allocation41_spill] sm:$0xff] }
 0x1c1   :  { %v2389_v1 = vmax.f32 %v5294_v3, %v2193_v15  ;;  %v2417_v10 = vmax.f32 %v5296_v63, %v2305_v16  ;;  %2503 = vst.msk [vmem:[%s5020_s3 + $0xb0] sm:$0xff] %vm2480_vm1, %v2446_v32  ;;  %2531 = vst.msk [vmem:[%s5020_s3 + $0x190] sm:$0xff] %vm2480_vm1, %v2474_v48  ;;  %v1634_v42 = vadd.f32 %v4565_v8, %v2996_v57  ;;  %v5302_v23 = vmax.f32 %v5301_v28, 0.0  ;;  %v5309_v32 = vld [vmem:[#allocation38_spill] sm:$0xff]  ;;  %v5310_v48 = vld [vmem:[#allocation39_spill] sm:$0xff] }
 0x1c2   :  { %v2447_v25 = vmax.f32 %v5297_v58, %v2391_v0  ;;  %v2475_v47 = vmax.f32 %v5298_v55, %v2419_v60  ;;  %v2082_v11 = vadd.f32 %v4565_v8, %v3108_v56  ;;  %2501 = vst.msk [vmem:[%s5020_s3 + $0xa0] sm:$0xff] %vm2480_vm1, %v2444_v43  ;;  %2529 = vst.msk [vmem:[%s5020_s3 + $0x180] sm:$0xff] %vm2480_vm1, %v2472_v62  ;;  %v5304_v2 = vmax.f32 %v5303_v49, 0.0  ;;  %v5321_v57 = vld [vmem:[#allocation42_spill] sm:$0xff]  ;;  %v5322_v58 = vld [vmem:[#allocation43_spill] sm:$0xff] }
 0x1c3   :  { %v2445_v54 = vmax.f32 %v5299_v9, %v2389_v1  ;;  %v2473_v24 = vmax.f32 %v5300_v31, %v2417_v10  ;;  %v1626_v20 = vadd.f32 %v4565_v8, %v1625_v6  ;;  %v2074_v46 = vadd.f32 %v4565_v8, %v2073_v19  ;;  %v5323_v55 = vld [vmem:[#allocation44_spill] sm:$0xff] }
 0x1c4   :  { %2504 = vst.msk [vmem:[%s5020_s3 + $0xb8] sm:$0xff] %vm2480_vm1, %v2447_v25  ;;  %2532 = vst.msk [vmem:[%s5020_s3 + $0x198] sm:$0xff] %vm2480_vm1, %v2475_v47  ;;  %v2198_v22 = vmax.f32 %v1634_v42, 0.0  ;;  %v2310_v59 = vmax.f32 %v2082_v11, 0.0  ;;  %v1637_v61 = vadd.f32 %v4565_v8, %v2997_v37  ;;  %v2085_v26 = vadd.f32 %v4565_v8, %v3109_v35  ;;  %v5324_v42 = vld [vmem:[#allocation45_spill] sm:$0xff] }
 0x1c5   :  { %2502 = vst.msk [vmem:[%s5020_s3 + $0xa8] sm:$0xff] %vm2480_vm1, %v2445_v54  ;;  %2530 = vst.msk [vmem:[%s5020_s3 + $0x188] sm:$0xff] %vm2480_vm1, %v2473_v24  ;;  %v2196_v12 = vmax.f32 %v1626_v20, 0.0  ;;  %v2308_v18 = vmax.f32 %v2074_v46, 0.0  ;;  %v1629_v5 = vadd.f32 %v4565_v8, %v1628_v17  ;;  %v2077_v7 = vadd.f32 %v4565_v8, %v2076_v50 }
 0x1c6   :  { %v2394_v45 = vmax.f32 %v5302_v23, %v2198_v22  ;;  %v2422_v30 = vmax.f32 %v5304_v2, %v2310_v59  ;;  %v2199_v41 = vmax.f32 %v1637_v61, 0.0  ;;  %v2311_v51 = vmax.f32 %v2085_v26, 0.0 }
 0x1c7   :  { %v5306_v36 = vmax.f32 %v5305_v13, 0.0  ;;  %v5308_v33 = vmax.f32 %v5307_v14, 0.0  ;;  %v2197_v16 = vmax.f32 %v1629_v5, 0.0  ;;  %v2309_v53 = vmax.f32 %v2077_v7, 0.0 }
 0x1c8   :  { %v2450_v38 = vmax.f32 %v5309_v32, %v2394_v45  ;;  %v2478_v8 = vmax.f32 %v5310_v48, %v2422_v30  ;;  %v5312_v34 = vmax.f32 %v5311_v29, 0.0  ;;  %v5314_v4 = vmax.f32 %v5313_v21, 0.0 }
 0x1c9   :  { %v2392_v39 = vmax.f32 %v5306_v36, %v2196_v12  ;;  %v2420_v15 = vmax.f32 %v5308_v33, %v2308_v18  ;;  %v5318_v3 = vmax.f32 %v5317_v40, 0.0  ;;  %v5320_v63 = vmax.f32 %v5319_v44, 0.0 }
 0x1ca   :  { %v2395_v0 = vmax.f32 %v5312_v34, %v2199_v41  ;;  %v2423_v60 = vmax.f32 %v5314_v4, %v2311_v51  ;;  %2507 = vst.msk [vmem:[%s5020_s3 + $0xd0] sm:$0xff] %vm2480_vm1, %v2450_v38  ;;  %2535 = vst.msk [vmem:[%s5020_s3 + $0x1b0] sm:$0xff] %vm2480_vm1, %v2478_v8 }
 0x1cb   :  { %v2448_v43 = vmax.f32 %v5315_v52, %v2392_v39  ;;  %v2476_v62 = vmax.f32 %v5316_v27, %v2420_v15  ;;  %v2393_v1 = vmax.f32 %v5318_v3, %v2197_v16  ;;  %v2421_v10 = vmax.f32 %v5320_v63, %v2309_v53 }
 0x1cc   :  { %v2451_v56 = vmax.f32 %v5321_v57, %v2395_v0  ;;  %v2479_v25 = vmax.f32 %v5322_v58, %v2423_v60 }
 0x1cd   :  { %2505 = vst.msk [vmem:[%s5020_s3 + $0xc0] sm:$0xff] %vm2480_vm1, %v2448_v43  ;;  %2533 = vst.msk [vmem:[%s5020_s3 + $0x1a0] sm:$0xff] %vm2480_vm1, %v2476_v62  ;;  %v2449_v47 = vmax.f32 %v5323_v55, %v2393_v1  ;;  %v2477_v11 = vmax.f32 %v5324_v42, %v2421_v10 }
 0x1ce   :  { %2508 = vst.msk [vmem:[%s5020_s3 + $0xd8] sm:$0xff] %vm2480_vm1, %v2451_v56  ;;  %2536 = vst.msk [vmem:[%s5020_s3 + $0x1b8] sm:$0xff] %vm2480_vm1, %v2479_v25 }
 0x1cf   :  { %2506 = vst.msk [vmem:[%s5020_s3 + $0xc8] sm:$0xff] %vm2480_vm1, %v2449_v47  ;;  %2534 = vst.msk [vmem:[%s5020_s3 + $0x1a8] sm:$0xff] %vm2480_vm1, %v2477_v11 }

// kernel: cnn_forward.4
= control target key start
LH: loop header
LB: loop body
LE: loop exit
PB: predicated region body
PF: predicated region fallthrough
CT: control target
= control target key end

     0   :  { %v2039_v0 = vmov 0   ;;  %vm1562_vm0 = vcmask 261120   ;;  %s2719_s1 = inlined_call_operand.vmem [shape: bf16[512,128], index: 1, kind: input, shape index: {}]   ;;  %s2720_s0 = inlined_call_operand.vmem [shape: bf16[2,224,512], index: 0, kind: input, shape index: {}]   ;;  %s2721_s2 = inlined_call_operand.vmem [shape: f32[1,128], index: 2, kind: input, shape index: {}]   ;;  %s2722_s3 = inlined_call_operand.vmem [shape: f32[2,56,32], index: 3, kind: output, shape index: {}]  }
   0x1   :  { %950 = vmatprep.subr.bf16.mxu1 %v2039_v0  ;;  %1207 = vmatprep.subr.bf16.mxu0 %v2039_v0  ;;  %v1839_v1 = vld [vmem:[%s2719_s1] sm:$0xff]   ;;  %v1841_v3 = vld [vmem:[%s2719_s1 + $0x8] sm:$0xff]   ;;  %v1843_v5 = vld [vmem:[%s2719_s1 + $0x10] sm:$0xff]  }
   0x2   :  { %v1840_v2 = vld [vmem:[%s2719_s1 + $0x80] sm:$0xff]   ;;  %951 = vmatpush1.bf16.msra.mxu1 %v1839_v1  ;;  %v1842_v4 = vld [vmem:[%s2719_s1 + $0x88] sm:$0xff]   ;;  %v1844_v6 = vld [vmem:[%s2719_s1 + $0x90] sm:$0xff]  }
   0x3   :  { %1208 = vmatpush1.bf16.msra.mxu0 %v1840_v2  ;;  %952 = vmatprep.subr.bf16.mxu1 %v2039_v0  ;;  %v1845_v7 = vld [vmem:[%s2719_s1 + $0x18] sm:$0xff]   ;;  %v1847_v9 = vld [vmem:[%s2719_s1 + $0x20] sm:$0xff]   ;;  %v1849_v11 = vld [vmem:[%s2719_s1 + $0x28] sm:$0xff]  }
   0x4   :  { %1209 = vmatprep.subr.bf16.mxu0 %v2039_v0  ;;  %v1846_v8 = vld [vmem:[%s2719_s1 + $0x98] sm:$0xff]   ;;  %v1848_v10 = vld [vmem:[%s2719_s1 + $0xa0] sm:$0xff]   ;;  %v1850_v12 = vld [vmem:[%s2719_s1 + $0xa8] sm:$0xff]  }
   0x5   :  { %v1851_v13 = vld [vmem:[%s2719_s1 + $0x30] sm:$0xff]   ;;  %v1853_v15 = vld [vmem:[%s2719_s1 + $0x38] sm:$0xff]   ;;  %v1855_v17 = vld [vmem:[%s2719_s1 + $0x40] sm:$0xff]  }
   0x6   :  { %953 = vmatpush1.bf16.msra.mxu1 %v1841_v3  ;;  %v1852_v14 = vld [vmem:[%s2719_s1 + $0xb0] sm:$0xff]   ;;  %v1854_v16 = vld [vmem:[%s2719_s1 + $0xb8] sm:$0xff]   ;;  %v1856_v18 = vld [vmem:[%s2719_s1 + $0xc0] sm:$0xff]  }
   0x7   :  { %1210 = vmatpush1.bf16.msra.mxu0 %v1842_v4  ;;  %954 = vmatprep.subr.bf16.mxu1 %v2039_v0  ;;  %v1873_v19 = vld [vmem:[%s2720_s0 + $0x4] ss:$16 sps:$4 sm:$0xff]   ;;  %v1857_v20 = vld [vmem:[%s2719_s1 + $0x48] sm:$0xff]   ;;  %v1861_v25 = vld [vmem:[%s2719_s1 + $0x58] sm:$0xff]  }
   0x8   :  { %1211 = vmatprep.subr.bf16.mxu0 %v2039_v0  ;;  %v1876_v21 = vld [vmem:[%s2720_s0 + $0xc] ss:$16 sps:$4 sm:$0xff]   ;;  %982 = vmatprep.mubr.bf16.mxu1 %v1873_v19  ;;  %v1859_v23 = vld [vmem:[%s2719_s1 + $0x50] sm:$0xff]   ;;  %v1863_v27 = vld [vmem:[%s2719_s1 + $0x60] sm:$0xff]  }
   0x9   :  { %v1858_v22 = vld [vmem:[%s2719_s1 + $0xc8] sm:$0xff]   ;;  %1239 = vmatprep.mubr.bf16.mxu0 %v1876_v21  ;;  %v1860_v24 = vld [vmem:[%s2719_s1 + $0xd0] sm:$0xff]   ;;  %v1862_v26 = vld [vmem:[%s2719_s1 + $0xd8] sm:$0xff]  }
   0xa   :  { %955 = vmatpush1.bf16.msra.mxu1 %v1843_v5  ;;  %v1864_v28 = vld [vmem:[%s2719_s1 + $0xe0] sm:$0xff]   ;;  %v1865_v29 = vld [vmem:[%s2719_s1 + $0x68] sm:$0xff]   ;;  %v1867_v31 = vld [vmem:[%s2719_s1 + $0x70] sm:$0xff]  }
   0xb   :  { %1212 = vmatpush1.bf16.msra.mxu0 %v1844_v6  ;;  %956 = vmatprep.subr.bf16.mxu1 %v2039_v0  ;;  %v1866_v30 = vld [vmem:[%s2719_s1 + $0xe8] sm:$0xff]   ;;  %v1868_v32 = vld [vmem:[%s2719_s1 + $0xf0] sm:$0xff]   ;;  %v1869_v33 = vld [vmem:[%s2719_s1 + $0x78] sm:$0xff]  }
   0xc   :  { %1213 = vmatprep.subr.bf16.mxu0 %v2039_v0  ;;  %v1870_v34 = vld [vmem:[%s2719_s1 + $0xf8] sm:$0xff]   ;;  %v1871_v35 = vld [vmem:[%s2720_s0] ss:$16 sps:$4 sm:$0xff]   ;;  %v1877_v37 = vld [vmem:[%s2720_s0 + $0x24] ss:$16 sps:$4 sm:$0xff]  }
   0xd   :  { %v1874_v36 = vld [vmem:[%s2720_s0 + $0x8] ss:$16 sps:$4 sm:$0xff]   ;;  %v1879_v38 = vld [vmem:[%s2720_s0 + $0x2c] ss:$16 sps:$4 sm:$0xff]   ;;  %v1881_v39 = vld [vmem:[%s2720_s0 + $0x20] ss:$16 sps:$4 sm:$0xff]  }
   0xe   :  { %957 = vmatpush1.bf16.msra.mxu1 %v1845_v7  ;;  %v1882_v40 = vld [vmem:[%s2720_s0 + $0x28] ss:$16 sps:$4 sm:$0xff]   ;;  %v1883_v41 = vld [vmem:[%s2720_s0 + $0x44] ss:$16 sps:$4 sm:$0xff]   ;;  %v1885_v42 = vld [vmem:[%s2720_s0 + $0x4c] ss:$16 sps:$4 sm:$0xff]  }
   0xf   :  { %1214 = vmatpush1.bf16.msra.mxu0 %v1846_v8  ;;  %958 = vmatprep.subr.bf16.mxu1 %v2039_v0  ;;  %v1887_v43 = vld [vmem:[%s2720_s0 + $0x40] ss:$16 sps:$4 sm:$0xff]   ;;  %v1888_v44 = vld [vmem:[%s2720_s0 + $0x48] ss:$16 sps:$4 sm:$0xff]   ;;  %v1889_v45 = vld [vmem:[%s2720_s0 + $0x64] ss:$16 sps:$4 sm:$0xff]  }
  0x10   :  { %1215 = vmatprep.subr.bf16.mxu0 %v2039_v0  ;;  %v1891_v46 = vld [vmem:[%s2720_s0 + $0x6c] ss:$16 sps:$4 sm:$0xff]   ;;  %v1893_v47 = vld [vmem:[%s2720_s0 + $0x60] ss:$16 sps:$4 sm:$0xff]   ;;  %v1894_v48 = vld [vmem:[%s2720_s0 + $0x68] ss:$16 sps:$4 sm:$0xff]  }
  0x11   :  { %v1895_v49 = vld [vmem:[%s2720_s0 + $0x84] ss:$16 sps:$4 sm:$0xff]   ;;  %v1897_v50 = vld [vmem:[%s2720_s0 + $0x8c] ss:$16 sps:$4 sm:$0xff]   ;;  %v1899_v51 = vld [vmem:[%s2720_s0 + $0x80] ss:$16 sps:$4 sm:$0xff]  }
  0x12   :  { %959 = vmatpush1.bf16.msra.mxu1 %v1847_v9  ;;  %v1900_v52 = vld [vmem:[%s2720_s0 + $0x88] ss:$16 sps:$4 sm:$0xff]   ;;  %v1901_v53 = vld [vmem:[%s2720_s0 + $0xa4] ss:$16 sps:$4 sm:$0xff]   ;;  %v1903_v54 = vld [vmem:[%s2720_s0 + $0xac] ss:$16 sps:$4 sm:$0xff]  }
  0x13   :  { %1216 = vmatpush1.bf16.msra.mxu0 %v1848_v10  ;;  %960 = vmatprep.subr.bf16.mxu1 %v2039_v0  ;;  %v1905_v55 = vld [vmem:[%s2720_s0 + $0xa0] ss:$16 sps:$4 sm:$0xff]   ;;  %v1906_v56 = vld [vmem:[%s2720_s0 + $0xa8] ss:$16 sps:$4 sm:$0xff]   ;;  %v1907_v57 = vld [vmem:[%s2720_s0 + $0xc4] ss:$16 sps:$4 sm:$0xff]  }
  0x14   :  { %1217 = vmatprep.subr.bf16.mxu0 %v2039_v0  ;;  %v1909_v58 = vld [vmem:[%s2720_s0 + $0xcc] ss:$16 sps:$4 sm:$0xff]   ;;  %v1911_v59 = vld [vmem:[%s2720_s0 + $0xc0] ss:$16 sps:$4 sm:$0xff]   ;;  %v1912_v60 = vld [vmem:[%s2720_s0 + $0xc8] ss:$16 sps:$4 sm:$0xff]  }
  0x15   :  { %v1913_v61 = vld [vmem:[%s2720_s0 + $0xe4] ss:$16 sps:$4 sm:$0xff]   ;;  %v1915_v62 = vld [vmem:[%s2720_s0 + $0xec] ss:$16 sps:$4 sm:$0xff]   ;;  %v1917_v63 = vld [vmem:[%s2720_s0 + $0xe0] ss:$16 sps:$4 sm:$0xff]  }
  0x16   :  { %961 = vmatpush1.bf16.msra.mxu1 %v1849_v11  ;;  %v1919_v1 = vld [vmem:[%s2720_s0 + $0x104] ss:$16 sps:$4 sm:$0xff]   ;;  %v1921_v2 = vld [vmem:[%s2720_s0 + $0x10c] ss:$16 sps:$4 sm:$0xff]   ;;  %v1923_v3 = vld [vmem:[%s2720_s0 + $0x100] ss:$16 sps:$4 sm:$0xff]  }
  0x17   :  { %1218 = vmatpush1.bf16.msra.mxu0 %v1850_v12  ;;  %962 = vmatprep.subr.bf16.mxu1 %v2039_v0  ;;  %v1924_v4 = vld [vmem:[%s2720_s0 + $0x108] ss:$16 sps:$4 sm:$0xff]   ;;  %v1925_v5 = vld [vmem:[%s2720_s0 + $0x124] ss:$16 sps:$4 sm:$0xff]   ;;  %v1927_v6 = vld [vmem:[%s2720_s0 + $0x12c] ss:$16 sps:$4 sm:$0xff]  }
  0x18   :  { %1219 = vmatprep.subr.bf16.mxu0 %v2039_v0  ;;  %v1929_v7 = vld [vmem:[%s2720_s0 + $0x120] ss:$16 sps:$4 sm:$0xff]   ;;  %v1930_v8 = vld [vmem:[%s2720_s0 + $0x128] ss:$16 sps:$4 sm:$0xff]   ;;  %v1931_v9 = vld [vmem:[%s2720_s0 + $0x144] ss:$16 sps:$4 sm:$0xff]  }
  0x19   :  { %v1933_v10 = vld [vmem:[%s2720_s0 + $0x14c] ss:$16 sps:$4 sm:$0xff]   ;;  %v1935_v11 = vld [vmem:[%s2720_s0 + $0x140] ss:$16 sps:$4 sm:$0xff]   ;;  %v1936_v12 = vld [vmem:[%s2720_s0 + $0x148] ss:$16 sps:$4 sm:$0xff]  }
  0x1a   :  { %963 = vmatpush1.bf16.msra.mxu1 %v1851_v13  ;;  %v1937_v13 = vld [vmem:[%s2720_s0 + $0x164] ss:$16 sps:$4 sm:$0xff]   ;;  %v1947_v19 = vld [vmem:[%s2720_s0 + $0x180] ss:$16 sps:$4 sm:$0xff]  }
  0x1b   :  { %1220 = vmatpush1.bf16.msra.mxu0 %v1852_v14  ;;  %964 = vmatprep.subr.bf16.mxu1 %v2039_v0  ;;  %v1939_v14 = vld [vmem:[%s2720_s0 + $0x16c] ss:$16 sps:$4 sm:$0xff]   ;;  %v1949_v21 = vld [vmem:[%s2720_s0 + $0x1a4] ss:$16 sps:$4 sm:$0xff]  }
  0x1c   :  { %1221 = vmatprep.subr.bf16.mxu0 %v2039_v0 }
  0x1e   :  { %965 = vmatpush1.bf16.msra.mxu1 %v1853_v15  ;;  %v1941_v15 = vld [vmem:[%s2720_s0 + $0x160] ss:$16 sps:$4 sm:$0xff]  }
  0x1f   :  { %1222 = vmatpush1.bf16.msra.mxu0 %v1854_v16  ;;  %966 = vmatprep.subr.bf16.mxu1 %v2039_v0  ;;  %v1942_v16 = vld [vmem:[%s2720_s0 + $0x168] ss:$16 sps:$4 sm:$0xff]  }
  0x20   :  { %1223 = vmatprep.subr.bf16.mxu0 %v2039_v0 }
  0x22   :  { %967 = vmatpush1.bf16.msra.mxu1 %v1855_v17  ;;  %v1943_v17 = vld [vmem:[%s2720_s0 + $0x184] ss:$16 sps:$4 sm:$0xff]  }
  0x23   :  { %1224 = vmatpush1.bf16.msra.mxu0 %v1856_v18  ;;  %968 = vmatprep.subr.bf16.mxu1 %v2039_v0  ;;  %v1945_v18 = vld [vmem:[%s2720_s0 + $0x18c] ss:$16 sps:$4 sm:$0xff]  }
  0x24   :  { %1225 = vmatprep.subr.bf16.mxu0 %v2039_v0 }
  0x26   :  { %969 = vmatpush1.bf16.msra.mxu1 %v1857_v20  ;;  %v1948_v20 = vld [vmem:[%s2720_s0 + $0x188] ss:$16 sps:$4 sm:$0xff]  }
  0x27   :  { %1226 = vmatpush1.bf16.msra.mxu0 %v1858_v22  ;;  %970 = vmatprep.subr.bf16.mxu1 %v2039_v0  ;;  %v1951_v22 = vld [vmem:[%s2720_s0 + $0x1ac] ss:$16 sps:$4 sm:$0xff]  }
  0x28   :  { %1227 = vmatprep.subr.bf16.mxu0 %v2039_v0 }
  0x2a   :  { %971 = vmatpush1.bf16.msra.mxu1 %v1859_v23  ;;  %v1953_v23 = vld [vmem:[%s2720_s0 + $0x1a0] ss:$16 sps:$4 sm:$0xff]  }
  0x2b   :  { %1228 = vmatpush1.bf16.msra.mxu0 %v1860_v24  ;;  %972 = vmatprep.subr.bf16.mxu1 %v2039_v0  ;;  %v1954_v24 = vld [vmem:[%s2720_s0 + $0x1a8] ss:$16 sps:$4 sm:$0xff]  }
  0x2c   :  { %1229 = vmatprep.subr.bf16.mxu0 %v2039_v0 }
  0x2e   :  { %973 = vmatpush1.bf16.msra.mxu1 %v1861_v25  ;;  %v1955_v25 = vld [vmem:[%s2720_s0 + $0x1c4] ss:$16 sps:$4 sm:$0xff]  }
  0x2f   :  { %1230 = vmatpush1.bf16.msra.mxu0 %v1862_v26  ;;  %974 = vmatprep.subr.bf16.mxu1 %v2039_v0  ;;  %v1957_v26 = vld [vmem:[%s2720_s0 + $0x1cc] ss:$16 sps:$4 sm:$0xff]  }
  0x30   :  { %1231 = vmatprep.subr.bf16.mxu0 %v2039_v0 }
  0x32   :  { %975 = vmatpush1.bf16.msra.mxu1 %v1863_v27  ;;  %v1959_v27 = vld [vmem:[%s2720_s0 + $0x1c0] ss:$16 sps:$4 sm:$0xff]  }
  0x33   :  { %1232 = vmatpush1.bf16.msra.mxu0 %v1864_v28  ;;  %976 = vmatprep.subr.bf16.mxu1 %v2039_v0  ;;  %v1960_v28 = vld [vmem:[%s2720_s0 + $0x1c8] ss:$16 sps:$4 sm:$0xff]  }
  0x34   :  { %1233 = vmatprep.subr.bf16.mxu0 %v2039_v0 }
  0x36   :  { %977 = vmatpush1.bf16.msra.mxu1 %v1865_v29  ;;  %v1961_v29 = vld [vmem:[%s2720_s0 + $0x1e4] ss:$16 sps:$4 sm:$0xff]  }
  0x37   :  { %1234 = vmatpush1.bf16.msra.mxu0 %v1866_v30  ;;  %978 = vmatprep.subr.bf16.mxu1 %v2039_v0  ;;  %v1963_v30 = vld [vmem:[%s2720_s0 + $0x1ec] ss:$16 sps:$4 sm:$0xff]  }
  0x38   :  { %1235 = vmatprep.subr.bf16.mxu0 %v2039_v0 }
  0x3a   :  { %979 = vmatpush1.bf16.msra.mxu1 %v1867_v31  ;;  %v1965_v31 = vld [vmem:[%s2720_s0 + $0x1e0] ss:$16 sps:$4 sm:$0xff]  }
  0x3b   :  { %1236 = vmatpush1.bf16.msra.mxu0 %v1868_v32  ;;  %980 = vmatprep.subr.bf16.mxu1 %v2039_v0  ;;  %v1966_v32 = vld [vmem:[%s2720_s0 + $0x1e8] ss:$16 sps:$4 sm:$0xff]  }
  0x3c   :  { %1237 = vmatprep.subr.bf16.mxu0 %v2039_v0  ;;  %v1918_v0 = vld [vmem:[%s2720_s0 + $0xe8] ss:$16 sps:$4 sm:$0xff]  }
  0x3e   :  { %981 = vmatpush1.bf16.msra.mxu1 %v1869_v33  ;;  %v1967_v33 = vld [vmem:[%s2720_s0 + $0x204] ss:$16 sps:$4 sm:$0xff]  }
  0x3f   :  { %1238 = vmatpush1.bf16.msra.mxu0 %v1870_v34  ;;  %v1969_v34 = vld [vmem:[%s2720_s0 + $0x20c] ss:$16 sps:$4 sm:$0xff]  }
  0x41   :  { %983 = vmatmul.mubr.bf16.vlgmr.msra.gmra.mrb[0].mxu1 %v1871_v35  ;;  %v1971_v35 = vld [vmem:[%s2720_s0 + $0x200] ss:$16 sps:$4 sm:$0xff]  }
  0x42   :  { %1240 = vmatmul.mubr.bf16.vlgmr.msra.gmra.mrb[0].mxu0 %v1874_v36  ;;  %990 = vmatprep.mubr.bf16.mxu1 %v1877_v37  ;;  %v1972_v36 = vld [vmem:[%s2720_s0 + $0x208] ss:$16 sps:$4 sm:$0xff]   ;;  %v1973_v37 = vld [vmem:[%s2720_s0 + $0x224] ss:$16 sps:$4 sm:$0xff]  }
  0x43   :  { %1247 = vmatprep.mubr.bf16.mxu0 %v1879_v38  ;;  %v1975_v38 = vld [vmem:[%s2720_s0 + $0x22c] ss:$16 sps:$4 sm:$0xff]  }
  0x49   :  { %991 = vmatmul.mubr.bf16.gmra.mrb[4].mxu1 %v1881_v39  ;;  %v1977_v39 = vld [vmem:[%s2720_s0 + $0x220] ss:$16 sps:$4 sm:$0xff]  }
  0x4a   :  { %1248 = vmatmul.mubr.bf16.gmra.mrb[4].mxu0 %v1882_v40  ;;  %998 = vmatprep.mubr.bf16.mxu1 %v1883_v41  ;;  %v1978_v40 = vld [vmem:[%s2720_s0 + $0x228] ss:$16 sps:$4 sm:$0xff]   ;;  %v1979_v41 = vld [vmem:[%s2720_s0 + $0x244] ss:$16 sps:$4 sm:$0xff]  }
  0x4b   :  { %1255 = vmatprep.mubr.bf16.mxu0 %v1885_v42  ;;  %v1981_v42 = vld [vmem:[%s2720_s0 + $0x24c] ss:$16 sps:$4 sm:$0xff]  }
  0x51   :  { %999 = vmatmul.mubr.bf16.gmra.mrb[8].mxu1 %v1887_v43  ;;  %v1983_v43 = vld [vmem:[%s2720_s0 + $0x240] ss:$16 sps:$4 sm:$0xff]  }
  0x52   :  { %1256 = vmatmul.mubr.bf16.gmra.mrb[8].mxu0 %v1888_v44  ;;  %1006 = vmatprep.mubr.bf16.mxu1 %v1889_v45  ;;  %v1984_v44 = vld [vmem:[%s2720_s0 + $0x248] ss:$16 sps:$4 sm:$0xff]   ;;  %v1985_v45 = vld [vmem:[%s2720_s0 + $0x264] ss:$16 sps:$4 sm:$0xff]  }
  0x53   :  { %1263 = vmatprep.mubr.bf16.mxu0 %v1891_v46  ;;  %v1987_v46 = vld [vmem:[%s2720_s0 + $0x26c] ss:$16 sps:$4 sm:$0xff]  }
  0x59   :  { %1007 = vmatmul.mubr.bf16.gmra.mrb[12].mxu1 %v1893_v47  ;;  %v1989_v47 = vld [vmem:[%s2720_s0 + $0x260] ss:$16 sps:$4 sm:$0xff]  }
  0x5a   :  { %1264 = vmatmul.mubr.bf16.gmra.mrb[12].mxu0 %v1894_v48  ;;  %1014 = vmatprep.mubr.bf16.mxu1 %v1895_v49  ;;  %v1990_v48 = vld [vmem:[%s2720_s0 + $0x268] ss:$16 sps:$4 sm:$0xff]   ;;  %v1991_v49 = vld [vmem:[%s2720_s0 + $0x284] ss:$16 sps:$4 sm:$0xff]  }
  0x5b   :  { %1271 = vmatprep.mubr.bf16.mxu0 %v1897_v50  ;;  %v1993_v50 = vld [vmem:[%s2720_s0 + $0x28c] ss:$16 sps:$4 sm:$0xff]  }
  0x61   :  { %1015 = vmatmul.mubr.bf16.gmra.mrb[16].mxu1 %v1899_v51  ;;  %v1995_v51 = vld [vmem:[%s2720_s0 + $0x280] ss:$16 sps:$4 sm:$0xff]  }
  0x62   :  { %1272 = vmatmul.mubr.bf16.gmra.mrb[16].mxu0 %v1900_v52  ;;  %1022 = vmatprep.mubr.bf16.mxu1 %v1901_v53  ;;  %v1996_v52 = vld [vmem:[%s2720_s0 + $0x288] ss:$16 sps:$4 sm:$0xff]   ;;  %v1997_v53 = vld [vmem:[%s2720_s0 + $0x2a4] ss:$16 sps:$4 sm:$0xff]  }
  0x63   :  { %1279 = vmatprep.mubr.bf16.mxu0 %v1903_v54  ;;  %v1999_v54 = vld [vmem:[%s2720_s0 + $0x2ac] ss:$16 sps:$4 sm:$0xff]  }
  0x69   :  { %1023 = vmatmul.mubr.bf16.gmra.mrb[20].mxu1 %v1905_v55  ;;  %v2001_v55 = vld [vmem:[%s2720_s0 + $0x2a0] ss:$16 sps:$4 sm:$0xff]  }
  0x6a   :  { %1280 = vmatmul.mubr.bf16.gmra.mrb[20].mxu0 %v1906_v56  ;;  %1030 = vmatprep.mubr.bf16.mxu1 %v1907_v57  ;;  %v2002_v56 = vld [vmem:[%s2720_s0 + $0x2a8] ss:$16 sps:$4 sm:$0xff]   ;;  %v2003_v57 = vld [vmem:[%s2720_s0 + $0x2c4] ss:$16 sps:$4 sm:$0xff]  }
  0x6b   :  { %1287 = vmatprep.mubr.bf16.mxu0 %v1909_v58  ;;  %v2005_v58 = vld [vmem:[%s2720_s0 + $0x2cc] ss:$16 sps:$4 sm:$0xff]  }
  0x71   :  { %1031 = vmatmul.mubr.bf16.gmra.mrb[24].mxu1 %v1911_v59  ;;  %v2007_v59 = vld [vmem:[%s2720_s0 + $0x2c0] ss:$16 sps:$4 sm:$0xff]  }
  0x72   :  { %1288 = vmatmul.mubr.bf16.gmra.mrb[24].mxu0 %v1912_v60  ;;  %1038 = vmatprep.mubr.bf16.mxu1 %v1913_v61  ;;  %v2008_v60 = vld [vmem:[%s2720_s0 + $0x2c8] ss:$16 sps:$4 sm:$0xff]   ;;  %v2009_v61 = vld [vmem:[%s2720_s0 + $0x2e4] ss:$16 sps:$4 sm:$0xff]  }
  0x73   :  { %1295 = vmatprep.mubr.bf16.mxu0 %v1915_v62  ;;  %v2011_v62 = vld [vmem:[%s2720_s0 + $0x2ec] ss:$16 sps:$4 sm:$0xff]  }
  0x79   :  { %1039 = vmatmul.mubr.bf16.gmra.mrb[28].mxu1 %v1917_v63  ;;  %v2013_v63 = vld [vmem:[%s2720_s0 + $0x2e0] ss:$16 sps:$4 sm:$0xff]  }
  0x7a   :  { %1296 = vmatmul.mubr.bf16.gmra.mrb[28].mxu0 %v1918_v0  ;;  %1046 = vmatprep.mubr.bf16.mxu1 %v1919_v1  ;;  %v2014_v0 = vld [vmem:[%s2720_s0 + $0x2e8] ss:$16 sps:$4 sm:$0xff]   ;;  %v2015_v1 = vld [vmem:[%s2720_s0 + $0x304] ss:$16 sps:$4 sm:$0xff]  }
  0x7b   :  { %1303 = vmatprep.mubr.bf16.mxu0 %v1921_v2  ;;  %v2017_v2 = vld [vmem:[%s2720_s0 + $0x30c] ss:$16 sps:$4 sm:$0xff]  }
  0x81   :  { %1047 = vmatmul.mubr.bf16.gmra.mrb[32].mxu1 %v1923_v3  ;;  %v2019_v3 = vld [vmem:[%s2720_s0 + $0x300] ss:$16 sps:$4 sm:$0xff]  }
  0x82   :  { %1304 = vmatmul.mubr.bf16.gmra.mrb[32].mxu0 %v1924_v4  ;;  %1054 = vmatprep.mubr.bf16.mxu1 %v1925_v5  ;;  %v2020_v4 = vld [vmem:[%s2720_s0 + $0x308] ss:$16 sps:$4 sm:$0xff]   ;;  %v2021_v5 = vld [vmem:[%s2720_s0 + $0x324] ss:$16 sps:$4 sm:$0xff]  }
  0x83   :  { %1311 = vmatprep.mubr.bf16.mxu0 %v1927_v6  ;;  %v2023_v6 = vld [vmem:[%s2720_s0 + $0x32c] ss:$16 sps:$4 sm:$0xff]  }
  0x89   :  { %1055 = vmatmul.mubr.bf16.gmra.mrb[36].mxu1 %v1929_v7  ;;  %v2025_v7 = vld [vmem:[%s2720_s0 + $0x320] ss:$16 sps:$4 sm:$0xff]  }
  0x8a   :  { %1312 = vmatmul.mubr.bf16.gmra.mrb[36].mxu0 %v1930_v8  ;;  %1062 = vmatprep.mubr.bf16.mxu1 %v1931_v9  ;;  %v2026_v8 = vld [vmem:[%s2720_s0 + $0x328] ss:$16 sps:$4 sm:$0xff]   ;;  %v2027_v9 = vld [vmem:[%s2720_s0 + $0x344] ss:$16 sps:$4 sm:$0xff]  }
  0x8b   :  { %1319 = vmatprep.mubr.bf16.mxu0 %v1933_v10  ;;  %v2029_v10 = vld [vmem:[%s2720_s0 + $0x34c] ss:$16 sps:$4 sm:$0xff]  }
  0x91   :  { %1063 = vmatmul.mubr.bf16.gmra.mrb[40].mxu1 %v1935_v11  ;;  %v2031_v11 = vld [vmem:[%s2720_s0 + $0x340] ss:$16 sps:$4 sm:$0xff]  }
  0x92   :  { %1320 = vmatmul.mubr.bf16.gmra.mrb[40].mxu0 %v1936_v12  ;;  %1070 = vmatprep.mubr.bf16.mxu1 %v1937_v13  ;;  %v2032_v12 = vld [vmem:[%s2720_s0 + $0x348] ss:$16 sps:$4 sm:$0xff]   ;;  %v2033_v13 = vld [vmem:[%s2720_s0 + $0x364] ss:$16 sps:$4 sm:$0xff]  }
  0x93   :  { %1327 = vmatprep.mubr.bf16.mxu0 %v1939_v14  ;;  %v2035_v14 = vld [vmem:[%s2720_s0 + $0x36c] ss:$16 sps:$4 sm:$0xff]  }
  0x99   :  { %1071 = vmatmul.mubr.bf16.gmra.mrb[44].mxu1 %v1941_v15  ;;  %v2521_v15 = vld [vmem:[%s2721_s2] ss:$0 sm:$0xff] }
  0x9a   :  { %1328 = vmatmul.mubr.bf16.gmra.mrb[44].mxu0 %v1942_v16  ;;  %1078 = vmatprep.mubr.bf16.mxu1 %v1943_v17 }
  0x9b   :  { %1335 = vmatprep.mubr.bf16.mxu0 %v1945_v18 }
  0xa1   :  { %1079 = vmatmul.mubr.bf16.gmra.mrb[48].mxu1 %v1947_v19 }
  0xa2   :  { %1336 = vmatmul.mubr.bf16.gmra.mrb[48].mxu0 %v1948_v20  ;;  %1086 = vmatprep.mubr.bf16.mxu1 %v1949_v21  ;;  %v2037_v20 = vld [vmem:[%s2720_s0 + $0x360] ss:$16 sps:$4 sm:$0xff]  }
  0xa3   :  { %1343 = vmatprep.mubr.bf16.mxu0 %v1951_v22 }
  0xa9   :  { %1087 = vmatmul.mubr.bf16.gmra.mrb[52].mxu1 %v1953_v23  ;;  %v2038_v23 = vld [vmem:[%s2720_s0 + $0x368] ss:$16 sps:$4 sm:$0xff]  }
  0xaa   :  { %1344 = vmatmul.mubr.bf16.gmra.mrb[52].mxu0 %v1954_v24  ;;  %1094 = vmatprep.mubr.bf16.mxu1 %v1955_v25 }
  0xab   :  { %1351 = vmatprep.mubr.bf16.mxu0 %v1957_v26 }
  0xb1   :  { %1095 = vmatmul.mubr.bf16.gmra.mrb[56].mxu1 %v1959_v27 }
  0xb2   :  { %1352 = vmatmul.mubr.bf16.gmra.mrb[56].mxu0 %v1960_v28  ;;  %1102 = vmatprep.mubr.bf16.mxu1 %v1961_v29 }
  0xb3   :  { %1359 = vmatprep.mubr.bf16.mxu0 %v1963_v30 }
  0xb9   :  { %1103 = vmatmul.mubr.bf16.gmra.mrb[60].mxu1 %v1965_v31 }
  0xba   :  { %1360 = vmatmul.mubr.bf16.gmra.mrb[60].mxu0 %v1966_v32  ;;  %1110 = vmatprep.mubr.bf16.mxu1 %v1967_v33 }
  0xbb   :  { %1367 = vmatprep.mubr.bf16.mxu0 %v1969_v34 }
  0xc1   :  { %1111 = vmatmul.mubr.bf16.gmra.mrb[64].mxu1 %v1971_v35 }
  0xc2   :  { %1368 = vmatmul.mubr.bf16.gmra.mrb[64].mxu0 %v1972_v36  ;;  %1118 = vmatprep.mubr.bf16.mxu1 %v1973_v37 }
  0xc3   :  { %1375 = vmatprep.mubr.bf16.mxu0 %v1975_v38 }
  0xc9   :  { %1119 = vmatmul.mubr.bf16.gmra.mrb[68].mxu1 %v1977_v39 }
  0xca   :  { %1376 = vmatmul.mubr.bf16.gmra.mrb[68].mxu0 %v1978_v40  ;;  %1126 = vmatprep.mubr.bf16.mxu1 %v1979_v41 }
  0xcb   :  { %1383 = vmatprep.mubr.bf16.mxu0 %v1981_v42 }
  0xd1   :  { %1127 = vmatmul.mubr.bf16.gmra.mrb[72].mxu1 %v1983_v43 }
  0xd2   :  { %1384 = vmatmul.mubr.bf16.gmra.mrb[72].mxu0 %v1984_v44  ;;  %1134 = vmatprep.mubr.bf16.mxu1 %v1985_v45 }
  0xd3   :  { %1391 = vmatprep.mubr.bf16.mxu0 %v1987_v46 }
  0xd9   :  { %1135 = vmatmul.mubr.bf16.gmra.mrb[76].mxu1 %v1989_v47 }
  0xda   :  { %1392 = vmatmul.mubr.bf16.gmra.mrb[76].mxu0 %v1990_v48  ;;  %1142 = vmatprep.mubr.bf16.mxu1 %v1991_v49 }
  0xdb   :  { %1399 = vmatprep.mubr.bf16.mxu0 %v1993_v50 }
  0xe1   :  { %1143 = vmatmul.mubr.bf16.gmra.mrb[80].mxu1 %v1995_v51 }
  0xe2   :  { %1400 = vmatmul.mubr.bf16.gmra.mrb[80].mxu0 %v1996_v52  ;;  %1150 = vmatprep.mubr.bf16.mxu1 %v1997_v53 }
  0xe3   :  { %1407 = vmatprep.mubr.bf16.mxu0 %v1999_v54 }
  0xe9   :  { %1151 = vmatmul.mubr.bf16.gmra.mrb[84].mxu1 %v2001_v55 }
  0xea   :  { %1408 = vmatmul.mubr.bf16.gmra.mrb[84].mxu0 %v2002_v56  ;;  %1158 = vmatprep.mubr.bf16.mxu1 %v2003_v57 }
  0xeb   :  { %1415 = vmatprep.mubr.bf16.mxu0 %v2005_v58 }
  0xf1   :  { %1159 = vmatmul.mubr.bf16.gmra.mrb[88].mxu1 %v2007_v59 }
  0xf2   :  { %1416 = vmatmul.mubr.bf16.gmra.mrb[88].mxu0 %v2008_v60  ;;  %1166 = vmatprep.mubr.bf16.mxu1 %v2009_v61 }
  0xf3   :  { %1423 = vmatprep.mubr.bf16.mxu0 %v2011_v62 }
  0xf9   :  { %1167 = vmatmul.mubr.bf16.gmra.mrb[92].mxu1 %v2013_v63 }
  0xfa   :  { %1424 = vmatmul.mubr.bf16.gmra.mrb[92].mxu0 %v2014_v0  ;;  %1174 = vmatprep.mubr.bf16.mxu1 %v2015_v1 }
  0xfb   :  { %1431 = vmatprep.mubr.bf16.mxu0 %v2017_v2 }
 0x101   :  { %1175 = vmatmul.mubr.bf16.gmra.mrb[96].mxu1 %v2019_v3 }
 0x102   :  { %1432 = vmatmul.mubr.bf16.gmra.mrb[96].mxu0 %v2020_v4  ;;  %1182 = vmatprep.mubr.bf16.mxu1 %v2021_v5 }
 0x103   :  { %1439 = vmatprep.mubr.bf16.mxu0 %v2023_v6 }
 0x109   :  { %1183 = vmatmul.mubr.bf16.gmra.mrb[100].mxu1 %v2025_v7 }
 0x10a   :  { %1440 = vmatmul.mubr.bf16.gmra.mrb[100].mxu0 %v2026_v8  ;;  %1190 = vmatprep.mubr.bf16.mxu1 %v2027_v9 }
 0x10b   :  { %1447 = vmatprep.mubr.bf16.mxu0 %v2029_v10 }
 0x111   :  { %1191 = vmatmul.mubr.bf16.gmra.mrb[104].mxu1 %v2031_v11 }
 0x112   :  { %1448 = vmatmul.mubr.bf16.gmra.mrb[104].mxu0 %v2032_v12  ;;  %1198 = vmatprep.mubr.bf16.mxu1 %v2033_v13 }
 0x113   :  { %1455 = vmatprep.mubr.bf16.mxu0 %v2035_v14 }
 0x114   :  { %v984_v16 = vpop.f32.mrb[0].mxu1 }
 0x115   :  { %v985_v17 = vadd.f32 %v2521_v15, %v984_v16  ;;  %v1241_v18 = vpop.f32.mrb[0].mxu0  ;;  %v986_v19 = vpop.f32.mrb[1].mxu1 }
 0x116   :  { %v1243_v21 = vpop.f32.mrb[1].mxu0  ;;  %v987_v22 = vpop.f32.mrb[2].mxu1 }
 0x117   :  { %v1242_v24 = vadd.f32 %v1241_v18, %v985_v17  ;;  %v988_v25 = vadd.f32 %v2521_v15, %v987_v22  ;;  %v1244_v26 = vpop.f32.mrb[2].mxu0  ;;  %v989_v27 = vpop.f32.mrb[3].mxu1 }
 0x118   :  { %v1246_v28 = vpop.f32.mrb[3].mxu0 }
 0x119   :  { %v1245_v29 = vadd.f32 %v1244_v26, %v988_v25  ;;  %1199 = vmatmul.mubr.bf16.gmra.mrb[108].mxu1 %v2037_v20  ;;  %v1464_v2 = vmax.f32 %v1242_v24, 0.0 }
 0x11a   :  { %1456 = vmatmul.mubr.bf16.gmra.mrb[108].mxu0 %v2038_v23 }
 0x11b   :  { %v1465_v17 = vmax.f32 %v1245_v29, 0.0 }
 0x11c   :  { %v992_v30 = vpop.f32.mrb[4].mxu1 }
 0x11d   :  { %v993_v31 = vadd.f32 %v2521_v15, %v992_v30  ;;  %v1249_v32 = vpop.f32.mrb[4].mxu0  ;;  %v994_v33 = vpop.f32.mrb[5].mxu1 }
 0x11e   :  { %v1251_v34 = vpop.f32.mrb[5].mxu0  ;;  %v995_v35 = vpop.f32.mrb[6].mxu1 }
 0x11f   :  { %v1250_v36 = vadd.f32 %v1249_v32, %v993_v31  ;;  %v996_v37 = vadd.f32 %v2521_v15, %v995_v35  ;;  %v1252_v38 = vpop.f32.mrb[6].mxu0  ;;  %v997_v39 = vpop.f32.mrb[7].mxu1 }
 0x120   :  { %v1254_v40 = vpop.f32.mrb[7].mxu0 }
 0x121   :  { %v1253_v41 = vadd.f32 %v1252_v38, %v996_v37  ;;  %v1466_v20 = vmax.f32 %v1250_v36, 0.0 }
 0x123   :  { %v1467_v35 = vmax.f32 %v1253_v41, 0.0 }
 0x124   :  { %v1000_v42 = vpop.f32.mrb[8].mxu1 }
 0x125   :  { %v1001_v43 = vadd.f32 %v2521_v15, %v1000_v42  ;;  %v1257_v44 = vpop.f32.mrb[8].mxu0  ;;  %v1002_v45 = vpop.f32.mrb[9].mxu1 }
 0x126   :  { %v1259_v46 = vpop.f32.mrb[9].mxu0  ;;  %v1003_v47 = vpop.f32.mrb[10].mxu1 }
 0x127   :  { %v1258_v48 = vadd.f32 %v1257_v44, %v1001_v43  ;;  %v1004_v49 = vadd.f32 %v2521_v15, %v1003_v47  ;;  %v1260_v50 = vpop.f32.mrb[10].mxu0  ;;  %v1005_v51 = vpop.f32.mrb[11].mxu1 }
 0x128   :  { %v1262_v52 = vpop.f32.mrb[11].mxu0 }
 0x129   :  { %v2535_v53 = vadd.f32 %v1260_v50, %v1004_v49  ;;  %v1468_v38 = vmax.f32 %v1258_v48, 0.0 }
 0x12b   :  { %v1469_v48 = vmax.f32 %v2535_v53, 0.0 }
 0x12c   :  { %v1008_v54 = vpop.f32.mrb[12].mxu1 }
 0x12d   :  { %v1009_v55 = vadd.f32 %v2521_v15, %v1008_v54  ;;  %v1265_v56 = vpop.f32.mrb[12].mxu0  ;;  %v1010_v57 = vpop.f32.mrb[13].mxu1 }
 0x12e   :  { %v1267_v58 = vpop.f32.mrb[13].mxu0  ;;  %v1011_v59 = vpop.f32.mrb[14].mxu1 }
 0x12f   :  { %v2538_v60 = vadd.f32 %v1265_v56, %v1009_v55  ;;  %v1012_v61 = vadd.f32 %v2521_v15, %v1011_v59  ;;  %v1268_v62 = vpop.f32.mrb[14].mxu0  ;;  %v1013_v63 = vpop.f32.mrb[15].mxu1 }
 0x130   :  { %v1270_v0 = vpop.f32.mrb[15].mxu0 }
 0x131   :  { %v1269_v1 = vadd.f32 %v1268_v62, %v1012_v61  ;;  %v1470_v57 = vmax.f32 %v2538_v60, 0.0 }
 0x133   :  { %v1471_v3 = vmax.f32 %v1269_v1, 0.0 }
 0x134   :  { %v1016_v4 = vpop.f32.mrb[16].mxu1 }
 0x135   :  { %v2541_v5 = vmax.f32 %v1464_v2, %v1471_v3  ;;  %v1017_v6 = vadd.f32 %v2521_v15, %v1016_v4  ;;  %v1273_v7 = vpop.f32.mrb[16].mxu0  ;;  %v1018_v8 = vpop.f32.mrb[17].mxu1 }
 0x136   :  { %v1275_v9 = vpop.f32.mrb[17].mxu0  ;;  %v1019_v10 = vpop.f32.mrb[18].mxu1 }
 0x137   :  { %v1274_v11 = vadd.f32 %v1273_v7, %v1017_v6  ;;  %v1020_v12 = vadd.f32 %v2521_v15, %v1019_v10  ;;  %v1276_v13 = vpop.f32.mrb[18].mxu0  ;;  %v1021_v14 = vpop.f32.mrb[19].mxu1 }
 0x138   :  { %v1278_v16 = vpop.f32.mrb[19].mxu0 }
 0x139   :  { %v1472_v18 = vmax.f32 %v1274_v11, 0.0  ;;  %v1277_v19 = vadd.f32 %v1276_v13, %v1020_v12 }
 0x13b   :  { %v2545_v21 = vmax.f32 %v1465_v17, %v1472_v18  ;;  %v1473_v22 = vmax.f32 %v1277_v19, 0.0 }
 0x13c   :  { %v1024_v23 = vpop.f32.mrb[20].mxu1 }
 0x13d   :  { %v2547_v24 = vmax.f32 %v1466_v20, %v1473_v22  ;;  %v1025_v25 = vadd.f32 %v2521_v15, %v1024_v23  ;;  %v1281_v26 = vpop.f32.mrb[20].mxu0  ;;  %v1026_v27 = vpop.f32.mrb[21].mxu1 }
 0x13e   :  { %v1283_v28 = vpop.f32.mrb[21].mxu0  ;;  %v1027_v30 = vpop.f32.mrb[22].mxu1 }
 0x13f   :  { %v1282_v31 = vadd.f32 %v1281_v26, %v1025_v25  ;;  %v1028_v32 = vadd.f32 %v2521_v15, %v1027_v30  ;;  %v1284_v33 = vpop.f32.mrb[22].mxu0  ;;  %v1029_v29 = vpop.f32.mrb[23].mxu1 }
 0x140   :  { %v1286_v34 = vpop.f32.mrb[23].mxu0 }
 0x141   :  { %v1474_v36 = vmax.f32 %v1282_v31, 0.0  ;;  %v1285_v37 = vadd.f32 %v1284_v33, %v1028_v32 }
 0x143   :  { %v2551_v39 = vmax.f32 %v1467_v35, %v1474_v36  ;;  %v1475_v40 = vmax.f32 %v1285_v37, 0.0 }
 0x144   :  { %v1032_v42 = vpop.f32.mrb[24].mxu1 }
 0x145   :  { %v2553_v43 = vmax.f32 %v1468_v38, %v1475_v40  ;;  %v1033_v44 = vadd.f32 %v2521_v15, %v1032_v42  ;;  %v1289_v45 = vpop.f32.mrb[24].mxu0  ;;  %v1034_v46 = vpop.f32.mrb[25].mxu1 }
 0x146   :  { %v1291_v47 = vpop.f32.mrb[25].mxu0  ;;  %v1035_v49 = vpop.f32.mrb[26].mxu1 }
 0x147   :  { %v1290_v50 = vadd.f32 %v1289_v45, %v1033_v44  ;;  %v1036_v51 = vadd.f32 %v2521_v15, %v1035_v49  ;;  %v1292_v52 = vpop.f32.mrb[26].mxu0  ;;  %v1037_v41 = vpop.f32.mrb[27].mxu1 }
 0x148   :  { %v1294_v54 = vpop.f32.mrb[27].mxu0 }
 0x149   :  { %v1476_v55 = vmax.f32 %v1290_v50, 0.0  ;;  %v1293_v56 = vadd.f32 %v1292_v52, %v1036_v51 }
 0x14b   :  { %v2559_v58 = vmax.f32 %v1469_v48, %v1476_v55  ;;  %v1477_v59 = vmax.f32 %v1293_v56, 0.0 }
 0x14c   :  { %v1040_v61 = vpop.f32.mrb[28].mxu1 }
 0x14d   :  { %v2561_v62 = vmax.f32 %v1470_v57, %v1477_v59  ;;  %v1041_v63 = vadd.f32 %v2521_v15, %v1040_v61  ;;  %v1297_v0 = vpop.f32.mrb[28].mxu0  ;;  %v1042_v1 = vpop.f32.mrb[29].mxu1 }
 0x14e   :  { %v1299_v2 = vpop.f32.mrb[29].mxu0  ;;  %v1043_v3 = vpop.f32.mrb[30].mxu1 }
 0x14f   :  { %v1298_v4 = vadd.f32 %v1297_v0, %v1041_v63  ;;  %v1044_v6 = vadd.f32 %v2521_v15, %v1043_v3  ;;  %v1300_v53 = vpop.f32.mrb[30].mxu0  ;;  %v1045_v7 = vpop.f32.mrb[31].mxu1 }
 0x150   :  { %v1302_v8 = vpop.f32.mrb[31].mxu0 }
 0x151   :  { %v1301_v9 = vadd.f32 %v1300_v53, %v1044_v6  ;;  %v1478_v52 = vmax.f32 %v1298_v4, 0.0 }
 0x153   :  { %v1479_v53 = vmax.f32 %v1301_v9, 0.0 }
 0x154   :  { %v1048_v60 = vpop.f32.mrb[32].mxu1 }
 0x155   :  { %v1049_v10 = vadd.f32 %v2521_v15, %v1048_v60  ;;  %v1305_v11 = vpop.f32.mrb[32].mxu0  ;;  %v1050_v12 = vpop.f32.mrb[33].mxu1 }
 0x156   :  { %v1307_v13 = vpop.f32.mrb[33].mxu0  ;;  %v1051_v14 = vpop.f32.mrb[34].mxu1 }
 0x157   :  { %v1306_v16 = vadd.f32 %v1305_v11, %v1049_v10  ;;  %v1052_v17 = vadd.f32 %v2521_v15, %v1051_v14  ;;  %v1308_v18 = vpop.f32.mrb[34].mxu0  ;;  %v1053_v19 = vpop.f32.mrb[35].mxu1 }
 0x158   :  { %v1310_v20 = vpop.f32.mrb[35].mxu0 }
 0x159   :  { %v2567_v22 = vadd.f32 %v1308_v18, %v1052_v17  ;;  %v1480_v8 = vmax.f32 %v1306_v16, 0.0 }
 0x15c   :  { %v1056_v23 = vpop.f32.mrb[36].mxu1 }
 0x15d   :  { %v1057_v25 = vadd.f32 %v2521_v15, %v1056_v23  ;;  %v1313_v26 = vpop.f32.mrb[36].mxu0  ;;  %v1058_v27 = vpop.f32.mrb[37].mxu1 }
 0x15e   :  { %v1315_v28 = vpop.f32.mrb[37].mxu0  ;;  %v1059_v30 = vpop.f32.mrb[38].mxu1 }
 0x15f   :  { %v2570_v31 = vadd.f32 %v1313_v26, %v1057_v25  ;;  %v1060_v32 = vadd.f32 %v2521_v15, %v1059_v30  ;;  %v1316_v33 = vpop.f32.mrb[38].mxu0  ;;  %v1061_v29 = vpop.f32.mrb[39].mxu1  ;;  %v1481_v26 = vmax.f32 %v2567_v22, 0.0 }
 0x160   :  { %v1318_v34 = vpop.f32.mrb[39].mxu0 }
 0x161   :  { %v2573_v35 = vadd.f32 %v1316_v33, %v1060_v32  ;;  %v1482_v30 = vmax.f32 %v2570_v31, 0.0 }
 0x164   :  { %v1064_v36 = vpop.f32.mrb[40].mxu1 }
 0x165   :  { %v1065_v37 = vadd.f32 %v2521_v15, %v1064_v36  ;;  %v1321_v38 = vpop.f32.mrb[40].mxu0  ;;  %v1066_v40 = vpop.f32.mrb[41].mxu1 }
 0x166   :  { %v1323_v42 = vpop.f32.mrb[41].mxu0  ;;  %v1067_v44 = vpop.f32.mrb[42].mxu1 }
 0x167   :  { %v2576_v45 = vadd.f32 %v1321_v38, %v1065_v37  ;;  %v1068_v46 = vadd.f32 %v2521_v15, %v1067_v44  ;;  %v1324_v47 = vpop.f32.mrb[42].mxu0  ;;  %v1069_v49 = vpop.f32.mrb[43].mxu1 }
 0x168   :  { %v1326_v50 = vpop.f32.mrb[43].mxu0  ;;  %v1483_v49 = vmax.f32 %v2573_v35, 0.0 }
 0x169   :  { %v1325_v51 = vadd.f32 %v1324_v47, %v1068_v46 }
 0x16b   :  { %v1485_v41 = vmax.f32 %v1325_v51, 0.0 }
 0x16c   :  { %v1072_v54 = vpop.f32.mrb[44].mxu1 }
 0x16d   :  { %v1534_v48 = vmax.f32 %v1478_v52, %v1485_v41  ;;  %v1073_v55 = vadd.f32 %v2521_v15, %v1072_v54  ;;  %v1329_v56 = vpop.f32.mrb[44].mxu0  ;;  %v1074_v57 = vpop.f32.mrb[45].mxu1  ;;  %v1484_v52 = vmax.f32 %v2576_v45, 0.0 }
 0x16e   :  { %v1331_v59 = vpop.f32.mrb[45].mxu0  ;;  %v1075_v61 = vpop.f32.mrb[46].mxu1 }
 0x16f   :  { %v1548_v63 = vmax.f32 %v2541_v5, %v1534_v48  ;;  %v1330_v0 = vadd.f32 %v1329_v56, %v1073_v55  ;;  %v1076_v1 = vadd.f32 %v2521_v15, %v1075_v61  ;;  %v1332_v2 = vpop.f32.mrb[46].mxu0  ;;  %v1077_v3 = vpop.f32.mrb[47].mxu1 }
 0x170   :  { %v1334_v6 = vpop.f32.mrb[47].mxu0 }
 0x171   :  { %1563 = vst.msk [vmem:[%s2722_s3] sm:$0xff] %vm1562_vm0, %v1548_v63  ;;  %v1486_v4 = vmax.f32 %v1330_v0, 0.0  ;;  %v1333_v7 = vadd.f32 %v1332_v2, %v1076_v1 }
 0x173   :  { %v1535_v60 = vmax.f32 %v1479_v53, %v1486_v4  ;;  %v1487_v10 = vmax.f32 %v1333_v7, 0.0 }
 0x174   :  { %v1080_v11 = vpop.f32.mrb[48].mxu1 }
 0x175   :  { %v1549_v5 = vmax.f32 %v2545_v21, %v1535_v60  ;;  %v1536_v12 = vmax.f32 %v1480_v8, %v1487_v10  ;;  %v1081_v13 = vadd.f32 %v2521_v15, %v1080_v11  ;;  %v1337_v14 = vpop.f32.mrb[48].mxu0  ;;  %v1082_v17 = vpop.f32.mrb[49].mxu1 }
 0x176   :  { %v1339_v18 = vpop.f32.mrb[49].mxu0  ;;  %v1083_v9 = vpop.f32.mrb[50].mxu1 }
 0x177   :  { %1564 = vst.msk [vmem:[%s2722_s3 + $0x8] sm:$0xff] %vm1562_vm0, %v1549_v5  ;;  %v1550_v19 = vmax.f32 %v2547_v24, %v1536_v12  ;;  %v1338_v16 = vadd.f32 %v1337_v14, %v1081_v13  ;;  %v1084_v20 = vadd.f32 %v2521_v15, %v1083_v9  ;;  %v1340_v23 = vpop.f32.mrb[50].mxu0  ;;  %v1085_v25 = vpop.f32.mrb[51].mxu1 }
 0x178   :  { %v1342_v21 = vpop.f32.mrb[51].mxu0 }
 0x179   :  { %1565 = vst.msk [vmem:[%s2722_s3 + $0x10] sm:$0xff] %vm1562_vm0, %v1550_v19  ;;  %v1488_v27 = vmax.f32 %v1338_v16, 0.0  ;;  %v1341_v28 = vadd.f32 %v1340_v23, %v1084_v20 }
 0x17b   :  { %v1537_v32 = vmax.f32 %v1481_v26, %v1488_v27  ;;  %v1489_v33 = vmax.f32 %v1341_v28, 0.0 }
 0x17c   :  { %v1088_v24 = vpop.f32.mrb[52].mxu1 }
 0x17d   :  { %v1551_v29 = vmax.f32 %v2551_v39, %v1537_v32  ;;  %v1538_v34 = vmax.f32 %v1482_v30, %v1489_v33  ;;  %v1089_v36 = vadd.f32 %v2521_v15, %v1088_v24  ;;  %v1345_v37 = vpop.f32.mrb[52].mxu0  ;;  %v1090_v38 = vpop.f32.mrb[53].mxu1 }
 0x17e   :  { %v1347_v22 = vpop.f32.mrb[53].mxu0  ;;  %v1091_v40 = vpop.f32.mrb[54].mxu1 }
 0x17f   :  { %1566 = vst.msk [vmem:[%s2722_s3 + $0x18] sm:$0xff] %vm1562_vm0, %v1551_v29  ;;  %v1552_v42 = vmax.f32 %v2553_v43, %v1538_v34  ;;  %v1346_v31 = vadd.f32 %v1345_v37, %v1089_v36  ;;  %v1092_v44 = vadd.f32 %v2521_v15, %v1091_v40  ;;  %v1348_v46 = vpop.f32.mrb[54].mxu0  ;;  %v1093_v47 = vpop.f32.mrb[55].mxu1 }
 0x180   :  { %v1350_v39 = vpop.f32.mrb[55].mxu0 }
 0x181   :  { %1567 = vst.msk [vmem:[%s2722_s3 + $0x20] sm:$0xff] %vm1562_vm0, %v1552_v42  ;;  %v1490_v50 = vmax.f32 %v1346_v31, 0.0  ;;  %v1349_v51 = vadd.f32 %v1348_v46, %v1092_v44 }
 0x183   :  { %v1539_v41 = vmax.f32 %v1483_v49, %v1490_v50  ;;  %v1491_v54 = vmax.f32 %v1349_v51, 0.0 }
 0x184   :  { %v1096_v43 = vpop.f32.mrb[56].mxu1 }
 0x185   :  { %v1553_v48 = vmax.f32 %v2559_v58, %v1539_v41  ;;  %v1540_v55 = vmax.f32 %v1484_v52, %v1491_v54  ;;  %v1097_v56 = vadd.f32 %v2521_v15, %v1096_v43  ;;  %v1353_v57 = vpop.f32.mrb[56].mxu0  ;;  %v1098_v59 = vpop.f32.mrb[57].mxu1 }
 0x186   :  { %v1355_v35 = vpop.f32.mrb[57].mxu0  ;;  %v1099_v61 = vpop.f32.mrb[58].mxu1 }
 0x187   :  { %1568 = vst.msk [vmem:[%s2722_s3 + $0x28] sm:$0xff] %vm1562_vm0, %v1553_v48  ;;  %v1554_v63 = vmax.f32 %v2561_v62, %v1540_v55  ;;  %v1354_v45 = vadd.f32 %v1353_v57, %v1097_v56  ;;  %v1100_v0 = vadd.f32 %v2521_v15, %v1099_v61  ;;  %v1356_v1 = vpop.f32.mrb[58].mxu0  ;;  %v1101_v2 = vpop.f32.mrb[59].mxu1 }
 0x188   :  { %v1358_v58 = vpop.f32.mrb[59].mxu0 }
 0x189   :  { %1569 = vst.msk [vmem:[%s2722_s3 + $0x30] sm:$0xff] %vm1562_vm0, %v1554_v63  ;;  %v1357_v3 = vadd.f32 %v1356_v1, %v1100_v0  ;;  %v1492_v42 = vmax.f32 %v1354_v45, 0.0 }
 0x18b   :  { %v1493_v55 = vmax.f32 %v1357_v3, 0.0 }
 0x18c   :  { %v1104_v6 = vpop.f32.mrb[60].mxu1 }
 0x18d   :  { %v1105_v53 = vadd.f32 %v2521_v15, %v1104_v6  ;;  %v1361_v4 = vpop.f32.mrb[60].mxu0  ;;  %v1106_v7 = vpop.f32.mrb[61].mxu1 }
 0x18e   :  { %v1363_v8 = vpop.f32.mrb[61].mxu0  ;;  %v1107_v60 = vpop.f32.mrb[62].mxu1 }
 0x18f   :  { %v1362_v62 = vadd.f32 %v1361_v4, %v1105_v53  ;;  %v1108_v10 = vadd.f32 %v2521_v15, %v1107_v60  ;;  %v1364_v11 = vpop.f32.mrb[62].mxu0  ;;  %v1109_v5 = vpop.f32.mrb[63].mxu1 }
 0x190   :  { %v1366_v12 = vpop.f32.mrb[63].mxu0 }
 0x191   :  { %v1365_v13 = vadd.f32 %v1364_v11, %v1108_v10  ;;  %v1494_v59 = vmax.f32 %v1362_v62, 0.0 }
 0x193   :  { %v1495_v60 = vmax.f32 %v1365_v13, 0.0 }
 0x194   :  { %v1112_v14 = vpop.f32.mrb[64].mxu1 }
 0x195   :  { %v1113_v17 = vadd.f32 %v2521_v15, %v1112_v14  ;;  %v1369_v18 = vpop.f32.mrb[64].mxu0  ;;  %v1114_v9 = vpop.f32.mrb[65].mxu1 }
 0x196   :  { %v1371_v19 = vpop.f32.mrb[65].mxu0  ;;  %v1115_v16 = vpop.f32.mrb[66].mxu1 }
 0x197   :  { %v1370_v20 = vadd.f32 %v1369_v18, %v1113_v17  ;;  %v1116_v23 = vadd.f32 %v2521_v15, %v1115_v16  ;;  %v1372_v25 = vpop.f32.mrb[66].mxu0  ;;  %v1117_v21 = vpop.f32.mrb[67].mxu1 }
 0x198   :  { %v1374_v26 = vpop.f32.mrb[67].mxu0 }
 0x199   :  { %v2630_v27 = vadd.f32 %v1372_v25, %v1116_v23  ;;  %v1496_v11 = vmax.f32 %v1370_v20, 0.0 }
 0x19b   :  { %v1497_v20 = vmax.f32 %v2630_v27, 0.0 }
 0x19c   :  { %v1120_v28 = vpop.f32.mrb[68].mxu1 }
 0x19d   :  { %v1121_v30 = vadd.f32 %v2521_v15, %v1120_v28  ;;  %v1377_v32 = vpop.f32.mrb[68].mxu0  ;;  %v1122_v33 = vpop.f32.mrb[69].mxu1 }
 0x19e   :  { %v1379_v24 = vpop.f32.mrb[69].mxu0  ;;  %v1123_v29 = vpop.f32.mrb[70].mxu1 }
 0x19f   :  { %v2633_v34 = vadd.f32 %v1377_v32, %v1121_v30  ;;  %v1124_v36 = vadd.f32 %v2521_v15, %v1123_v29  ;;  %v1380_v37 = vpop.f32.mrb[70].mxu0  ;;  %v1125_v38 = vpop.f32.mrb[71].mxu1 }
 0x1a0   :  { %v1382_v22 = vpop.f32.mrb[71].mxu0 }
 0x1a1   :  { %v1381_v40 = vadd.f32 %v1380_v37, %v1124_v36  ;;  %v1498_v33 = vmax.f32 %v2633_v34, 0.0 }
 0x1a3   :  { %v1499_v31 = vmax.f32 %v1381_v40, 0.0 }
 0x1a4   :  { %v1128_v44 = vpop.f32.mrb[72].mxu1 }
 0x1a5   :  { %v2636_v46 = vmax.f32 %v1492_v42, %v1499_v31  ;;  %v1129_v47 = vadd.f32 %v2521_v15, %v1128_v44  ;;  %v1385_v39 = vpop.f32.mrb[72].mxu0  ;;  %v1130_v49 = vpop.f32.mrb[73].mxu1 }
 0x1a6   :  { %v1387_v50 = vpop.f32.mrb[73].mxu0  ;;  %v1131_v51 = vpop.f32.mrb[74].mxu1 }
 0x1a7   :  { %v1386_v52 = vadd.f32 %v1385_v39, %v1129_v47  ;;  %v1132_v41 = vadd.f32 %v2521_v15, %v1131_v51  ;;  %v1388_v54 = vpop.f32.mrb[74].mxu0  ;;  %v1133_v43 = vpop.f32.mrb[75].mxu1 }
 0x1a8   :  { %v1390_v48 = vpop.f32.mrb[75].mxu0 }
 0x1a9   :  { %v1500_v56 = vmax.f32 %v1386_v52, 0.0  ;;  %v1389_v57 = vadd.f32 %v1388_v54, %v1132_v41 }
 0x1ab   :  { %v2640_v35 = vmax.f32 %v1493_v55, %v1500_v56  ;;  %v1501_v61 = vmax.f32 %v1389_v57, 0.0 }
 0x1ac   :  { %v1136_v63 = vpop.f32.mrb[76].mxu1 }
 0x1ad   :  { %v2642_v45 = vmax.f32 %v1494_v59, %v1501_v61  ;;  %v1137_v0 = vadd.f32 %v2521_v15, %v1136_v63  ;;  %v1393_v1 = vpop.f32.mrb[76].mxu0  ;;  %v1138_v2 = vpop.f32.mrb[77].mxu1 }
 0x1ae   :  { %v1395_v58 = vpop.f32.mrb[77].mxu0  ;;  %v1139_v6 = vpop.f32.mrb[78].mxu1 }
 0x1af   :  { %v1394_v53 = vadd.f32 %v1393_v1, %v1137_v0  ;;  %v1140_v4 = vadd.f32 %v2521_v15, %v1139_v6  ;;  %v1396_v7 = vpop.f32.mrb[78].mxu0  ;;  %v1141_v3 = vpop.f32.mrb[79].mxu1 }
 0x1b0   :  { %v1398_v8 = vpop.f32.mrb[79].mxu0 }
 0x1b1   :  { %v1502_v62 = vmax.f32 %v1394_v53, 0.0  ;;  %v1397_v10 = vadd.f32 %v1396_v7, %v1140_v4 }
 0x1b3   :  { %v2646_v5 = vmax.f32 %v1495_v60, %v1502_v62  ;;  %v1503_v12 = vmax.f32 %v1397_v10, 0.0 }
 0x1b4   :  { %v1144_v14 = vpop.f32.mrb[80].mxu1 }
 0x1b5   :  { %v2648_v17 = vmax.f32 %v1496_v11, %v1503_v12  ;;  %v1145_v18 = vadd.f32 %v2521_v15, %v1144_v14  ;;  %v1401_v9 = vpop.f32.mrb[80].mxu0  ;;  %v1146_v19 = vpop.f32.mrb[81].mxu1 }
 0x1b6   :  { %v1403_v16 = vpop.f32.mrb[81].mxu0  ;;  %v1147_v23 = vpop.f32.mrb[82].mxu1 }
 0x1b7   :  { %v1402_v25 = vadd.f32 %v1401_v9, %v1145_v18  ;;  %v1148_v21 = vadd.f32 %v2521_v15, %v1147_v23  ;;  %v1404_v26 = vpop.f32.mrb[82].mxu0  ;;  %v1149_v13 = vpop.f32.mrb[83].mxu1 }
 0x1b8   :  { %v1406_v28 = vpop.f32.mrb[83].mxu0 }
 0x1b9   :  { %v1504_v30 = vmax.f32 %v1402_v25, 0.0  ;;  %v1405_v32 = vadd.f32 %v1404_v26, %v1148_v21 }
 0x1bb   :  { %v2654_v24 = vmax.f32 %v1497_v20, %v1504_v30  ;;  %v1505_v29 = vmax.f32 %v1405_v32, 0.0 }
 0x1bc   :  { %v1152_v36 = vpop.f32.mrb[84].mxu1 }
 0x1bd   :  { %v2656_v37 = vmax.f32 %v1498_v33, %v1505_v29  ;;  %v1153_v38 = vadd.f32 %v2521_v15, %v1152_v36  ;;  %v1409_v22 = vpop.f32.mrb[84].mxu0  ;;  %v1154_v40 = vpop.f32.mrb[85].mxu1 }
 0x1be   :  { %v1411_v42 = vpop.f32.mrb[85].mxu0  ;;  %v1155_v31 = vpop.f32.mrb[86].mxu1 }
 0x1bf   :  { %v1410_v44 = vadd.f32 %v1409_v22, %v1153_v38  ;;  %v1156_v47 = vadd.f32 %v2521_v15, %v1155_v31  ;;  %v1412_v27 = vpop.f32.mrb[86].mxu0  ;;  %v1157_v39 = vpop.f32.mrb[87].mxu1 }
 0x1c0   :  { %v1414_v49 = vpop.f32.mrb[87].mxu0 }
 0x1c1   :  { %v1413_v50 = vadd.f32 %v1412_v27, %v1156_v47  ;;  %v1506_v26 = vmax.f32 %v1410_v44, 0.0 }
 0x1c3   :  { %v1507_v27 = vmax.f32 %v1413_v50, 0.0 }
 0x1c4   :  { %v1160_v34 = vpop.f32.mrb[88].mxu1 }
 0x1c5   :  { %v1161_v51 = vadd.f32 %v2521_v15, %v1160_v34  ;;  %v1417_v52 = vpop.f32.mrb[88].mxu0  ;;  %v1162_v41 = vpop.f32.mrb[89].mxu1 }
 0x1c6   :  { %v1419_v54 = vpop.f32.mrb[89].mxu0  ;;  %v1163_v43 = vpop.f32.mrb[90].mxu1 }
 0x1c7   :  { %v1418_v48 = vadd.f32 %v1417_v52, %v1161_v51  ;;  %v1164_v55 = vadd.f32 %v2521_v15, %v1163_v43  ;;  %v1420_v56 = vpop.f32.mrb[90].mxu0  ;;  %v1165_v57 = vpop.f32.mrb[91].mxu1 }
 0x1c8   :  { %v1422_v59 = vpop.f32.mrb[91].mxu0 }
 0x1c9   :  { %v2662_v61 = vadd.f32 %v1420_v56, %v1164_v55  ;;  %v1508_v49 = vmax.f32 %v1418_v48, 0.0 }
 0x1cc   :  { %v1168_v63 = vpop.f32.mrb[92].mxu1 }
 0x1cd   :  { %v1169_v0 = vadd.f32 %v2521_v15, %v1168_v63  ;;  %v1425_v1 = vpop.f32.mrb[92].mxu0  ;;  %v1170_v2 = vpop.f32.mrb[93].mxu1 }
 0x1ce   :  { %v1427_v58 = vpop.f32.mrb[93].mxu0  ;;  %v1171_v6 = vpop.f32.mrb[94].mxu1 }
 0x1cf   :  { %v2665_v53 = vadd.f32 %v1425_v1, %v1169_v0  ;;  %v1172_v4 = vadd.f32 %v2521_v15, %v1171_v6  ;;  %v1428_v7 = vpop.f32.mrb[94].mxu0  ;;  %v1173_v3 = vpop.f32.mrb[95].mxu1  ;;  %v1509_v1 = vmax.f32 %v2662_v61, 0.0 }
 0x1d0   :  { %v1430_v8 = vpop.f32.mrb[95].mxu0 }
 0x1d1   :  { %v2668_v60 = vadd.f32 %v1428_v7, %v1172_v4  ;;  %v1510_v6 = vmax.f32 %v2665_v53, 0.0 }
 0x1d4   :  { %v1176_v62 = vpop.f32.mrb[96].mxu1 }
 0x1d5   :  { %v1177_v10 = vadd.f32 %v2521_v15, %v1176_v62  ;;  %v1433_v11 = vpop.f32.mrb[96].mxu0  ;;  %v1178_v12 = vpop.f32.mrb[97].mxu1 }
 0x1d6   :  { %v1435_v14 = vpop.f32.mrb[97].mxu0  ;;  %v1179_v18 = vpop.f32.mrb[98].mxu1 }
 0x1d7   :  { %v2671_v9 = vadd.f32 %v1433_v11, %v1177_v10  ;;  %v1180_v19 = vadd.f32 %v2521_v15, %v1179_v18  ;;  %v1436_v16 = vpop.f32.mrb[98].mxu0  ;;  %v1181_v23 = vpop.f32.mrb[99].mxu1 }
 0x1d8   :  { %v1438_v25 = vpop.f32.mrb[99].mxu0  ;;  %v1511_v23 = vmax.f32 %v2668_v60, 0.0 }
 0x1d9   :  { %v1437_v21 = vadd.f32 %v1436_v16, %v1180_v19 }
 0x1db   :  { %v1513_v13 = vmax.f32 %v1437_v21, 0.0 }
 0x1dc   :  { %v1184_v28 = vpop.f32.mrb[100].mxu1 }
 0x1dd   :  { %v1541_v20 = vmax.f32 %v1506_v26, %v1513_v13  ;;  %v1185_v30 = vadd.f32 %v2521_v15, %v1184_v28  ;;  %v1441_v32 = vpop.f32.mrb[100].mxu0  ;;  %v1186_v33 = vpop.f32.mrb[101].mxu1  ;;  %v1512_v26 = vmax.f32 %v2671_v9, 0.0 }
 0x1de   :  { %v1443_v29 = vpop.f32.mrb[101].mxu0  ;;  %v1187_v36 = vpop.f32.mrb[102].mxu1 }
 0x1df   :  { %v1555_v38 = vmax.f32 %v2636_v46, %v1541_v20  ;;  %v1442_v22 = vadd.f32 %v1441_v32, %v1185_v30  ;;  %v1188_v40 = vadd.f32 %v2521_v15, %v1187_v36  ;;  %v1444_v42 = vpop.f32.mrb[102].mxu0  ;;  %v1189_v31 = vpop.f32.mrb[103].mxu1 }
 0x1e0   :  { %v1446_v47 = vpop.f32.mrb[103].mxu0 }
 0x1e1   :  { %1570 = vst.msk [vmem:[%s2722_s3 + $0x38] sm:$0xff] %vm1562_vm0, %v1555_v38  ;;  %v1514_v44 = vmax.f32 %v1442_v22, 0.0  ;;  %v1445_v39 = vadd.f32 %v1444_v42, %v1188_v40 }
 0x1e3   :  { %v1542_v34 = vmax.f32 %v1507_v27, %v1514_v44  ;;  %v1515_v51 = vmax.f32 %v1445_v39, 0.0 }
 0x1e4   :  { %v1192_v52 = vpop.f32.mrb[104].mxu1 }
 0x1e5   :  { %v1556_v46 = vmax.f32 %v2640_v35, %v1542_v34  ;;  %v1543_v41 = vmax.f32 %v1508_v49, %v1515_v51  ;;  %v1193_v54 = vadd.f32 %v2521_v15, %v1192_v52  ;;  %v1449_v43 = vpop.f32.mrb[104].mxu0  ;;  %v1194_v55 = vpop.f32.mrb[105].mxu1 }
 0x1e6   :  { %v1451_v56 = vpop.f32.mrb[105].mxu0  ;;  %v1195_v50 = vpop.f32.mrb[106].mxu1 }
 0x1e7   :  { %1571 = vst.msk [vmem:[%s2722_s3 + $0x40] sm:$0xff] %vm1562_vm0, %v1556_v46  ;;  %v1557_v57 = vmax.f32 %v2642_v45, %v1543_v41  ;;  %v1450_v48 = vadd.f32 %v1449_v43, %v1193_v54  ;;  %v1196_v59 = vadd.f32 %v2521_v15, %v1195_v50  ;;  %v1452_v63 = vpop.f32.mrb[106].mxu0  ;;  %v1197_v0 = vpop.f32.mrb[107].mxu1 }
 0x1e8   :  { %v1454_v35 = vpop.f32.mrb[107].mxu0 }
 0x1e9   :  { %1572 = vst.msk [vmem:[%s2722_s3 + $0x48] sm:$0xff] %vm1562_vm0, %v1557_v57  ;;  %v1516_v2 = vmax.f32 %v1450_v48, 0.0  ;;  %v1453_v58 = vadd.f32 %v1452_v63, %v1196_v59 }
 0x1eb   :  { %v1544_v4 = vmax.f32 %v1509_v1, %v1516_v2  ;;  %v1517_v7 = vmax.f32 %v1453_v58, 0.0 }
 0x1ec   :  { %v1200_v45 = vpop.f32.mrb[108].mxu1 }
 0x1ed   :  { %v1558_v3 = vmax.f32 %v2646_v5, %v1544_v4  ;;  %v1545_v8 = vmax.f32 %v1510_v6, %v1517_v7  ;;  %v1201_v62 = vadd.f32 %v2521_v15, %v1200_v45  ;;  %v1457_v10 = vpop.f32.mrb[108].mxu0  ;;  %v1202_v11 = vpop.f32.mrb[109].mxu1 }
 0x1ee   :  { %v1459_v61 = vpop.f32.mrb[109].mxu0  ;;  %v1203_v12 = vpop.f32.mrb[110].mxu1 }
 0x1ef   :  { %1573 = vst.msk [vmem:[%s2722_s3 + $0x50] sm:$0xff] %vm1562_vm0, %v1558_v3  ;;  %v1559_v14 = vmax.f32 %v2648_v17, %v1545_v8  ;;  %v1458_v53 = vadd.f32 %v1457_v10, %v1201_v62  ;;  %v1204_v18 = vadd.f32 %v2521_v15, %v1203_v12  ;;  %v1460_v19 = vpop.f32.mrb[110].mxu0  ;;  %v1205_v16 = vpop.f32.mrb[111].mxu1 }
 0x1f0   :  { %v1462_v5 = vpop.f32.mrb[111].mxu0 }
 0x1f1   :  { %1574 = vst.msk [vmem:[%s2722_s3 + $0x58] sm:$0xff] %vm1562_vm0, %v1559_v14  ;;  %v1518_v25 = vmax.f32 %v1458_v53, 0.0  ;;  %v1461_v21 = vadd.f32 %v1460_v19, %v1204_v18 }
 0x1f3   :  { %v1546_v13 = vmax.f32 %v1511_v23, %v1518_v25  ;;  %v1519_v28 = vmax.f32 %v1461_v21, 0.0 }
 0x1f5   :  { %v1560_v17 = vmax.f32 %v2654_v24, %v1546_v13  ;;  %v1547_v20 = vmax.f32 %v1512_v26, %v1519_v28 }
 0x1f7   :  { %1575 = vst.msk [vmem:[%s2722_s3 + $0x60] sm:$0xff] %vm1562_vm0, %v1560_v17  ;;  %v1561_v15 = vmax.f32 %v2656_v37, %v1547_v20 }
 0x1f9   :  { %1576 = vst.msk [vmem:[%s2722_s3 + $0x68] sm:$0xff] %vm1562_vm0, %v1561_v15 }

// kernel: cnn_forward.5
= control target key start
LH: loop header
LB: loop body
LE: loop exit
PB: predicated region body
PF: predicated region fallthrough
CT: control target
= control target key end

     0   :  { %v28_v28 = vlaneseq  ;;  %v1571_v36 = vmov 1983009808   ;;  %s1924_s0 = inlined_call_operand.vmem [shape: f32[2,1568], index: 0, kind: input, shape index: {}]   ;;  %s1925_s1 = inlined_call_operand.vmem [shape: bf16[1568,128], index: 1, kind: input, shape index: {}]   ;;  %s1926_s2 = inlined_call_operand.vmem [shape: f32[1,128], index: 2, kind: input, shape index: {}]   ;;  %s1927_s3 = inlined_call_operand.hbm [shape: f32[2,128], index: 3, kind: output, shape index: {}]  }
   0x1   :  { %v1446_v0 = vld [vmem:[%s1925_s1 + $0x40] sm:$0xff]   ;;  %v1450_v4 = vld [vmem:[%s1925_s1 + $0x48] sm:$0xff]   ;;  %v1454_v8 = vld [vmem:[%s1925_s1 + $0x50] sm:$0xff]   ;;  %v26_v37 = vunpack.c.l.s4 %v1571_v36 }
   0x2   :  { %v1447_v1 = vld [vmem:[%s1925_s1] sm:$0xff]   ;;  %1299 = vmatprep.subr.bf16.mxu0 %v1446_v0  ;;  %v1451_v5 = vld [vmem:[%s1925_s1 + $0x8] sm:$0xff]   ;;  %v1455_v9 = vld [vmem:[%s1925_s1 + $0x10] sm:$0xff]   ;;  %v29_v33 = vshrl.u32 %v28_v28, 7 }
   0x3   :  { %v1448_v2 = vld [vmem:[%s1925_s1 + $0xc0] sm:$0xff]   ;;  %1300 = vmatpush3.bf16.msra.mxu0 %v1447_v1  ;;  %v1452_v6 = vld [vmem:[%s1925_s1 + $0xc8] sm:$0xff]   ;;  %v1456_v10 = vld [vmem:[%s1925_s1 + $0xd0] sm:$0xff]   ;;  %v27_v38 = vunpack.c.0.s8 %v26_v37 }
   0x4   :  { %v1449_v3 = vld [vmem:[%s1925_s1 + $0x80] sm:$0xff]   ;;  %1321 = vmatprep.subr.bf16.mxu1 %v1448_v2  ;;  %1301 = vmatprep.subr.bf16.mxu0 %v1450_v4  ;;  %v1453_v7 = vld [vmem:[%s1925_s1 + $0x88] sm:$0xff]   ;;  %v1457_v11 = vld [vmem:[%s1925_s1 + $0x90] sm:$0xff]  }
   0x5   :  { %1322 = vmatpush3.bf16.msra.mxu1 %v1449_v3  ;;  %v1458_v12 = vld [vmem:[%s1925_s1 + $0x58] sm:$0xff]   ;;  %v1462_v16 = vld [vmem:[%s1925_s1 + $0x60] sm:$0xff]   ;;  %v1466_v20 = vld [vmem:[%s1925_s1 + $0x68] sm:$0xff]   ;;  %v1700_v41 = vsub.s32 %v27_v38, %v29_v33 }
   0x6   :  { %1323 = vmatprep.subr.bf16.mxu1 %v1452_v6  ;;  %v1459_v13 = vld [vmem:[%s1925_s1 + $0x18] sm:$0xff]   ;;  %v1463_v17 = vld [vmem:[%s1925_s1 + $0x20] sm:$0xff]   ;;  %v1467_v21 = vld [vmem:[%s1925_s1 + $0x28] sm:$0xff]  }
   0x7   :  { %1302 = vmatpush3.bf16.msra.mxu0 %v1451_v5  ;;  %v1460_v14 = vld [vmem:[%s1925_s1 + $0xd8] sm:$0xff]   ;;  %v1464_v18 = vld [vmem:[%s1925_s1 + $0xe0] sm:$0xff]   ;;  %v1468_v22 = vld [vmem:[%s1925_s1 + $0xe8] sm:$0xff]  }
   0x8   :  { %1303 = vmatprep.subr.bf16.mxu0 %v1454_v8  ;;  %v1461_v15 = vld [vmem:[%s1925_s1 + $0x98] sm:$0xff]   ;;  %v1465_v19 = vld [vmem:[%s1925_s1 + $0xa0] sm:$0xff]   ;;  %v1469_v23 = vld [vmem:[%s1925_s1 + $0xa8] sm:$0xff]  }
   0x9   :  { %1324 = vmatpush3.bf16.msra.mxu1 %v1453_v7  ;;  %v1470_v24 = vld [vmem:[%s1925_s1 + $0x70] sm:$0xff]   ;;  %v1474_v29 = vld [vmem:[%s1925_s1 + $0x78] sm:$0xff]   ;;  %v16_v34 = vld [vmem:[%s1924_s0] sm:$0xff] }
   0xa   :  { %1325 = vmatprep.subr.bf16.mxu1 %v1456_v10  ;;  %v1471_v25 = vld [vmem:[%s1925_s1 + $0x30] sm:$0xff]   ;;  %v1475_v30 = vld [vmem:[%s1925_s1 + $0x38] sm:$0xff]   ;;  %v1478_v35 = vld [vmem:[%s1925_s1 + $0x140] sm:$0xff]   ;;  %v24_v39 = vcombine.high %v16_v34, %v16_v34  ;;  %v31_v42 = vrot.slane %v16_v34, %v1700_v41 }
   0xb   :  { %1304 = vmatpush3.bf16.msra.mxu0 %v1455_v9  ;;  %v1472_v26 = vld [vmem:[%s1925_s1 + $0xf0] sm:$0xff]   ;;  %v1476_v31 = vld [vmem:[%s1925_s1 + $0xf8] sm:$0xff]   ;;  %v1481_v40 = vld [vmem:[%s1925_s1 + $0x1c0] sm:$0xff]  }
   0xc   :  { %1305 = vmatprep.subr.bf16.mxu0 %v1458_v12  ;;  %v1473_v27 = vld [vmem:[%s1925_s1 + $0xb0] sm:$0xff]   ;;  %v1477_v32 = vld [vmem:[%s1925_s1 + $0xb8] sm:$0xff]   ;;  %v38_v43 = vrot.slane %v24_v39, %v1700_v41  ;;  %v39_v44 = vcombine.high %v31_v42, %v31_v42  ;;  %v1480_v46 = vld [vmem:[%s1925_s1 + $0x100] sm:$0xff]   ;;  %v95_v47 = vpack.c.bf16 %v31_v42, %v31_v42 }
   0xd   :  { %1326 = vmatpush3.bf16.msra.mxu1 %v1457_v11  ;;  %v1482_v49 = vld [vmem:[%s1925_s1 + $0x180] sm:$0xff]   ;;  %v1483_v52 = vld [vmem:[%s1925_s1 + $0x148] sm:$0xff]   ;;  %v1487_v56 = vld [vmem:[%s1925_s1 + $0x150] sm:$0xff]  }
   0xe   :  { %1327 = vmatprep.subr.bf16.mxu1 %v1460_v14  ;;  %v40_v45 = vcombine.high %v38_v43, %v38_v43  ;;  %v97_v48 = vpack.c.bf16 %v38_v43, %v38_v43  ;;  %v96_v50 = vpack.c.bf16 %v39_v44, %v39_v44  ;;  %v1485_v53 = vld [vmem:[%s1925_s1 + $0x1c8] sm:$0xff]   ;;  %v1489_v57 = vld [vmem:[%s1925_s1 + $0x1d0] sm:$0xff]   ;;  %v1491_v60 = vld [vmem:[%s1925_s1 + $0x158] sm:$0xff]  }
   0xf   :  { %1306 = vmatpush3.bf16.msra.mxu0 %v1459_v13  ;;  %v1484_v54 = vld [vmem:[%s1925_s1 + $0x108] sm:$0xff]   ;;  %v1488_v58 = vld [vmem:[%s1925_s1 + $0x110] sm:$0xff]   ;;  %v1493_v61 = vld [vmem:[%s1925_s1 + $0x1d8] sm:$0xff]  }
  0x10   :  { %1307 = vmatprep.subr.bf16.mxu0 %v1462_v16  ;;  %v98_v51 = vpack.c.bf16 %v40_v45, %v40_v45  ;;  %935 = vmatprep.mubr.bf16.mxu0 %v96_v50  ;;  %v1486_v55 = vld [vmem:[%s1925_s1 + $0x188] sm:$0xff]   ;;  %v1490_v59 = vld [vmem:[%s1925_s1 + $0x190] sm:$0xff]   ;;  %v1492_v62 = vld [vmem:[%s1925_s1 + $0x118] sm:$0xff]  }
  0x11   :  { %1328 = vmatpush3.bf16.msra.mxu1 %v1461_v15  ;;  %v1494_v63 = vld [vmem:[%s1925_s1 + $0x198] sm:$0xff]   ;;  %v1495_v0 = vld [vmem:[%s1925_s1 + $0x160] sm:$0xff]   ;;  %v1499_v4 = vld [vmem:[%s1925_s1 + $0x168] sm:$0xff]  }
  0x12   :  { %1329 = vmatprep.subr.bf16.mxu1 %v1464_v18  ;;  %975 = vmatprep.mubr.bf16.mxu1 %v98_v51  ;;  %v1497_v1 = vld [vmem:[%s1925_s1 + $0x1e0] sm:$0xff]   ;;  %v1501_v5 = vld [vmem:[%s1925_s1 + $0x1e8] sm:$0xff]   ;;  %v1503_v8 = vld [vmem:[%s1925_s1 + $0x170] sm:$0xff]  }
  0x13   :  { %1308 = vmatpush3.bf16.msra.mxu0 %v1463_v17  ;;  %v1496_v2 = vld [vmem:[%s1925_s1 + $0x120] sm:$0xff]   ;;  %v1500_v6 = vld [vmem:[%s1925_s1 + $0x128] sm:$0xff]   ;;  %v1505_v9 = vld [vmem:[%s1925_s1 + $0x1f0] sm:$0xff]  }
  0x14   :  { %1309 = vmatprep.subr.bf16.mxu0 %v1466_v20  ;;  %v1498_v3 = vld [vmem:[%s1925_s1 + $0x1a0] sm:$0xff]   ;;  %v1502_v7 = vld [vmem:[%s1925_s1 + $0x1a8] sm:$0xff]   ;;  %v1504_v11 = vld [vmem:[%s1925_s1 + $0x130] sm:$0xff]  }
  0x15   :  { %1330 = vmatpush3.bf16.msra.mxu1 %v1465_v19  ;;  %v17_v10 = vld [vmem:[%s1924_s0 + $0x8] sm:$0xff]  ;;  %v1506_v14 = vld [vmem:[%s1925_s1 + $0x1b0] sm:$0xff]   ;;  %v1507_v15 = vld [vmem:[%s1925_s1 + $0x178] sm:$0xff]  }
  0x16   :  { %1331 = vmatprep.subr.bf16.mxu1 %v1468_v22  ;;  %v48_v12 = vrot.slane %v17_v10, %v1700_v41  ;;  %v41_v13 = vcombine.high %v17_v10, %v17_v10  ;;  %v1509_v18 = vld [vmem:[%s1925_s1 + $0x1f8] sm:$0xff]   ;;  %v1519_v33 = vld [vmem:[%s1925_s1 + $0x288] sm:$0xff]   ;;  %v1520_v34 = vld [vmem:[%s1925_s1 + $0x250] sm:$0xff]  }
  0x17   :  { %1310 = vmatpush3.bf16.msra.mxu0 %v1467_v21  ;;  %v1508_v19 = vld [vmem:[%s1925_s1 + $0x138] sm:$0xff]   ;;  %v1521_v36 = vld [vmem:[%s1925_s1 + $0x210] sm:$0xff]   ;;  %v1528_v43 = vld [vmem:[%s1925_s1 + $0x260] sm:$0xff]  }
  0x18   :  { %1311 = vmatprep.subr.bf16.mxu0 %v1470_v24  ;;  %v56_v16 = vcombine.high %v48_v12, %v48_v12  ;;  %v55_v17 = vrot.slane %v41_v13, %v1700_v41  ;;  %v1510_v22 = vld [vmem:[%s1925_s1 + $0x1b8] sm:$0xff]   ;;  %v1523_v37 = vld [vmem:[%s1925_s1 + $0x290] sm:$0xff]   ;;  %v1530_v44 = vld [vmem:[%s1925_s1 + $0x2e0] sm:$0xff]  }
  0x19   :  { %1332 = vmatpush3.bf16.msra.mxu1 %v1469_v23  ;;  %v1511_v23 = vld [vmem:[%s1925_s1 + $0x240] sm:$0xff]   ;;  %v1524_v38 = vld [vmem:[%s1925_s1 + $0x258] sm:$0xff]   ;;  %v1535_v50 = vld [vmem:[%s1925_s1 + $0x2a8] sm:$0xff]  }
  0x1a   :  { %1333 = vmatprep.subr.bf16.mxu1 %v1472_v26  ;;  %v100_v20 = vpack.c.bf16 %v56_v16, %v56_v16  ;;  %v57_v21 = vcombine.high %v55_v17, %v55_v17  ;;  %v1513_v26 = vld [vmem:[%s1925_s1 + $0x200] sm:$0xff]   ;;  %v101_v28 = vpack.c.bf16 %v55_v17, %v55_v17  ;;  %v1526_v39 = vld [vmem:[%s1925_s1 + $0x2d8] sm:$0xff]   ;;  %v1536_v51 = vld [vmem:[%s1925_s1 + $0x270] sm:$0xff]  }
  0x1b   :  { %1312 = vmatpush3.bf16.msra.mxu0 %v1471_v25  ;;  %v1514_v25 = vld [vmem:[%s1925_s1 + $0x2c0] sm:$0xff]   ;;  %v1527_v42 = vld [vmem:[%s1925_s1 + $0x298] sm:$0xff]  }
  0x1c   :  { %1313 = vmatprep.subr.bf16.mxu0 %v1474_v29  ;;  %v102_v24 = vpack.c.bf16 %v57_v21, %v57_v21  ;;  %v1515_v29 = vld [vmem:[%s1925_s1 + $0x280] sm:$0xff]  }
  0x1d   :  { %1334 = vmatpush3.bf16.msra.mxu1 %v1473_v27  ;;  %v99_v27 = vpack.c.bf16 %v48_v12, %v48_v12  ;;  %v1529_v45 = vld [vmem:[%s1925_s1 + $0x220] sm:$0xff]  }
  0x1e   :  { %1335 = vmatprep.subr.bf16.mxu1 %v1476_v31  ;;  %v1518_v31 = vld [vmem:[%s1925_s1 + $0x2c8] sm:$0xff]  }
  0x1f   :  { %1314 = vmatpush3.bf16.msra.mxu0 %v1475_v30  ;;  %v1516_v30 = vld [vmem:[%s1925_s1 + $0x248] sm:$0xff]  }
  0x20   :  { %1343 = vmatprep.subr.bf16.mxu0 %v1478_v35  ;;  %v1522_v35 = vld [vmem:[%s1925_s1 + $0x2d0] sm:$0xff]  }
  0x21   :  { %1336 = vmatpush3.bf16.msra.mxu1 %v1477_v32  ;;  %v1517_v32 = vld [vmem:[%s1925_s1 + $0x208] sm:$0xff]  }
  0x22   :  { %1365 = vmatprep.subr.bf16.mxu1 %v1481_v40  ;;  %936 = vmatmul.mubr.bf16.vlgmr.msra.gmra.mrb[0].mxu0 %v95_v47  ;;  %v1525_v40 = vld [vmem:[%s1925_s1 + $0x218] sm:$0xff]   ;;  %v1532_v47 = vld [vmem:[%s1925_s1 + $0x268] sm:$0xff]  }
  0x23   :  { %1344 = vmatpush3.bf16.msra.mxu0 %v1480_v46  ;;  %1015 = vmatprep.mubr.bf16.mxu0 %v100_v20  ;;  %v1531_v46 = vld [vmem:[%s1925_s1 + $0x2a0] sm:$0xff]  }
  0x24   :  { %976 = vmatmul.mubr.bf16.vlgmr.msra.gmra.mrb[0].mxu1 %v97_v48  ;;  %1345 = vmatprep.subr.bf16.mxu0 %v1483_v52  ;;  %v1534_v48 = vld [vmem:[%s1925_s1 + $0x2e8] sm:$0xff]   ;;  %v1538_v52 = vld [vmem:[%s1925_s1 + $0x2f0] sm:$0xff]  }
  0x25   :  { %1366 = vmatpush3.bf16.msra.mxu1 %v1482_v49  ;;  %1055 = vmatprep.mubr.bf16.mxu1 %v102_v24  ;;  %v1533_v49 = vld [vmem:[%s1925_s1 + $0x228] sm:$0xff]  }
  0x26   :  { %1367 = vmatprep.subr.bf16.mxu1 %v1485_v53  ;;  %v18_v53 = vld [vmem:[%s1924_s0 + $0x10] sm:$0xff] }
  0x27   :  { %1346 = vmatpush3.bf16.msra.mxu0 %v1484_v54  ;;  %v65_v54 = vrot.slane %v18_v53, %v1700_v41 }
  0x28   :  { %1347 = vmatprep.subr.bf16.mxu0 %v1487_v56  ;;  %v1537_v56 = vld [vmem:[%s1925_s1 + $0x230] sm:$0xff]  }
  0x29   :  { %1368 = vmatpush3.bf16.msra.mxu1 %v1486_v55  ;;  %v58_v55 = vcombine.high %v18_v53, %v18_v53 }
  0x2a   :  { %1369 = vmatprep.subr.bf16.mxu1 %v1489_v57  ;;  %v1539_v57 = vld [vmem:[%s1925_s1 + $0x2b0] sm:$0xff]  }
  0x2b   :  { %1348 = vmatpush3.bf16.msra.mxu0 %v1488_v58  ;;  %v73_v58 = vcombine.high %v65_v54, %v65_v54 }
  0x2c   :  { %1349 = vmatprep.subr.bf16.mxu0 %v1491_v60 }
  0x2d   :  { %1370 = vmatpush3.bf16.msra.mxu1 %v1490_v59  ;;  %v72_v59 = vrot.slane %v58_v55, %v1700_v41 }
  0x2e   :  { %1371 = vmatprep.subr.bf16.mxu1 %v1493_v61 }
  0x2f   :  { %1350 = vmatpush3.bf16.msra.mxu0 %v1492_v62 }
  0x30   :  { %1351 = vmatprep.subr.bf16.mxu0 %v1495_v0 }
  0x31   :  { %1372 = vmatpush3.bf16.msra.mxu1 %v1494_v63 }
  0x32   :  { %1373 = vmatprep.subr.bf16.mxu1 %v1497_v1 }
  0x33   :  { %1352 = vmatpush3.bf16.msra.mxu0 %v1496_v2 }
  0x34   :  { %1353 = vmatprep.subr.bf16.mxu0 %v1499_v4 }
  0x35   :  { %1374 = vmatpush3.bf16.msra.mxu1 %v1498_v3 }
  0x36   :  { %1375 = vmatprep.subr.bf16.mxu1 %v1501_v5 }
  0x37   :  { %1354 = vmatpush3.bf16.msra.mxu0 %v1500_v6 }
  0x38   :  { %1355 = vmatprep.subr.bf16.mxu0 %v1503_v8 }
  0x39   :  { %1376 = vmatpush3.bf16.msra.mxu1 %v1502_v7 }
  0x3a   :  { %1377 = vmatprep.subr.bf16.mxu1 %v1505_v9 }
  0x3b   :  { %1356 = vmatpush3.bf16.msra.mxu0 %v1504_v11 }
  0x3c   :  { %1357 = vmatprep.subr.bf16.mxu0 %v1507_v15 }
  0x3d   :  { %1378 = vmatpush3.bf16.msra.mxu1 %v1506_v14 }
  0x3e   :  { %1379 = vmatprep.subr.bf16.mxu1 %v1509_v18 }
  0x3f   :  { %1358 = vmatpush3.bf16.msra.mxu0 %v1508_v19 }
  0x40   :  { %1387 = vmatprep.subr.bf16.mxu0 %v1511_v23 }
  0x41   :  { %1380 = vmatpush3.bf16.msra.mxu1 %v1510_v22 }
  0x42   :  { %1409 = vmatprep.subr.bf16.mxu1 %v1514_v25  ;;  %1016 = vmatmul.mubr.bf16.vlgmr.msra.gmra.mrb[4].mxu0 %v99_v27 }
  0x43   :  { %1388 = vmatpush3.bf16.msra.mxu0 %v1513_v26 }
  0x44   :  { %1056 = vmatmul.mubr.bf16.vlgmr.msra.gmra.mrb[4].mxu1 %v101_v28  ;;  %1389 = vmatprep.subr.bf16.mxu0 %v1516_v30 }
  0x45   :  { %1410 = vmatpush3.bf16.msra.mxu1 %v1515_v29 }
  0x46   :  { %1411 = vmatprep.subr.bf16.mxu1 %v1518_v31 }
  0x47   :  { %1390 = vmatpush3.bf16.msra.mxu0 %v1517_v32 }
  0x48   :  { %1391 = vmatprep.subr.bf16.mxu0 %v1520_v34 }
  0x49   :  { %1412 = vmatpush3.bf16.msra.mxu1 %v1519_v33 }
  0x4a   :  { %1413 = vmatprep.subr.bf16.mxu1 %v1522_v35 }
  0x4b   :  { %1392 = vmatpush3.bf16.msra.mxu0 %v1521_v36 }
  0x4c   :  { %1393 = vmatprep.subr.bf16.mxu0 %v1524_v38 }
  0x4d   :  { %1414 = vmatpush3.bf16.msra.mxu1 %v1523_v37 }
  0x4e   :  { %1415 = vmatprep.subr.bf16.mxu1 %v1526_v39 }
  0x4f   :  { %1394 = vmatpush3.bf16.msra.mxu0 %v1525_v40 }
  0x50   :  { %1395 = vmatprep.subr.bf16.mxu0 %v1528_v43 }
  0x51   :  { %1416 = vmatpush3.bf16.msra.mxu1 %v1527_v42 }
  0x52   :  { %1417 = vmatprep.subr.bf16.mxu1 %v1530_v44 }
  0x53   :  { %1396 = vmatpush3.bf16.msra.mxu0 %v1529_v45 }
  0x54   :  { %1397 = vmatprep.subr.bf16.mxu0 %v1532_v47 }
  0x55   :  { %1418 = vmatpush3.bf16.msra.mxu1 %v1531_v46 }
  0x56   :  { %1419 = vmatprep.subr.bf16.mxu1 %v1534_v48 }
  0x57   :  { %1398 = vmatpush3.bf16.msra.mxu0 %v1533_v49 }
  0x59   :  { %1420 = vmatpush3.bf16.msra.mxu1 %v1535_v50 }
  0x5a   :  { %8 = vsyncpa [#allocation3], 0  ;;  %1399 = vmatprep.subr.bf16.mxu0 %v1536_v51  ;;  %1421 = vmatprep.subr.bf16.mxu1 %v1538_v52  ;;  %v1540_v60 = vld [vmem:[%s1925_s1 + $0x278] sm:$0xff]   ;;  %v104_v62 = vpack.c.bf16 %v73_v58, %v73_v58  ;;  %v74_v63 = vcombine.high %v72_v59, %v72_v59  ;;  %v103_v2 = vpack.c.bf16 %v65_v54, %v65_v54  ;;  %v1545_v4 = vld [vmem:[%s1925_s1 + $0x300] sm:$0xff]   ;;  %v1572_v5 = vmov 0.0  }
  0x5b   :  { %v1542_v61 = vld [vmem:[%s1925_s1 + $0x2f8] sm:$0xff]   ;;  %1400 = vmatpush3.bf16.msra.mxu0 %v1537_v56  ;;  %v105_v3 = vpack.c.bf16 %v72_v59, %v72_v59  ;;  %v1546_v6 = vld [vmem:[%s1925_s1 + $0x308] sm:$0xff]   ;;  %vm1573_vm0 = vmmov 0   ;;  %vm899_vm1 = vcmask 261120   ;;  %v1199_v11 = vld [vmem:[%s1926_s2] ss:$0 sm:$0xff] }
  0x5c   :  { %v1541_v0 = vld [vmem:[%s1925_s1 + $0x238] sm:$0xff]   ;;  %v106_v1 = vpack.c.bf16 %v74_v63, %v74_v63  ;;  %1401 = vmatprep.subr.bf16.mxu0 %v1540_v60  ;;  %1095 = vmatprep.mubr.bf16.mxu0 %v104_v62 }
  0x5d   :  { %1422 = vmatpush3.bf16.msra.mxu1 %v1539_v57  ;;  %v1543_v41 = vld [vmem:[%s1925_s1 + $0x2b8] sm:$0xff]  }
  0x5e   :  { %1423 = vmatprep.subr.bf16.mxu1 %v1542_v61  ;;  %1135 = vmatprep.mubr.bf16.mxu1 %v106_v1  ;;  %v1198_v7 = vld.sshfl [vmem:[%s1924_s0 + $0x18] sm:$0x3 pattern:$0x76325410]  ;;  %s1574_s0 = smov [#allocation2]  }
  0x5f   :  { %1402 = vmatpush3.bf16.msra.mxu0 %v1541_v0  ;;  %v107_v8 = vpack.c.bf16 %v1198_v7, %v1198_v7  ;;  %s1190_s1 = sshll.u32 %s1574_s0, 4  ;;  %s1191_s1 = int_to_ptr.vmem [resolvable:$true] %s1190_s1 }
  0x60   :  { %1434 = vmatprep.subr.bf16.mxu0 %v1572_v5  ;;  %s1547_s2 = scalar_lea.vmem %s1191_s1, 32  ;;  %p1552_p1 = scmp.lt.s32.totalorder %s1191_s1, %s1191_s1 }
  0x61   :  { %1424 = vmatpush3.bf16.msra.mxu1 %v1543_v41  ;;  %p1548_p0 = scmp.ne.s32.totalorder %s1191_s1, %s1547_s2  ;;  %p1553_p2 = scmp.lt.s32.totalorder %s1547_s2, %s1547_s2 }
  0x62   :  { %1096 = vmatmul.mubr.bf16.vlgmr.msra.gmra.mrb[8].mxu0 %v103_v2 }
  0x63   :  { %1435 = vmatpush3.bf16.msra.mxu0 %v1545_v4  ;;  %1438 = vmatprep.mubr.msk.bf16.mxu0 %vm1573_vm0, %v1572_v5  ;;  %p1554_p3 = por %p1553_p2, %p1552_p1 }
  0x64   :  { %1136 = vmatmul.mubr.bf16.vlgmr.msra.gmra.mrb[8].mxu1 %v105_v3  ;;  %1436 = vmatprep.subr.bf16.mxu0 %v1572_v5 }
  0x65   :  { %p1555_p4 = pnand %p1554_p3, %p1548_p0 }
  0x67   :  { %1437 = vmatpush3.bf16.msra.mxu0 %v1546_v6 }
  0x6a   :  { %1439 = vmatmul.mubr.msk.bf16.vlgmr.msra.gmra.mrb[12].mxu0 %vm899_vm1, %v107_v8 }
  0xf5   :  { %v1315_v9 = vpop.f32.mrb[0].mxu0 }
  0xf6   :  { %v1316_v12 = vpop.f32.mrb[1].mxu0 }
  0xf7   :  { %v1337_v10 = vpop.f32.mrb[0].mxu1  ;;  %v1317_v14 = vadd.f32 %v1316_v12, %v1315_v9  ;;  %v1318_v15 = vpop.f32.mrb[2].mxu0 }
  0xf8   :  { %v1338_v13 = vpop.f32.mrb[1].mxu1  ;;  %v1319_v18 = vpop.f32.mrb[3].mxu0 }
  0xf9   :  { %v1339_v16 = vadd.f32 %v1338_v13, %v1337_v10  ;;  %v1340_v17 = vpop.f32.mrb[2].mxu1  ;;  %v938_v20 = vadd.f32 %v1317_v14, %v1199_v11 }
  0xfa   :  { %v1341_v19 = vpop.f32.mrb[3].mxu1 }
  0xfb   :  { %v978_v21 = vadd.f32 %v1339_v16, %v938_v20 }
 0x115   :  { %v1359_v22 = vpop.f32.mrb[4].mxu0 }
 0x116   :  { %v1360_v24 = vpop.f32.mrb[5].mxu0 }
 0x117   :  { %v1381_v23 = vpop.f32.mrb[4].mxu1  ;;  %v1361_v26 = vadd.f32 %v1360_v24, %v1359_v22  ;;  %v1362_v27 = vpop.f32.mrb[6].mxu0 }
 0x118   :  { %v1382_v25 = vpop.f32.mrb[5].mxu1  ;;  %v1363_v30 = vpop.f32.mrb[7].mxu0 }
 0x119   :  { %v1383_v28 = vadd.f32 %v1382_v25, %v1381_v23  ;;  %v1384_v29 = vpop.f32.mrb[6].mxu1  ;;  %v1018_v32 = vadd.f32 %v1361_v26, %v978_v21 }
 0x11a   :  { %v1385_v31 = vpop.f32.mrb[7].mxu1 }
 0x11b   :  { %v1058_v33 = vadd.f32 %v1383_v28, %v1018_v32 }
 0x135   :  { %v1403_v34 = vpop.f32.mrb[8].mxu0 }
 0x136   :  { %v1404_v36 = vpop.f32.mrb[9].mxu0 }
 0x137   :  { %v1425_v35 = vpop.f32.mrb[8].mxu1  ;;  %v1405_v38 = vadd.f32 %v1404_v36, %v1403_v34  ;;  %v1406_v39 = vpop.f32.mrb[10].mxu0 }
 0x138   :  { %v1426_v37 = vpop.f32.mrb[9].mxu1  ;;  %v1407_v43 = vpop.f32.mrb[11].mxu0 }
 0x139   :  { %v1427_v40 = vadd.f32 %v1426_v37, %v1425_v35  ;;  %v1428_v42 = vpop.f32.mrb[10].mxu1  ;;  %v1098_v45 = vadd.f32 %v1405_v38, %v1058_v33 }
 0x13a   :  { %v1429_v44 = vpop.f32.mrb[11].mxu1 }
 0x13b   :  { %v1138_v46 = vadd.f32 %v1427_v40, %v1098_v45 }
 0x13d   :  { %v1177_v47 = vpop.f32.mrb[12].mxu0 }
 0x13e   :  { %v1178_v48 = vadd.f32 %v1177_v47, %v1138_v46  ;;  %v1440_v49 = vpop.f32.mrb[13].mxu0 }
 0x13f   :  { %v1180_v50 = vpop.f32.mrb[14].mxu0 }
 0x140   :  { %1183 = vst [vmem:[#allocation2] sm:$0x3] %v1178_v48  ;;  %v1441_v51 = vpop.f32.mrb[15].mxu0 }
 0x141   :  { %1558 = shalt.err (!%p1555_p4)
}
 0x142   :  { %s1559_s4 = scalar_lea.hbm %s1927_s3, 32 }
 0x143   :  { %p1560_p5 = scmp.ne.s32.totalorder %s1927_s3, %s1559_s4  ;;  %p1563_p6 = scmp.lt.u32.totalorder %s1559_s4, %s1927_s3 }
 0x145   :  { %p1565_p7 = pnand %p1563_p6, %p1560_p5 }
 0x147   :  { %1568 = shalt.err (!%p1565_p7)
}
 0x148   :  { %1193 = dma.vmem_to_hbm [thread:$0]  %s1191_s1, 32, %s1927_s3, [#allocation3]  }
 0x149   :  { %1569 = dma.done.wait [#allocation3], 32  }
 0x14a   :  { %1570 = vsyncadd [#allocation3], 4294967264 }
 0x14b   :  { %1197 = vsyncpa [#allocation3], 1 }

</bundles_post_ra>
